<compile_context>
chip_gen: v7x
topology: tpu7x:2x2x1
jax: 0.10.0
libtpu: 0.0.40
codegen_flags: <defaults>
</compile_context>

<pallas_src>
import functools

import jax
import jax.numpy as jnp
from jax.experimental import pallas as pl
from jax.experimental.pallas import tpu as pltpu


# ----------------------- conv kernel: tap-accumulated matmul -----------------------

def _conv_taps_kernel(x_ref, w_ref, o_ref, *, kh, kw, stride, ho, wo):
    # x_ref: (Hp, Wp, Cin) f32 padded input for one sample (VMEM)
    # w_ref: (kh*kw, Cin, Cout) bf16 tap-major weights
    # o_ref: (Ho, Wo, Cout) f32
    cout = o_ref.shape[-1]
    acc = jnp.zeros((ho * wo, cout), jnp.float32)
    for di in range(kh):
        for dj in range(kw):
            if stride == 1:
                xt = x_ref[di:di + ho, dj:dj + wo, :]
            else:
                # TODO(synk): strided (stride>1) tap windows are best-effort; not exercised below.
                xt = x_ref[pl.ds(di, ho, stride), pl.ds(dj, wo, stride), :]
            a = xt.astype(jnp.bfloat16).reshape(ho * wo, -1)
            acc = acc + jnp.dot(a, w_ref[di * kw + dj],
                                preferred_element_type=jnp.float32)
    o_ref[...] = acc.reshape(ho, wo, cout)


def conv2d_nhwc(x_nhwc, w_oihw, stride, pad):
    """Bias-free conv2d. x: NHWC f32, w: OIHW (PyTorch layout). Returns NHWC f32."""
    N, H, W, Cin = x_nhwc.shape
    Cout, Cin2, kh, kw = w_oihw.shape
    assert Cin == Cin2
    xp = x_nhwc if pad == 0 else jnp.pad(
        x_nhwc, ((0, 0), (pad, pad), (pad, pad), (0, 0)))
    Hp, Wp = H + 2 * pad, W + 2 * pad
    Ho = (Hp - kh) // stride + 1
    Wo = (Wp - kw) // stride + 1
    # OIHW -> (kh*kw, Cin, Cout), bf16 operands for the MXU (f32 accumulation in-kernel).
    w = jnp.transpose(w_oihw, (2, 3, 1, 0)).reshape(kh * kw, Cin, Cout)
    w = w.astype(jnp.bfloat16)
    kern = functools.partial(_conv_taps_kernel, kh=kh, kw=kw, stride=stride,
                             ho=Ho, wo=Wo)
    return pl.pallas_call(
        kern,
        out_shape=jax.ShapeDtypeStruct((N, Ho, Wo, Cout), jnp.float32),
        grid=(N,),
        in_specs=[
            pl.BlockSpec((None, Hp, Wp, Cin), lambda n: (n, 0, 0, 0)),
            pl.BlockSpec((kh * kw, Cin, Cout), lambda n: (0, 0, 0)),
        ],
        out_specs=pl.BlockSpec((None, Ho, Wo, Cout), lambda n: (n, 0, 0, 0)),
        compiler_params=pltpu.CompilerParams(dimension_semantics=("parallel",)),
    )(xp, w)


# ----------------------- GroupNorm kernels (channels-last, lane-dense) -----------------------

def _gn_kernel(x_ref, a_ref, g_ref, b_ref, o_ref, *, inv_cnt, eps, relu):
    # x_ref: (HW, C) f32; a_ref: (C, C) 0/1 group-mask; g/b: (1, C)
    x = x_ref[...].astype(jnp.float32)
    a = a_ref[...]
    s1 = jnp.sum(x, axis=0, keepdims=True)                      # (1, C)
    mean = jnp.dot(s1, a, preferred_element_type=jnp.float32,
                   precision=jax.lax.Precision.HIGHEST) * inv_cnt
    d = x - mean
    s2 = jnp.sum(d * d, axis=0, keepdims=True)                  # (1, C)
    var = jnp.dot(s2, a, preferred_element_type=jnp.float32,
                  precision=jax.lax.Precision.HIGHEST) * inv_cnt
    scale = g_ref[...] * jax.lax.rsqrt(var + eps)                # (1, C)
    y = d * scale + b_ref[...]
    if relu:
        y = jnp.maximum(y, 0.0)
    o_ref[...] = y


def _gn_add_relu_kernel(x_ref, a_ref, g_ref, b_ref, r_ref, o_ref, *, inv_cnt, eps):
    # GroupNorm(bn2) + residual add + relu, fused.
    x = x_ref[...].astype(jnp.float32)
    a = a_ref[...]
    s1 = jnp.sum(x, axis=0, keepdims=True)
    mean = jnp.dot(s1, a, preferred_element_type=jnp.float32,
                   precision=jax.lax.Precision.HIGHEST) * inv_cnt
    d = x - mean
    s2 = jnp.sum(d * d, axis=0, keepdims=True)
    var = jnp.dot(s2, a, preferred_element_type=jnp.float32,
                  precision=jax.lax.Precision.HIGHEST) * inv_cnt
    scale = g_ref[...] * jax.lax.rsqrt(var + eps)
    y = d * scale + b_ref[...] + r_ref[...].astype(jnp.float32)
    o_ref[...] = jnp.maximum(y, 0.0)


def pallas_groupnorm(x_flat, gamma, beta, *, groups, relu, residual=None, eps=1e-5):
    """GroupNorm on a channels-last (N, HW, C) tensor; optional fused residual+relu."""
    N, HW, C = x_flat.shape
    cpg = C // groups
    gid = jnp.arange(C, dtype=jnp.int32) // cpg
    a = (gid[:, None] == gid[None, :]).astype(jnp.float32)       # (C, C) group mask
    g = gamma.reshape(1, C).astype(jnp.float32)
    b = beta.reshape(1, C).astype(jnp.float32)
    inv_cnt = 1.0 / float(HW * cpg)

    in_specs = [
        pl.BlockSpec((None, HW, C), lambda n: (n, 0, 0)),
        pl.BlockSpec((C, C), lambda n: (0, 0)),
        pl.BlockSpec((1, C), lambda n: (0, 0)),
        pl.BlockSpec((1, C), lambda n: (0, 0)),
    ]
    args = [x_flat, a, g, b]
    if residual is None:
        kern = functools.partial(_gn_kernel, inv_cnt=inv_cnt, eps=eps, relu=relu)
    else:
        kern = functools.partial(_gn_add_relu_kernel, inv_cnt=inv_cnt, eps=eps)
        in_specs.append(pl.BlockSpec((None, HW, C), lambda n: (n, 0, 0)))
        args.append(residual)

    return pl.pallas_call(
        kern,
        out_shape=jax.ShapeDtypeStruct((N, HW, C), jnp.float32),
        grid=(N,),
        in_specs=in_specs,
        out_specs=pl.BlockSpec((None, HW, C), lambda n: (n, 0, 0)),
        compiler_params=pltpu.CompilerParams(dimension_semantics=("parallel",)),
    )(*args)


# ----------------------------- BasicBlock forward -----------------------------

def basic_block_forward(x_nchw, params, *, stride):
    """x: (N, in_planes, H, W) NCHW f32 -> (N, planes, Ho, Wo) NCHW f32."""
    G = 8
    planes = params["w1"].shape[0]
    in_planes = params["w1"].shape[1]
    N, Cin, H, W = x_nchw.shape
    assert Cin == in_planes
    has_shortcut = (stride != 1) or (in_planes != planes)

    x_nhwc = jnp.transpose(x_nchw, (0, 2, 3, 1))          # boundary transpose only

    # conv1 -> bn1 -> relu
    y1 = conv2d_nhwc(x_nhwc, params["w1"], stride, 1)      # (N, Ho, Wo, planes)
    _, Ho, Wo, _ = y1.shape
    out1 = pallas_groupnorm(y1.reshape(N, Ho * Wo, planes),
                            params["bn1_g"], params["bn1_b"],
                            groups=G, relu=True)

    # conv2 (bn2 fused with residual add + relu below)
    y2 = conv2d_nhwc(out1.reshape(N, Ho, Wo, planes), params["w2"], 1, 1)

    # shortcut branch
    if has_shortcut:
        ys = conv2d_nhwc(x_nhwc, params["ws"], stride, 0)
        short = pallas_groupnorm(ys.reshape(N, Ho * Wo, planes),
                                 params["bns_g"], params["bns_b"],
                                 groups=G, relu=False)
    else:
        short = x_nhwc.reshape(N, H * W, Cin)

    # bn2 + residual add + relu (fused)
    out = pallas_groupnorm(y2.reshape(N, Ho * Wo, planes),
                           params["bn2_g"], params["bn2_b"],
                           groups=G, relu=True, residual=short)

    out_nhwc = out.reshape(N, Ho, Wo, planes)
    return jnp.transpose(out_nhwc, (0, 3, 1, 2))           # boundary transpose only


# ----------------------------- pure-JAX reference -----------------------------

def reference_forward(x_nchw, params, *, stride, conv_dtype=jnp.float32):
    planes = params["w1"].shape[0]
    in_planes = params["w1"].shape[1]
    has_shortcut = (stride != 1) or (in_planes != planes)

    def conv(x, w, s, p):
        return jax.lax.conv_general_dilated(
            x.astype(conv_dtype), w.astype(conv_dtype),
            window_strides=(s, s), padding=[(p, p), (p, p)],
            dimension_numbers=("NCHW", "OIHW", "NCHW"),
            preferred_element_type=jnp.float32,
            precision=jax.lax.Precision.HIGHEST)

    def gn(x, gamma, beta, G=8, eps=1e-5):
        N, C, H, W = x.shape
        xr = x.reshape(N, G, C // G, H * W)
        m = xr.mean(axis=(2, 3), keepdims=True)
        v = ((xr - m) ** 2).mean(axis=(2, 3), keepdims=True)
        xn = ((xr - m) * jax.lax.rsqrt(v + eps)).reshape(N, C, H, W)
        return xn * gamma.reshape(1, C, 1, 1) + beta.reshape(1, C, 1, 1)

    out = jax.nn.relu(gn(conv(x_nchw, params["w1"], stride, 1),
                         params["bn1_g"], params["bn1_b"]))
    out = gn(conv(out, params["w2"], 1, 1), params["bn2_g"], params["bn2_b"])
    if has_shortcut:
        sc = gn(conv(x_nchw, params["ws"], stride, 0),
                params["bns_g"], params["bns_b"])
    else:
        sc = x_nchw
    return jax.nn.relu(out + sc)


# ----------------------------- main -----------------------------

if __name__ == "__main__":
    # Small shapes: in_planes != planes -> exercises the conv1x1+GN shortcut.
    N, in_planes, planes, H, W, stride = 2, 8, 16, 16, 16, 1

    key = jax.random.PRNGKey(0)
    k1, k2, k3, kx = jax.random.split(key, 4)
    params = {
        "w1": 0.1 * jax.random.normal(k1, (planes, in_planes, 3, 3), jnp.float32),
        "w2": 0.1 * jax.random.normal(k2, (planes, planes, 3, 3), jnp.float32),
        "ws": 0.1 * jax.random.normal(k3, (planes, in_planes, 1, 1), jnp.float32),
        # GroupNorm affine params: PyTorch default init (ones / zeros).
        "bn1_g": jnp.ones((planes,), jnp.float32), "bn1_b": jnp.zeros((planes,), jnp.float32),
        "bn2_g": jnp.ones((planes,), jnp.float32), "bn2_b": jnp.zeros((planes,), jnp.float32),
        "bns_g": jnp.ones((planes,), jnp.float32), "bns_b": jnp.zeros((planes,), jnp.float32),
    }
    x = jax.random.normal(kx, (N, in_planes, H, W), jnp.float32)

    fwd = jax.jit(functools.partial(basic_block_forward, stride=stride))
    out = jax.block_until_ready(fwd(x, params))

    # Tight check against a reference that uses the same bf16 MXU operand precision.
    ref_bf16 = reference_forward(x, params, stride=stride, conv_dtype=jnp.bfloat16)
    # Loose check against the exact f32 reference (bounds bf16 operand error).
    ref_f32 = reference_forward(x, params, stride=stride, conv_dtype=jnp.float32)

    assert out.shape == ref_f32.shape == (N, planes, H // stride, W // stride)
    assert float(jnp.max(jnp.abs(out - ref_bf16))) < 2e-3
    assert float(jnp.max(jnp.abs(out - ref_f32))) < 5e-2

    print("KERNEL_OK")
</pallas_src>

<mosaic_0001>
module attributes {stable_mosaic.version = 11 : i64} {
  func.func @_gn_kernel(%arg0: i32, %arg1: memref<1x256x16xf32, #tpu.memory_space<vmem>>, %arg2: memref<16x16xf32, #tpu.memory_space<vmem>>, %arg3: memref<1x16xf32, #tpu.memory_space<vmem>>, %arg4: memref<1x16xf32, #tpu.memory_space<vmem>>, %arg5: memref<1x256x16xf32, #tpu.memory_space<vmem>>) attributes {dimension_semantics = [#tpu.dimension_semantics<parallel>], iteration_bounds = array<i64: 2>, scalar_prefetch = 0 : i64, scratch_operands = 0 : i64, tpu.core_type = #tpu.core_type<tc>, window_params = [{transform_indices = @transform_0, window_bounds = array<i64: 1, 256, 16>}, {pipeline_mode = #tpu.pipeline_mode<synchronous>, transform_indices = @transform_1, window_bounds = array<i64: 16, 16>}, {pipeline_mode = #tpu.pipeline_mode<synchronous>, transform_indices = @transform_2, window_bounds = array<i64: 1, 16>}, {pipeline_mode = #tpu.pipeline_mode<synchronous>, transform_indices = @transform_3, window_bounds = array<i64: 1, 16>}, {transform_indices = @transform_4, window_bounds = array<i64: 1, 256, 16>}]} {
    %c0 = arith.constant 0 : index
    %c0_0 = arith.constant 0 : index
    %c0_1 = arith.constant 0 : index
    %0 = vector.load %arg1[%c0, %c0_0, %c0_1] : memref<1x256x16xf32, #tpu.memory_space<vmem>>, vector<1x256x16xf32>
    %1 = vector.shape_cast %0 : vector<1x256x16xf32> to vector<256x16xf32>
    %c0_2 = arith.constant 0 : index
    %c0_3 = arith.constant 0 : index
    %2 = vector.load %arg2[%c0_2, %c0_3] : memref<16x16xf32, #tpu.memory_space<vmem>>, vector<16x16xf32>
    %cst = arith.constant dense<0.000000e+00> : vector<16xf32>
    %3 = vector.multi_reduction <add>, %1, %cst [0] : vector<256x16xf32> to vector<16xf32>
    %4 = vector.shape_cast %3 : vector<16xf32> to vector<1x16xf32>
    %cst_4 = arith.constant dense<0.000000e+00> : vector<1x16xf32>
    %5 = tpu.matmul %4, %2, %cst_4 {dimension_numbers = #tpu.dot_dimension_numbers<[1], [0], [0], [1], [0, 0, 1, 1], [], []>, precision = #tpu.contract_precision<fp32>} : vector<1x16xf32>, vector<16x16xf32>, vector<1x16xf32> -> vector<1x16xf32>
    %cst_5 = arith.constant 0.001953125 : f32
    %6 = vector.broadcast %cst_5 : f32 to vector<1x16xf32>
    %7 = arith.mulf %5, %6 : vector<1x16xf32>
    %8 = vector.broadcast %7 : vector<1x16xf32> to vector<256x16xf32>
    %9 = arith.subf %1, %8 : vector<256x16xf32>
    %10 = arith.mulf %9, %9 : vector<256x16xf32>
    %cst_6 = arith.constant dense<0.000000e+00> : vector<16xf32>
    %11 = vector.multi_reduction <add>, %10, %cst_6 [0] : vector<256x16xf32> to vector<16xf32>
    %12 = vector.shape_cast %11 : vector<16xf32> to vector<1x16xf32>
    %cst_7 = arith.constant dense<0.000000e+00> : vector<1x16xf32>
    %13 = tpu.matmul %12, %2, %cst_7 {dimension_numbers = #tpu.dot_dimension_numbers<[1], [0], [0], [1], [0, 0, 1, 1], [], []>, precision = #tpu.contract_precision<fp32>} : vector<1x16xf32>, vector<16x16xf32>, vector<1x16xf32> -> vector<1x16xf32>
    %cst_8 = arith.constant 0.001953125 : f32
    %14 = vector.broadcast %cst_8 : f32 to vector<1x16xf32>
    %15 = arith.mulf %13, %14 : vector<1x16xf32>
    %c0_9 = arith.constant 0 : index
    %c0_10 = arith.constant 0 : index
    %16 = vector.load %arg3[%c0_9, %c0_10] : memref<1x16xf32, #tpu.memory_space<vmem>>, vector<1x16xf32>
    %cst_11 = arith.constant 9.99999974E-6 : f32
    %17 = vector.broadcast %cst_11 : f32 to vector<1x16xf32>
    %18 = arith.addf %15, %17 : vector<1x16xf32>
    %19 = math.rsqrt %18 : vector<1x16xf32>
    %20 = arith.mulf %16, %19 : vector<1x16xf32>
    %21 = vector.broadcast %20 : vector<1x16xf32> to vector<256x16xf32>
    %22 = arith.mulf %9, %21 : vector<256x16xf32>
    %c0_12 = arith.constant 0 : index
    %c0_13 = arith.constant 0 : index
    %23 = vector.load %arg4[%c0_12, %c0_13] : memref<1x16xf32, #tpu.memory_space<vmem>>, vector<1x16xf32>
    %24 = vector.broadcast %23 : vector<1x16xf32> to vector<256x16xf32>
    %25 = arith.addf %22, %24 : vector<256x16xf32>
    %cst_14 = arith.constant 0.000000e+00 : f32
    %26 = vector.broadcast %cst_14 : f32 to vector<256x16xf32>
    %27 = arith.maximumf %25, %26 : vector<256x16xf32>
    %c0_15 = arith.constant 0 : index
    %c0_16 = arith.constant 0 : index
    %c0_17 = arith.constant 0 : index
    %28 = vector.load %arg5[%c0_15, %c0_16, %c0_17] : memref<1x256x16xf32, #tpu.memory_space<vmem>>, vector<1x256x16xf32>
    %29 = vector.shape_cast %28 : vector<1x256x16xf32> to vector<256x16xf32>
    %30 = vector.shape_cast %27 : vector<256x16xf32> to vector<1x256x16xf32>
    tpu.vector_store %arg5[%c0_15, %c0_16, %c0_17], %30 {strides = array<i32>} : memref<1x256x16xf32, #tpu.memory_space<vmem>>, vector<1x256x16xf32>,
    return
  }
  func.func @transform_0(%arg0: i32) -> (i32, i32, i32) {
    %c0_i32 = arith.constant 0 : i32
    %c0_i32_0 = arith.constant 0 : i32
    %c0_i32_1 = arith.constant 0 : i32
    return %arg0, %c0_i32, %c0_i32_0 : i32, i32, i32
  }
  func.func @transform_1(%arg0: i32) -> (i32, i32) {
    %c0_i32 = arith.constant 0 : i32
    %c0_i32_0 = arith.constant 0 : i32
    %c0_i32_1 = arith.constant 0 : i32
    return %c0_i32, %c0_i32_0 : i32, i32
  }
  func.func @transform_2(%arg0: i32) -> (i32, i32) {
    %c0_i32 = arith.constant 0 : i32
    %c0_i32_0 = arith.constant 0 : i32
    %c0_i32_1 = arith.constant 0 : i32
    return %c0_i32, %c0_i32_0 : i32, i32
  }
  func.func @transform_3(%arg0: i32) -> (i32, i32) {
    %c0_i32 = arith.constant 0 : i32
    %c0_i32_0 = arith.constant 0 : i32
    %c0_i32_1 = arith.constant 0 : i32
    return %c0_i32, %c0_i32_0 : i32, i32
  }
  func.func @transform_4(%arg0: i32) -> (i32, i32, i32) {
    %c0_i32 = arith.constant 0 : i32
    %c0_i32_0 = arith.constant 0 : i32
    %c0_i32_1 = arith.constant 0 : i32
    return %arg0, %c0_i32, %c0_i32_0 : i32, i32, i32
  }
}

module attributes {stable_mosaic.version = 11 : i64} {
  func.func @_conv_taps_kernel(%arg0: i32, %arg1: memref<1x18x18x8xf32, #tpu.memory_space<vmem>>, %arg2: memref<9x8x16xbf16, #tpu.memory_space<vmem>>, %arg3: memref<1x16x16x16xf32, #tpu.memory_space<vmem>>) attributes {dimension_semantics = [#tpu.dimension_semantics<parallel>], iteration_bounds = array<i64: 2>, scalar_prefetch = 0 : i64, scratch_operands = 0 : i64, tpu.core_type = #tpu.core_type<tc>, window_params = [{transform_indices = @transform_0, window_bounds = array<i64: 1, 18, 18, 8>}, {pipeline_mode = #tpu.pipeline_mode<synchronous>, transform_indices = @transform_1, window_bounds = array<i64: 9, 8, 16>}, {transform_indices = @transform_2, window_bounds = array<i64: 1, 16, 16, 16>}]} {
    %cst = arith.constant 0.000000e+00 : f32
    %0 = vector.broadcast %cst : f32 to vector<256x16xf32>
    %c0 = arith.constant 0 : index
    %c0_0 = arith.constant 0 : index
    %c0_1 = arith.constant 0 : index
    %c0_2 = arith.constant 0 : index
    %1 = vector.load %arg1[%c0, %c0_0, %c0_1, %c0_2] : memref<1x18x18x8xf32, #tpu.memory_space<vmem>>, vector<1x16x16x8xf32>
    %2 = vector.shape_cast %1 : vector<1x16x16x8xf32> to vector<16x16x8xf32>
    %3 = arith.truncf %2 : vector<16x16x8xf32> to vector<16x16x8xbf16>
    %4 = vector.shape_cast %3 : vector<16x16x8xbf16> to vector<256x8xbf16>
    %c0_3 = arith.constant 0 : index
    %c0_4 = arith.constant 0 : index
    %c0_5 = arith.constant 0 : index
    %5 = vector.load %arg2[%c0_3, %c0_4, %c0_5] : memref<9x8x16xbf16, #tpu.memory_space<vmem>>, vector<1x8x16xbf16>
    %6 = vector.shape_cast %5 : vector<1x8x16xbf16> to vector<8x16xbf16>
    %cst_6 = arith.constant dense<0.000000e+00> : vector<256x16xf32>
    %7 = tpu.matmul %4, %6, %cst_6 {dimension_numbers = #tpu.dot_dimension_numbers<[1], [0], [0], [1], [0, 0, 1, 1], [], []>} : vector<256x8xbf16>, vector<8x16xbf16>, vector<256x16xf32> -> vector<256x16xf32>
    %8 = arith.addf %0, %7 : vector<256x16xf32>
    %c0_7 = arith.constant 0 : index
    %c0_8 = arith.constant 0 : index
    %c1 = arith.constant 1 : index
    %c0_9 = arith.constant 0 : index
    %9 = vector.load %arg1[%c0_7, %c0_8, %c1, %c0_9] : memref<1x18x18x8xf32, #tpu.memory_space<vmem>>, vector<1x16x16x8xf32>
    %10 = vector.shape_cast %9 : vector<1x16x16x8xf32> to vector<16x16x8xf32>
    %11 = arith.truncf %10 : vector<16x16x8xf32> to vector<16x16x8xbf16>
    %12 = vector.shape_cast %11 : vector<16x16x8xbf16> to vector<256x8xbf16>
    %c1_10 = arith.constant 1 : index
    %c0_11 = arith.constant 0 : index
    %c0_12 = arith.constant 0 : index
    %13 = vector.load %arg2[%c1_10, %c0_11, %c0_12] : memref<9x8x16xbf16, #tpu.memory_space<vmem>>, vector<1x8x16xbf16>
    %14 = vector.shape_cast %13 : vector<1x8x16xbf16> to vector<8x16xbf16>
    %cst_13 = arith.constant dense<0.000000e+00> : vector<256x16xf32>
    %15 = tpu.matmul %12, %14, %cst_13 {dimension_numbers = #tpu.dot_dimension_numbers<[1], [0], [0], [1], [0, 0, 1, 1], [], []>} : vector<256x8xbf16>, vector<8x16xbf16>, vector<256x16xf32> -> vector<256x16xf32>
    %16 = arith.addf %8, %15 : vector<256x16xf32>
    %c0_14 = arith.constant 0 : index
    %c0_15 = arith.constant 0 : index
    %c2 = arith.constant 2 : index
    %c0_16 = arith.constant 0 : index
    %17 = vector.load %arg1[%c0_14, %c0_15, %c2, %c0_16] : memref<1x18x18x8xf32, #tpu.memory_space<vmem>>, vector<1x16x16x8xf32>
    %18 = vector.shape_cast %17 : vector<1x16x16x8xf32> to vector<16x16x8xf32>
    %19 = arith.truncf %18 : vector<16x16x8xf32> to vector<16x16x8xbf16>
    %20 = vector.shape_cast %19 : vector<16x16x8xbf16> to vector<256x8xbf16>
    %c2_17 = arith.constant 2 : index
    %c0_18 = arith.constant 0 : index
    %c0_19 = arith.constant 0 : index
    %21 = vector.load %arg2[%c2_17, %c0_18, %c0_19] : memref<9x8x16xbf16, #tpu.memory_space<vmem>>, vector<1x8x16xbf16>
    %22 = vector.shape_cast %21 : vector<1x8x16xbf16> to vector<8x16xbf16>
    %cst_20 = arith.constant dense<0.000000e+00> : vector<256x16xf32>
    %23 = tpu.matmul %20, %22, %cst_20 {dimension_numbers = #tpu.dot_dimension_numbers<[1], [0], [0], [1], [0, 0, 1, 1], [], []>} : vector<256x8xbf16>, vector<8x16xbf16>, vector<256x16xf32> -> vector<256x16xf32>
    %24 = arith.addf %16, %23 : vector<256x16xf32>
    %c0_21 = arith.constant 0 : index
    %c1_22 = arith.constant 1 : index
    %c0_23 = arith.constant 0 : index
    %c0_24 = arith.constant 0 : index
    %25 = vector.load %arg1[%c0_21, %c1_22, %c0_23, %c0_24] : memref<1x18x18x8xf32, #tpu.memory_space<vmem>>, vector<1x16x16x8xf32>
    %26 = vector.shape_cast %25 : vector<1x16x16x8xf32> to vector<16x16x8xf32>
    %27 = arith.truncf %26 : vector<16x16x8xf32> to vector<16x16x8xbf16>
    %28 = vector.shape_cast %27 : vector<16x16x8xbf16> to vector<256x8xbf16>
    %c3 = arith.constant 3 : index
    %c0_25 = arith.constant 0 : index
    %c0_26 = arith.constant 0 : index
    %29 = vector.load %arg2[%c3, %c0_25, %c0_26] : memref<9x8x16xbf16, #tpu.memory_space<vmem>>, vector<1x8x16xbf16>
    %30 = vector.shape_cast %29 : vector<1x8x16xbf16> to vector<8x16xbf16>
    %cst_27 = arith.constant dense<0.000000e+00> : vector<256x16xf32>
    %31 = tpu.matmul %28, %30, %cst_27 {dimension_numbers = #tpu.dot_dimension_numbers<[1], [0], [0], [1], [0, 0, 1, 1], [], []>} : vector<256x8xbf16>, vector<8x16xbf16>, vector<256x16xf32> -> vector<256x16xf32>
    %32 = arith.addf %24, %31 : vector<256x16xf32>
    %c0_28 = arith.constant 0 : index
    %c1_29 = arith.constant 1 : index
    %c1_30 = arith.constant 1 : index
    %c0_31 = arith.constant 0 : index
    %33 = vector.load %arg1[%c0_28, %c1_29, %c1_30, %c0_31] : memref<1x18x18x8xf32, #tpu.memory_space<vmem>>, vector<1x16x16x8xf32>
    %34 = vector.shape_cast %33 : vector<1x16x16x8xf32> to vector<16x16x8xf32>
    %35 = arith.truncf %34 : vector<16x16x8xf32> to vector<16x16x8xbf16>
    %36 = vector.shape_cast %35 : vector<16x16x8xbf16> to vector<256x8xbf16>
    %c4 = arith.constant 4 : index
    %c0_32 = arith.constant 0 : index
    %c0_33 = arith.constant 0 : index
    %37 = vector.load %arg2[%c4, %c0_32, %c0_33] : memref<9x8x16xbf16, #tpu.memory_space<vmem>>, vector<1x8x16xbf16>
    %38 = vector.shape_cast %37 : vector<1x8x16xbf16> to vector<8x16xbf16>
    %cst_34 = arith.constant dense<0.000000e+00> : vector<256x16xf32>
    %39 = tpu.matmul %36, %38, %cst_34 {dimension_numbers = #tpu.dot_dimension_numbers<[1], [0], [0], [1], [0, 0, 1, 1], [], []>} : vector<256x8xbf16>, vector<8x16xbf16>, vector<256x16xf32> -> vector<256x16xf32>
    %40 = arith.addf %32, %39 : vector<256x16xf32>
    %c0_35 = arith.constant 0 : index
    %c1_36 = arith.constant 1 : index
    %c2_37 = arith.constant 2 : index
    %c0_38 = arith.constant 0 : index
    %41 = vector.load %arg1[%c0_35, %c1_36, %c2_37, %c0_38] : memref<1x18x18x8xf32, #tpu.memory_space<vmem>>, vector<1x16x16x8xf32>
    %42 = vector.shape_cast %41 : vector<1x16x16x8xf32> to vector<16x16x8xf32>
    %43 = arith.truncf %42 : vector<16x16x8xf32> to vector<16x16x8xbf16>
    %44 = vector.shape_cast %43 : vector<16x16x8xbf16> to vector<256x8xbf16>
    %c5 = arith.constant 5 : index
    %c0_39 = arith.constant 0 : index
    %c0_40 = arith.constant 0 : index
    %45 = vector.load %arg2[%c5, %c0_39, %c0_40] : memref<9x8x16xbf16, #tpu.memory_space<vmem>>, vector<1x8x16xbf16>
    %46 = vector.shape_cast %45 : vector<1x8x16xbf16> to vector<8x16xbf16>
    %cst_41 = arith.constant dense<0.000000e+00> : vector<256x16xf32>
    %47 = tpu.matmul %44, %46, %cst_41 {dimension_numbers = #tpu.dot_dimension_numbers<[1], [0], [0], [1], [0, 0, 1, 1], [], []>} : vector<256x8xbf16>, vector<8x16xbf16>, vector<256x16xf32> -> vector<256x16xf32>
    %48 = arith.addf %40, %47 : vector<256x16xf32>
    %c0_42 = arith.constant 0 : index
    %c2_43 = arith.constant 2 : index
    %c0_44 = arith.constant 0 : index
    %c0_45 = arith.constant 0 : index
    %49 = vector.load %arg1[%c0_42, %c2_43, %c0_44, %c0_45] : memref<1x18x18x8xf32, #tpu.memory_space<vmem>>, vector<1x16x16x8xf32>
    %50 = vector.shape_cast %49 : vector<1x16x16x8xf32> to vector<16x16x8xf32>
    %51 = arith.truncf %50 : vector<16x16x8xf32> to vector<16x16x8xbf16>
    %52 = vector.shape_cast %51 : vector<16x16x8xbf16> to vector<256x8xbf16>
    %c6 = arith.constant 6 : index
    %c0_46 = arith.constant 0 : index
    %c0_47 = arith.constant 0 : index
    %53 = vector.load %arg2[%c6, %c0_46, %c0_47] : memref<9x8x16xbf16, #tpu.memory_space<vmem>>, vector<1x8x16xbf16>
    %54 = vector.shape_cast %53 : vector<1x8x16xbf16> to vector<8x16xbf16>
    %cst_48 = arith.constant dense<0.000000e+00> : vector<256x16xf32>
    %55 = tpu.matmul %52, %54, %cst_48 {dimension_numbers = #tpu.dot_dimension_numbers<[1], [0], [0], [1], [0, 0, 1, 1], [], []>} : vector<256x8xbf16>, vector<8x16xbf16>, vector<256x16xf32> -> vector<256x16xf32>
    %56 = arith.addf %48, %55 : vector<256x16xf32>
    %c0_49 = arith.constant 0 : index
    %c2_50 = arith.constant 2 : index
    %c1_51 = arith.constant 1 : index
    %c0_52 = arith.constant 0 : index
    %57 = vector.load %arg1[%c0_49, %c2_50, %c1_51, %c0_52] : memref<1x18x18x8xf32, #tpu.memory_space<vmem>>, vector<1x16x16x8xf32>
    %58 = vector.shape_cast %57 : vector<1x16x16x8xf32> to vector<16x16x8xf32>
    %59 = arith.truncf %58 : vector<16x16x8xf32> to vector<16x16x8xbf16>
    %60 = vector.shape_cast %59 : vector<16x16x8xbf16> to vector<256x8xbf16>
    %c7 = arith.constant 7 : index
    %c0_53 = arith.constant 0 : index
    %c0_54 = arith.constant 0 : index
    %61 = vector.load %arg2[%c7, %c0_53, %c0_54] : memref<9x8x16xbf16, #tpu.memory_space<vmem>>, vector<1x8x16xbf16>
    %62 = vector.shape_cast %61 : vector<1x8x16xbf16> to vector<8x16xbf16>
    %cst_55 = arith.constant dense<0.000000e+00> : vector<256x16xf32>
    %63 = tpu.matmul %60, %62, %cst_55 {dimension_numbers = #tpu.dot_dimension_numbers<[1], [0], [0], [1], [0, 0, 1, 1], [], []>} : vector<256x8xbf16>, vector<8x16xbf16>, vector<256x16xf32> -> vector<256x16xf32>
    %64 = arith.addf %56, %63 : vector<256x16xf32>
    %c0_56 = arith.constant 0 : index
    %c2_57 = arith.constant 2 : index
    %c2_58 = arith.constant 2 : index
    %c0_59 = arith.constant 0 : index
    %65 = vector.load %arg1[%c0_56, %c2_57, %c2_58, %c0_59] : memref<1x18x18x8xf32, #tpu.memory_space<vmem>>, vector<1x16x16x8xf32>
    %66 = vector.shape_cast %65 : vector<1x16x16x8xf32> to vector<16x16x8xf32>
    %67 = arith.truncf %66 : vector<16x16x8xf32> to vector<16x16x8xbf16>
    %68 = vector.shape_cast %67 : vector<16x16x8xbf16> to vector<256x8xbf16>
    %c8 = arith.constant 8 : index
    %c0_60 = arith.constant 0 : index
    %c0_61 = arith.constant 0 : index
    %69 = vector.load %arg2[%c8, %c0_60, %c0_61] : memref<9x8x16xbf16, #tpu.memory_space<vmem>>, vector<1x8x16xbf16>
    %70 = vector.shape_cast %69 : vector<1x8x16xbf16> to vector<8x16xbf16>
    %cst_62 = arith.constant dense<0.000000e+00> : vector<256x16xf32>
    %71 = tpu.matmul %68, %70, %cst_62 {dimension_numbers = #tpu.dot_dimension_numbers<[1], [0], [0], [1], [0, 0, 1, 1], [], []>} : vector<256x8xbf16>, vector<8x16xbf16>, vector<256x16xf32> -> vector<256x16xf32>
    %72 = arith.addf %64, %71 : vector<256x16xf32>
    %73 = vector.shape_cast %72 : vector<256x16xf32> to vector<16x16x16xf32>
    %c0_63 = arith.constant 0 : index
    %c0_64 = arith.constant 0 : index
    %c0_65 = arith.constant 0 : index
    %c0_66 = arith.constant 0 : index
    %74 = vector.load %arg3[%c0_63, %c0_64, %c0_65, %c0_66] : memref<1x16x16x16xf32, #tpu.memory_space<vmem>>, vector<1x16x16x16xf32>
    %75 = vector.shape_cast %74 : vector<1x16x16x16xf32> to vector<16x16x16xf32>
    %76 = vector.shape_cast %73 : vector<16x16x16xf32> to vector<1x16x16x16xf32>
    tpu.vector_store %arg3[%c0_63, %c0_64, %c0_65, %c0_66], %76 {strides = array<i32>} : memref<1x16x16x16xf32, #tpu.memory_space<vmem>>, vector<1x16x16x16xf32>,
    return
  }
  func.func @transform_0(%arg0: i32) -> (i32, i32, i32, i32) {
    %c0_i32 = arith.constant 0 : i32
    %c0_i32_0 = arith.constant 0 : i32
    %c0_i32_1 = arith.constant 0 : i32
    %c0_i32_2 = arith.constant 0 : i32
    return %arg0, %c0_i32, %c0_i32_0, %c0_i32_1 : i32, i32, i32, i32
  }
  func.func @transform_1(%arg0: i32) -> (i32, i32, i32) {
    %c0_i32 = arith.constant 0 : i32
    %c0_i32_0 = arith.constant 0 : i32
    %c0_i32_1 = arith.constant 0 : i32
    %c0_i32_2 = arith.constant 0 : i32
    return %c0_i32, %c0_i32_0, %c0_i32_1 : i32, i32, i32
  }
  func.func @transform_2(%arg0: i32) -> (i32, i32, i32, i32) {
    %c0_i32 = arith.constant 0 : i32
    %c0_i32_0 = arith.constant 0 : i32
    %c0_i32_1 = arith.constant 0 : i32
    %c0_i32_2 = arith.constant 0 : i32
    return %arg0, %c0_i32, %c0_i32_0, %c0_i32_1 : i32, i32, i32, i32
  }
}

module attributes {stable_mosaic.version = 11 : i64} {
  func.func @_conv_taps_kernel(%arg0: i32, %arg1: memref<1x16x16x8xf32, #tpu.memory_space<vmem>>, %arg2: memref<1x8x16xbf16, #tpu.memory_space<vmem>>, %arg3: memref<1x16x16x16xf32, #tpu.memory_space<vmem>>) attributes {dimension_semantics = [#tpu.dimension_semantics<parallel>], iteration_bounds = array<i64: 2>, scalar_prefetch = 0 : i64, scratch_operands = 0 : i64, tpu.core_type = #tpu.core_type<tc>, window_params = [{transform_indices = @transform_0, window_bounds = array<i64: 1, 16, 16, 8>}, {pipeline_mode = #tpu.pipeline_mode<synchronous>, transform_indices = @transform_1, window_bounds = array<i64: 1, 8, 16>}, {transform_indices = @transform_2, window_bounds = array<i64: 1, 16, 16, 16>}]} {
    %cst = arith.constant 0.000000e+00 : f32
    %0 = vector.broadcast %cst : f32 to vector<256x16xf32>
    %c0 = arith.constant 0 : index
    %c0_0 = arith.constant 0 : index
    %c0_1 = arith.constant 0 : index
    %c0_2 = arith.constant 0 : index
    %1 = vector.load %arg1[%c0, %c0_0, %c0_1, %c0_2] : memref<1x16x16x8xf32, #tpu.memory_space<vmem>>, vector<1x16x16x8xf32>
    %2 = vector.shape_cast %1 : vector<1x16x16x8xf32> to vector<16x16x8xf32>
    %3 = arith.truncf %2 : vector<16x16x8xf32> to vector<16x16x8xbf16>
    %4 = vector.shape_cast %3 : vector<16x16x8xbf16> to vector<256x8xbf16>
    %c0_3 = arith.constant 0 : index
    %c0_4 = arith.constant 0 : index
    %c0_5 = arith.constant 0 : index
    %5 = vector.load %arg2[%c0_3, %c0_4, %c0_5] : memref<1x8x16xbf16, #tpu.memory_space<vmem>>, vector<1x8x16xbf16>
    %6 = vector.shape_cast %5 : vector<1x8x16xbf16> to vector<8x16xbf16>
    %cst_6 = arith.constant dense<0.000000e+00> : vector<256x16xf32>
    %7 = tpu.matmul %4, %6, %cst_6 {dimension_numbers = #tpu.dot_dimension_numbers<[1], [0], [0], [1], [0, 0, 1, 1], [], []>} : vector<256x8xbf16>, vector<8x16xbf16>, vector<256x16xf32> -> vector<256x16xf32>
    %8 = arith.addf %0, %7 : vector<256x16xf32>
    %9 = vector.shape_cast %8 : vector<256x16xf32> to vector<16x16x16xf32>
    %c0_7 = arith.constant 0 : index
    %c0_8 = arith.constant 0 : index
    %c0_9 = arith.constant 0 : index
    %c0_10 = arith.constant 0 : index
    %10 = vector.load %arg3[%c0_7, %c0_8, %c0_9, %c0_10] : memref<1x16x16x16xf32, #tpu.memory_space<vmem>>, vector<1x16x16x16xf32>
    %11 = vector.shape_cast %10 : vector<1x16x16x16xf32> to vector<16x16x16xf32>
    %12 = vector.shape_cast %9 : vector<16x16x16xf32> to vector<1x16x16x16xf32>
    tpu.vector_store %arg3[%c0_7, %c0_8, %c0_9, %c0_10], %12 {strides = array<i32>} : memref<1x16x16x16xf32, #tpu.memory_space<vmem>>, vector<1x16x16x16xf32>,
    return
  }
  func.func @transform_0(%arg0: i32) -> (i32, i32, i32, i32) {
    %c0_i32 = arith.constant 0 : i32
    %c0_i32_0 = arith.constant 0 : i32
    %c0_i32_1 = arith.constant 0 : i32
    %c0_i32_2 = arith.constant 0 : i32
    return %arg0, %c0_i32, %c0_i32_0, %c0_i32_1 : i32, i32, i32, i32
  }
  func.func @transform_1(%arg0: i32) -> (i32, i32, i32) {
    %c0_i32 = arith.constant 0 : i32
    %c0_i32_0 = arith.constant 0 : i32
    %c0_i32_1 = arith.constant 0 : i32
    %c0_i32_2 = arith.constant 0 : i32
    return %c0_i32, %c0_i32_0, %c0_i32_1 : i32, i32, i32
  }
  func.func @transform_2(%arg0: i32) -> (i32, i32, i32, i32) {
    %c0_i32 = arith.constant 0 : i32
    %c0_i32_0 = arith.constant 0 : i32
    %c0_i32_1 = arith.constant 0 : i32
    %c0_i32_2 = arith.constant 0 : i32
    return %arg0, %c0_i32, %c0_i32_0, %c0_i32_1 : i32, i32, i32, i32
  }
}

module attributes {stable_mosaic.version = 11 : i64} {
  func.func @_conv_taps_kernel(%arg0: i32, %arg1: memref<1x18x18x16xf32, #tpu.memory_space<vmem>>, %arg2: memref<9x16x16xbf16, #tpu.memory_space<vmem>>, %arg3: memref<1x16x16x16xf32, #tpu.memory_space<vmem>>) attributes {dimension_semantics = [#tpu.dimension_semantics<parallel>], iteration_bounds = array<i64: 2>, scalar_prefetch = 0 : i64, scratch_operands = 0 : i64, tpu.core_type = #tpu.core_type<tc>, window_params = [{transform_indices = @transform_0, window_bounds = array<i64: 1, 18, 18, 16>}, {pipeline_mode = #tpu.pipeline_mode<synchronous>, transform_indices = @transform_1, window_bounds = array<i64: 9, 16, 16>}, {transform_indices = @transform_2, window_bounds = array<i64: 1, 16, 16, 16>}]} {
    %cst = arith.constant 0.000000e+00 : f32
    %0 = vector.broadcast %cst : f32 to vector<256x16xf32>
    %c0 = arith.constant 0 : index
    %c0_0 = arith.constant 0 : index
    %c0_1 = arith.constant 0 : index
    %c0_2 = arith.constant 0 : index
    %1 = vector.load %arg1[%c0, %c0_0, %c0_1, %c0_2] : memref<1x18x18x16xf32, #tpu.memory_space<vmem>>, vector<1x16x16x16xf32>
    %2 = vector.shape_cast %1 : vector<1x16x16x16xf32> to vector<16x16x16xf32>
    %3 = arith.truncf %2 : vector<16x16x16xf32> to vector<16x16x16xbf16>
    %4 = vector.shape_cast %3 : vector<16x16x16xbf16> to vector<256x16xbf16>
    %c0_3 = arith.constant 0 : index
    %c0_4 = arith.constant 0 : index
    %c0_5 = arith.constant 0 : index
    %5 = vector.load %arg2[%c0_3, %c0_4, %c0_5] : memref<9x16x16xbf16, #tpu.memory_space<vmem>>, vector<1x16x16xbf16>
    %6 = vector.shape_cast %5 : vector<1x16x16xbf16> to vector<16x16xbf16>
    %cst_6 = arith.constant dense<0.000000e+00> : vector<256x16xf32>
    %7 = tpu.matmul %4, %6, %cst_6 {dimension_numbers = #tpu.dot_dimension_numbers<[1], [0], [0], [1], [0, 0, 1, 1], [], []>} : vector<256x16xbf16>, vector<16x16xbf16>, vector<256x16xf32> -> vector<256x16xf32>
    %8 = arith.addf %0, %7 : vector<256x16xf32>
    %c0_7 = arith.constant 0 : index
    %c0_8 = arith.constant 0 : index
    %c1 = arith.constant 1 : index
    %c0_9 = arith.constant 0 : index
    %9 = vector.load %arg1[%c0_7, %c0_8, %c1, %c0_9] : memref<1x18x18x16xf32, #tpu.memory_space<vmem>>, vector<1x16x16x16xf32>
    %10 = vector.shape_cast %9 : vector<1x16x16x16xf32> to vector<16x16x16xf32>
    %11 = arith.truncf %10 : vector<16x16x16xf32> to vector<16x16x16xbf16>
    %12 = vector.shape_cast %11 : vector<16x16x16xbf16> to vector<256x16xbf16>
    %c1_10 = arith.constant 1 : index
    %c0_11 = arith.constant 0 : index
    %c0_12 = arith.constant 0 : index
    %13 = vector.load %arg2[%c1_10, %c0_11, %c0_12] : memref<9x16x16xbf16, #tpu.memory_space<vmem>>, vector<1x16x16xbf16>
    %14 = vector.shape_cast %13 : vector<1x16x16xbf16> to vector<16x16xbf16>
    %cst_13 = arith.constant dense<0.000000e+00> : vector<256x16xf32>
    %15 = tpu.matmul %12, %14, %cst_13 {dimension_numbers = #tpu.dot_dimension_numbers<[1], [0], [0], [1], [0, 0, 1, 1], [], []>} : vector<256x16xbf16>, vector<16x16xbf16>, vector<256x16xf32> -> vector<256x16xf32>
    %16 = arith.addf %8, %15 : vector<256x16xf32>
    %c0_14 = arith.constant 0 : index
    %c0_15 = arith.constant 0 : index
    %c2 = arith.constant 2 : index
    %c0_16 = arith.constant 0 : index
    %17 = vector.load %arg1[%c0_14, %c0_15, %c2, %c0_16] : memref<1x18x18x16xf32, #tpu.memory_space<vmem>>, vector<1x16x16x16xf32>
    %18 = vector.shape_cast %17 : vector<1x16x16x16xf32> to vector<16x16x16xf32>
    %19 = arith.truncf %18 : vector<16x16x16xf32> to vector<16x16x16xbf16>
    %20 = vector.shape_cast %19 : vector<16x16x16xbf16> to vector<256x16xbf16>
    %c2_17 = arith.constant 2 : index
    %c0_18 = arith.constant 0 : index
    %c0_19 = arith.constant 0 : index
    %21 = vector.load %arg2[%c2_17, %c0_18, %c0_19] : memref<9x16x16xbf16, #tpu.memory_space<vmem>>, vector<1x16x16xbf16>
    %22 = vector.shape_cast %21 : vector<1x16x16xbf16> to vector<16x16xbf16>
    %cst_20 = arith.constant dense<0.000000e+00> : vector<256x16xf32>
    %23 = tpu.matmul %20, %22, %cst_20 {dimension_numbers = #tpu.dot_dimension_numbers<[1], [0], [0], [1], [0, 0, 1, 1], [], []>} : vector<256x16xbf16>, vector<16x16xbf16>, vector<256x16xf32> -> vector<256x16xf32>
    %24 = arith.addf %16, %23 : vector<256x16xf32>
    %c0_21 = arith.constant 0 : index
    %c1_22 = arith.constant 1 : index
    %c0_23 = arith.constant 0 : index
    %c0_24 = arith.constant 0 : index
    %25 = vector.load %arg1[%c0_21, %c1_22, %c0_23, %c0_24] : memref<1x18x18x16xf32, #tpu.memory_space<vmem>>, vector<1x16x16x16xf32>
    %26 = vector.shape_cast %25 : vector<1x16x16x16xf32> to vector<16x16x16xf32>
    %27 = arith.truncf %26 : vector<16x16x16xf32> to vector<16x16x16xbf16>
    %28 = vector.shape_cast %27 : vector<16x16x16xbf16> to vector<256x16xbf16>
    %c3 = arith.constant 3 : index
    %c0_25 = arith.constant 0 : index
    %c0_26 = arith.constant 0 : index
    %29 = vector.load %arg2[%c3, %c0_25, %c0_26] : memref<9x16x16xbf16, #tpu.memory_space<vmem>>, vector<1x16x16xbf16>
    %30 = vector.shape_cast %29 : vector<1x16x16xbf16> to vector<16x16xbf16>
    %cst_27 = arith.constant dense<0.000000e+00> : vector<256x16xf32>
    %31 = tpu.matmul %28, %30, %cst_27 {dimension_numbers = #tpu.dot_dimension_numbers<[1], [0], [0], [1], [0, 0, 1, 1], [], []>} : vector<256x16xbf16>, vector<16x16xbf16>, vector<256x16xf32> -> vector<256x16xf32>
    %32 = arith.addf %24, %31 : vector<256x16xf32>
    %c0_28 = arith.constant 0 : index
    %c1_29 = arith.constant 1 : index
    %c1_30 = arith.constant 1 : index
    %c0_31 = arith.constant 0 : index
    %33 = vector.load %arg1[%c0_28, %c1_29, %c1_30, %c0_31] : memref<1x18x18x16xf32, #tpu.memory_space<vmem>>, vector<1x16x16x16xf32>
    %34 = vector.shape_cast %33 : vector<1x16x16x16xf32> to vector<16x16x16xf32>
    %35 = arith.truncf %34 : vector<16x16x16xf32> to vector<16x16x16xbf16>
    %36 = vector.shape_cast %35 : vector<16x16x16xbf16> to vector<256x16xbf16>
    %c4 = arith.constant 4 : index
    %c0_32 = arith.constant 0 : index
    %c0_33 = arith.constant 0 : index
    %37 = vector.load %arg2[%c4, %c0_32, %c0_33] : memref<9x16x16xbf16, #tpu.memory_space<vmem>>, vector<1x16x16xbf16>
    %38 = vector.shape_cast %37 : vector<1x16x16xbf16> to vector<16x16xbf16>
    %cst_34 = arith.constant dense<0.000000e+00> : vector<256x16xf32>
    %39 = tpu.matmul %36, %38, %cst_34 {dimension_numbers = #tpu.dot_dimension_numbers<[1], [0], [0], [1], [0, 0, 1, 1], [], []>} : vector<256x16xbf16>, vector<16x16xbf16>, vector<256x16xf32> -> vector<256x16xf32>
    %40 = arith.addf %32, %39 : vector<256x16xf32>
    %c0_35 = arith.constant 0 : index
    %c1_36 = arith.constant 1 : index
    %c2_37 = arith.constant 2 : index
    %c0_38 = arith.constant 0 : index
    %41 = vector.load %arg1[%c0_35, %c1_36, %c2_37, %c0_38] : memref<1x18x18x16xf32, #tpu.memory_space<vmem>>, vector<1x16x16x16xf32>
    %42 = vector.shape_cast %41 : vector<1x16x16x16xf32> to vector<16x16x16xf32>
    %43 = arith.truncf %42 : vector<16x16x16xf32> to vector<16x16x16xbf16>
    %44 = vector.shape_cast %43 : vector<16x16x16xbf16> to vector<256x16xbf16>
    %c5 = arith.constant 5 : index
    %c0_39 = arith.constant 0 : index
    %c0_40 = arith.constant 0 : index
    %45 = vector.load %arg2[%c5, %c0_39, %c0_40] : memref<9x16x16xbf16, #tpu.memory_space<vmem>>, vector<1x16x16xbf16>
    %46 = vector.shape_cast %45 : vector<1x16x16xbf16> to vector<16x16xbf16>
    %cst_41 = arith.constant dense<0.000000e+00> : vector<256x16xf32>
    %47 = tpu.matmul %44, %46, %cst_41 {dimension_numbers = #tpu.dot_dimension_numbers<[1], [0], [0], [1], [0, 0, 1, 1], [], []>} : vector<256x16xbf16>, vector<16x16xbf16>, vector<256x16xf32> -> vector<256x16xf32>
    %48 = arith.addf %40, %47 : vector<256x16xf32>
    %c0_42 = arith.constant 0 : index
    %c2_43 = arith.constant 2 : index
    %c0_44 = arith.constant 0 : index
    %c0_45 = arith.constant 0 : index
    %49 = vector.load %arg1[%c0_42, %c2_43, %c0_44, %c0_45] : memref<1x18x18x16xf32, #tpu.memory_space<vmem>>, vector<1x16x16x16xf32>
    %50 = vector.shape_cast %49 : vector<1x16x16x16xf32> to vector<16x16x16xf32>
    %51 = arith.truncf %50 : vector<16x16x16xf32> to vector<16x16x16xbf16>
    %52 = vector.shape_cast %51 : vector<16x16x16xbf16> to vector<256x16xbf16>
    %c6 = arith.constant 6 : index
    %c0_46 = arith.constant 0 : index
    %c0_47 = arith.constant 0 : index
    %53 = vector.load %arg2[%c6, %c0_46, %c0_47] : memref<9x16x16xbf16, #tpu.memory_space<vmem>>, vector<1x16x16xbf16>
    %54 = vector.shape_cast %53 : vector<1x16x16xbf16> to vector<16x16xbf16>
    %cst_48 = arith.constant dense<0.000000e+00> : vector<256x16xf32>
    %55 = tpu.matmul %52, %54, %cst_48 {dimension_numbers = #tpu.dot_dimension_numbers<[1], [0], [0], [1], [0, 0, 1, 1], [], []>} : vector<256x16xbf16>, vector<16x16xbf16>, vector<256x16xf32> -> vector<256x16xf32>
    %56 = arith.addf %48, %55 : vector<256x16xf32>
    %c0_49 = arith.constant 0 : index
    %c2_50 = arith.constant 2 : index
    %c1_51 = arith.constant 1 : index
    %c0_52 = arith.constant 0 : index
    %57 = vector.load %arg1[%c0_49, %c2_50, %c1_51, %c0_52] : memref<1x18x18x16xf32, #tpu.memory_space<vmem>>, vector<1x16x16x16xf32>
    %58 = vector.shape_cast %57 : vector<1x16x16x16xf32> to vector<16x16x16xf32>
    %59 = arith.truncf %58 : vector<16x16x16xf32> to vector<16x16x16xbf16>
    %60 = vector.shape_cast %59 : vector<16x16x16xbf16> to vector<256x16xbf16>
    %c7 = arith.constant 7 : index
    %c0_53 = arith.constant 0 : index
    %c0_54 = arith.constant 0 : index
    %61 = vector.load %arg2[%c7, %c0_53, %c0_54] : memref<9x16x16xbf16, #tpu.memory_space<vmem>>, vector<1x16x16xbf16>
    %62 = vector.shape_cast %61 : vector<1x16x16xbf16> to vector<16x16xbf16>
    %cst_55 = arith.constant dense<0.000000e+00> : vector<256x16xf32>
    %63 = tpu.matmul %60, %62, %cst_55 {dimension_numbers = #tpu.dot_dimension_numbers<[1], [0], [0], [1], [0, 0, 1, 1], [], []>} : vector<256x16xbf16>, vector<16x16xbf16>, vector<256x16xf32> -> vector<256x16xf32>
    %64 = arith.addf %56, %63 : vector<256x16xf32>
    %c0_56 = arith.constant 0 : index
    %c2_57 = arith.constant 2 : index
    %c2_58 = arith.constant 2 : index
    %c0_59 = arith.constant 0 : index
    %65 = vector.load %arg1[%c0_56, %c2_57, %c2_58, %c0_59] : memref<1x18x18x16xf32, #tpu.memory_space<vmem>>, vector<1x16x16x16xf32>
    %66 = vector.shape_cast %65 : vector<1x16x16x16xf32> to vector<16x16x16xf32>
    %67 = arith.truncf %66 : vector<16x16x16xf32> to vector<16x16x16xbf16>
    %68 = vector.shape_cast %67 : vector<16x16x16xbf16> to vector<256x16xbf16>
    %c8 = arith.constant 8 : index
    %c0_60 = arith.constant 0 : index
    %c0_61 = arith.constant 0 : index
    %69 = vector.load %arg2[%c8, %c0_60, %c0_61] : memref<9x16x16xbf16, #tpu.memory_space<vmem>>, vector<1x16x16xbf16>
    %70 = vector.shape_cast %69 : vector<1x16x16xbf16> to vector<16x16xbf16>
    %cst_62 = arith.constant dense<0.000000e+00> : vector<256x16xf32>
    %71 = tpu.matmul %68, %70, %cst_62 {dimension_numbers = #tpu.dot_dimension_numbers<[1], [0], [0], [1], [0, 0, 1, 1], [], []>} : vector<256x16xbf16>, vector<16x16xbf16>, vector<256x16xf32> -> vector<256x16xf32>
    %72 = arith.addf %64, %71 : vector<256x16xf32>
    %73 = vector.shape_cast %72 : vector<256x16xf32> to vector<16x16x16xf32>
    %c0_63 = arith.constant 0 : index
    %c0_64 = arith.constant 0 : index
    %c0_65 = arith.constant 0 : index
    %c0_66 = arith.constant 0 : index
    %74 = vector.load %arg3[%c0_63, %c0_64, %c0_65, %c0_66] : memref<1x16x16x16xf32, #tpu.memory_space<vmem>>, vector<1x16x16x16xf32>
    %75 = vector.shape_cast %74 : vector<1x16x16x16xf32> to vector<16x16x16xf32>
    %76 = vector.shape_cast %73 : vector<16x16x16xf32> to vector<1x16x16x16xf32>
    tpu.vector_store %arg3[%c0_63, %c0_64, %c0_65, %c0_66], %76 {strides = array<i32>} : memref<1x16x16x16xf32, #tpu.memory_space<vmem>>, vector<1x16x16x16xf32>,
    return
  }
  func.func @transform_0(%arg0: i32) -> (i32, i32, i32, i32) {
    %c0_i32 = arith.constant 0 : i32
    %c0_i32_0 = arith.constant 0 : i32
    %c0_i32_1 = arith.constant 0 : i32
    %c0_i32_2 = arith.constant 0 : i32
    return %arg0, %c0_i32, %c0_i32_0, %c0_i32_1 : i32, i32, i32, i32
  }
  func.func @transform_1(%arg0: i32) -> (i32, i32, i32) {
    %c0_i32 = arith.constant 0 : i32
    %c0_i32_0 = arith.constant 0 : i32
    %c0_i32_1 = arith.constant 0 : i32
    %c0_i32_2 = arith.constant 0 : i32
    return %c0_i32, %c0_i32_0, %c0_i32_1 : i32, i32, i32
  }
  func.func @transform_2(%arg0: i32) -> (i32, i32, i32, i32) {
    %c0_i32 = arith.constant 0 : i32
    %c0_i32_0 = arith.constant 0 : i32
    %c0_i32_1 = arith.constant 0 : i32
    %c0_i32_2 = arith.constant 0 : i32
    return %arg0, %c0_i32, %c0_i32_0, %c0_i32_1 : i32, i32, i32, i32
  }
}

module attributes {stable_mosaic.version = 11 : i64} {
  func.func @_gn_kernel(%arg0: i32, %arg1: memref<1x256x16xf32, #tpu.memory_space<vmem>>, %arg2: memref<16x16xf32, #tpu.memory_space<vmem>>, %arg3: memref<1x16xf32, #tpu.memory_space<vmem>>, %arg4: memref<1x16xf32, #tpu.memory_space<vmem>>, %arg5: memref<1x256x16xf32, #tpu.memory_space<vmem>>) attributes {dimension_semantics = [#tpu.dimension_semantics<parallel>], iteration_bounds = array<i64: 2>, scalar_prefetch = 0 : i64, scratch_operands = 0 : i64, tpu.core_type = #tpu.core_type<tc>, window_params = [{transform_indices = @transform_0, window_bounds = array<i64: 1, 256, 16>}, {pipeline_mode = #tpu.pipeline_mode<synchronous>, transform_indices = @transform_1, window_bounds = array<i64: 16, 16>}, {pipeline_mode = #tpu.pipeline_mode<synchronous>, transform_indices = @transform_2, window_bounds = array<i64: 1, 16>}, {pipeline_mode = #tpu.pipeline_mode<synchronous>, transform_indices = @transform_3, window_bounds = array<i64: 1, 16>}, {transform_indices = @transform_4, window_bounds = array<i64: 1, 256, 16>}]} {
    %c0 = arith.constant 0 : index
    %c0_0 = arith.constant 0 : index
    %c0_1 = arith.constant 0 : index
    %0 = vector.load %arg1[%c0, %c0_0, %c0_1] : memref<1x256x16xf32, #tpu.memory_space<vmem>>, vector<1x256x16xf32>
    %1 = vector.shape_cast %0 : vector<1x256x16xf32> to vector<256x16xf32>
    %c0_2 = arith.constant 0 : index
    %c0_3 = arith.constant 0 : index
    %2 = vector.load %arg2[%c0_2, %c0_3] : memref<16x16xf32, #tpu.memory_space<vmem>>, vector<16x16xf32>
    %cst = arith.constant dense<0.000000e+00> : vector<16xf32>
    %3 = vector.multi_reduction <add>, %1, %cst [0] : vector<256x16xf32> to vector<16xf32>
    %4 = vector.shape_cast %3 : vector<16xf32> to vector<1x16xf32>
    %cst_4 = arith.constant dense<0.000000e+00> : vector<1x16xf32>
    %5 = tpu.matmul %4, %2, %cst_4 {dimension_numbers = #tpu.dot_dimension_numbers<[1], [0], [0], [1], [0, 0, 1, 1], [], []>, precision = #tpu.contract_precision<fp32>} : vector<1x16xf32>, vector<16x16xf32>, vector<1x16xf32> -> vector<1x16xf32>
    %cst_5 = arith.constant 0.001953125 : f32
    %6 = vector.broadcast %cst_5 : f32 to vector<1x16xf32>
    %7 = arith.mulf %5, %6 : vector<1x16xf32>
    %8 = vector.broadcast %7 : vector<1x16xf32> to vector<256x16xf32>
    %9 = arith.subf %1, %8 : vector<256x16xf32>
    %10 = arith.mulf %9, %9 : vector<256x16xf32>
    %cst_6 = arith.constant dense<0.000000e+00> : vector<16xf32>
    %11 = vector.multi_reduction <add>, %10, %cst_6 [0] : vector<256x16xf32> to vector<16xf32>
    %12 = vector.shape_cast %11 : vector<16xf32> to vector<1x16xf32>
    %cst_7 = arith.constant dense<0.000000e+00> : vector<1x16xf32>
    %13 = tpu.matmul %12, %2, %cst_7 {dimension_numbers = #tpu.dot_dimension_numbers<[1], [0], [0], [1], [0, 0, 1, 1], [], []>, precision = #tpu.contract_precision<fp32>} : vector<1x16xf32>, vector<16x16xf32>, vector<1x16xf32> -> vector<1x16xf32>
    %cst_8 = arith.constant 0.001953125 : f32
    %14 = vector.broadcast %cst_8 : f32 to vector<1x16xf32>
    %15 = arith.mulf %13, %14 : vector<1x16xf32>
    %c0_9 = arith.constant 0 : index
    %c0_10 = arith.constant 0 : index
    %16 = vector.load %arg3[%c0_9, %c0_10] : memref<1x16xf32, #tpu.memory_space<vmem>>, vector<1x16xf32>
    %cst_11 = arith.constant 9.99999974E-6 : f32
    %17 = vector.broadcast %cst_11 : f32 to vector<1x16xf32>
    %18 = arith.addf %15, %17 : vector<1x16xf32>
    %19 = math.rsqrt %18 : vector<1x16xf32>
    %20 = arith.mulf %16, %19 : vector<1x16xf32>
    %21 = vector.broadcast %20 : vector<1x16xf32> to vector<256x16xf32>
    %22 = arith.mulf %9, %21 : vector<256x16xf32>
    %c0_12 = arith.constant 0 : index
    %c0_13 = arith.constant 0 : index
    %23 = vector.load %arg4[%c0_12, %c0_13] : memref<1x16xf32, #tpu.memory_space<vmem>>, vector<1x16xf32>
    %24 = vector.broadcast %23 : vector<1x16xf32> to vector<256x16xf32>
    %25 = arith.addf %22, %24 : vector<256x16xf32>
    %c0_14 = arith.constant 0 : index
    %c0_15 = arith.constant 0 : index
    %c0_16 = arith.constant 0 : index
    %26 = vector.load %arg5[%c0_14, %c0_15, %c0_16] : memref<1x256x16xf32, #tpu.memory_space<vmem>>, vector<1x256x16xf32>
    %27 = vector.shape_cast %26 : vector<1x256x16xf32> to vector<256x16xf32>
    %28 = vector.shape_cast %25 : vector<256x16xf32> to vector<1x256x16xf32>
    tpu.vector_store %arg5[%c0_14, %c0_15, %c0_16], %28 {strides = array<i32>} : memref<1x256x16xf32, #tpu.memory_space<vmem>>, vector<1x256x16xf32>,
    return
  }
  func.func @transform_0(%arg0: i32) -> (i32, i32, i32) {
    %c0_i32 = arith.constant 0 : i32
    %c0_i32_0 = arith.constant 0 : i32
    %c0_i32_1 = arith.constant 0 : i32
    return %arg0, %c0_i32, %c0_i32_0 : i32, i32, i32
  }
  func.func @transform_1(%arg0: i32) -> (i32, i32) {
    %c0_i32 = arith.constant 0 : i32
    %c0_i32_0 = arith.constant 0 : i32
    %c0_i32_1 = arith.constant 0 : i32
    return %c0_i32, %c0_i32_0 : i32, i32
  }
  func.func @transform_2(%arg0: i32) -> (i32, i32) {
    %c0_i32 = arith.constant 0 : i32
    %c0_i32_0 = arith.constant 0 : i32
    %c0_i32_1 = arith.constant 0 : i32
    return %c0_i32, %c0_i32_0 : i32, i32
  }
  func.func @transform_3(%arg0: i32) -> (i32, i32) {
    %c0_i32 = arith.constant 0 : i32
    %c0_i32_0 = arith.constant 0 : i32
    %c0_i32_1 = arith.constant 0 : i32
    return %c0_i32, %c0_i32_0 : i32, i32
  }
  func.func @transform_4(%arg0: i32) -> (i32, i32, i32) {
    %c0_i32 = arith.constant 0 : i32
    %c0_i32_0 = arith.constant 0 : i32
    %c0_i32_1 = arith.constant 0 : i32
    return %arg0, %c0_i32, %c0_i32_0 : i32, i32, i32
  }
}

module attributes {stable_mosaic.version = 11 : i64} {
  func.func @_gn_add_relu_kernel(%arg0: i32, %arg1: memref<1x256x16xf32, #tpu.memory_space<vmem>>, %arg2: memref<16x16xf32, #tpu.memory_space<vmem>>, %arg3: memref<1x16xf32, #tpu.memory_space<vmem>>, %arg4: memref<1x16xf32, #tpu.memory_space<vmem>>, %arg5: memref<1x256x16xf32, #tpu.memory_space<vmem>>, %arg6: memref<1x256x16xf32, #tpu.memory_space<vmem>>) attributes {dimension_semantics = [#tpu.dimension_semantics<parallel>], iteration_bounds = array<i64: 2>, scalar_prefetch = 0 : i64, scratch_operands = 0 : i64, tpu.core_type = #tpu.core_type<tc>, window_params = [{transform_indices = @transform_0, window_bounds = array<i64: 1, 256, 16>}, {pipeline_mode = #tpu.pipeline_mode<synchronous>, transform_indices = @transform_1, window_bounds = array<i64: 16, 16>}, {pipeline_mode = #tpu.pipeline_mode<synchronous>, transform_indices = @transform_2, window_bounds = array<i64: 1, 16>}, {pipeline_mode = #tpu.pipeline_mode<synchronous>, transform_indices = @transform_3, window_bounds = array<i64: 1, 16>}, {transform_indices = @transform_4, window_bounds = array<i64: 1, 256, 16>}, {transform_indices = @transform_5, window_bounds = array<i64: 1, 256, 16>}]} {
    %c0 = arith.constant 0 : index
    %c0_0 = arith.constant 0 : index
    %c0_1 = arith.constant 0 : index
    %0 = vector.load %arg1[%c0, %c0_0, %c0_1] : memref<1x256x16xf32, #tpu.memory_space<vmem>>, vector<1x256x16xf32>
    %1 = vector.shape_cast %0 : vector<1x256x16xf32> to vector<256x16xf32>
    %c0_2 = arith.constant 0 : index
    %c0_3 = arith.constant 0 : index
    %2 = vector.load %arg2[%c0_2, %c0_3] : memref<16x16xf32, #tpu.memory_space<vmem>>, vector<16x16xf32>
    %cst = arith.constant dense<0.000000e+00> : vector<16xf32>
    %3 = vector.multi_reduction <add>, %1, %cst [0] : vector<256x16xf32> to vector<16xf32>
    %4 = vector.shape_cast %3 : vector<16xf32> to vector<1x16xf32>
    %cst_4 = arith.constant dense<0.000000e+00> : vector<1x16xf32>
    %5 = tpu.matmul %4, %2, %cst_4 {dimension_numbers = #tpu.dot_dimension_numbers<[1], [0], [0], [1], [0, 0, 1, 1], [], []>, precision = #tpu.contract_precision<fp32>} : vector<1x16xf32>, vector<16x16xf32>, vector<1x16xf32> -> vector<1x16xf32>
    %cst_5 = arith.constant 0.001953125 : f32
    %6 = vector.broadcast %cst_5 : f32 to vector<1x16xf32>
    %7 = arith.mulf %5, %6 : vector<1x16xf32>
    %8 = vector.broadcast %7 : vector<1x16xf32> to vector<256x16xf32>
    %9 = arith.subf %1, %8 : vector<256x16xf32>
    %10 = arith.mulf %9, %9 : vector<256x16xf32>
    %cst_6 = arith.constant dense<0.000000e+00> : vector<16xf32>
    %11 = vector.multi_reduction <add>, %10, %cst_6 [0] : vector<256x16xf32> to vector<16xf32>
    %12 = vector.shape_cast %11 : vector<16xf32> to vector<1x16xf32>
    %cst_7 = arith.constant dense<0.000000e+00> : vector<1x16xf32>
    %13 = tpu.matmul %12, %2, %cst_7 {dimension_numbers = #tpu.dot_dimension_numbers<[1], [0], [0], [1], [0, 0, 1, 1], [], []>, precision = #tpu.contract_precision<fp32>} : vector<1x16xf32>, vector<16x16xf32>, vector<1x16xf32> -> vector<1x16xf32>
    %cst_8 = arith.constant 0.001953125 : f32
    %14 = vector.broadcast %cst_8 : f32 to vector<1x16xf32>
    %15 = arith.mulf %13, %14 : vector<1x16xf32>
    %c0_9 = arith.constant 0 : index
    %c0_10 = arith.constant 0 : index
    %16 = vector.load %arg3[%c0_9, %c0_10] : memref<1x16xf32, #tpu.memory_space<vmem>>, vector<1x16xf32>
    %cst_11 = arith.constant 9.99999974E-6 : f32
    %17 = vector.broadcast %cst_11 : f32 to vector<1x16xf32>
    %18 = arith.addf %15, %17 : vector<1x16xf32>
    %19 = math.rsqrt %18 : vector<1x16xf32>
    %20 = arith.mulf %16, %19 : vector<1x16xf32>
    %21 = vector.broadcast %20 : vector<1x16xf32> to vector<256x16xf32>
    %22 = arith.mulf %9, %21 : vector<256x16xf32>
    %c0_12 = arith.constant 0 : index
    %c0_13 = arith.constant 0 : index
    %23 = vector.load %arg4[%c0_12, %c0_13] : memref<1x16xf32, #tpu.memory_space<vmem>>, vector<1x16xf32>
    %24 = vector.broadcast %23 : vector<1x16xf32> to vector<256x16xf32>
    %25 = arith.addf %22, %24 : vector<256x16xf32>
    %c0_14 = arith.constant 0 : index
    %c0_15 = arith.constant 0 : index
    %c0_16 = arith.constant 0 : index
    %26 = vector.load %arg5[%c0_14, %c0_15, %c0_16] : memref<1x256x16xf32, #tpu.memory_space<vmem>>, vector<1x256x16xf32>
    %27 = vector.shape_cast %26 : vector<1x256x16xf32> to vector<256x16xf32>
    %28 = arith.addf %25, %27 : vector<256x16xf32>
    %cst_17 = arith.constant 0.000000e+00 : f32
    %29 = vector.broadcast %cst_17 : f32 to vector<256x16xf32>
    %30 = arith.maximumf %28, %29 : vector<256x16xf32>
    %c0_18 = arith.constant 0 : index
    %c0_19 = arith.constant 0 : index
    %c0_20 = arith.constant 0 : index
    %31 = vector.load %arg6[%c0_18, %c0_19, %c0_20] : memref<1x256x16xf32, #tpu.memory_space<vmem>>, vector<1x256x16xf32>
    %32 = vector.shape_cast %31 : vector<1x256x16xf32> to vector<256x16xf32>
    %33 = vector.shape_cast %30 : vector<256x16xf32> to vector<1x256x16xf32>
    tpu.vector_store %arg6[%c0_18, %c0_19, %c0_20], %33 {strides = array<i32>} : memref<1x256x16xf32, #tpu.memory_space<vmem>>, vector<1x256x16xf32>,
    return
  }
  func.func @transform_0(%arg0: i32) -> (i32, i32, i32) {
    %c0_i32 = arith.constant 0 : i32
    %c0_i32_0 = arith.constant 0 : i32
    %c0_i32_1 = arith.constant 0 : i32
    return %arg0, %c0_i32, %c0_i32_0 : i32, i32, i32
  }
  func.func @transform_1(%arg0: i32) -> (i32, i32) {
    %c0_i32 = arith.constant 0 : i32
    %c0_i32_0 = arith.constant 0 : i32
    %c0_i32_1 = arith.constant 0 : i32
    return %c0_i32, %c0_i32_0 : i32, i32
  }
  func.func @transform_2(%arg0: i32) -> (i32, i32) {
    %c0_i32 = arith.constant 0 : i32
    %c0_i32_0 = arith.constant 0 : i32
    %c0_i32_1 = arith.constant 0 : i32
    return %c0_i32, %c0_i32_0 : i32, i32
  }
  func.func @transform_3(%arg0: i32) -> (i32, i32) {
    %c0_i32 = arith.constant 0 : i32
    %c0_i32_0 = arith.constant 0 : i32
    %c0_i32_1 = arith.constant 0 : i32
    return %c0_i32, %c0_i32_0 : i32, i32
  }
  func.func @transform_4(%arg0: i32) -> (i32, i32, i32) {
    %c0_i32 = arith.constant 0 : i32
    %c0_i32_0 = arith.constant 0 : i32
    %c0_i32_1 = arith.constant 0 : i32
    return %arg0, %c0_i32, %c0_i32_0 : i32, i32, i32
  }
  func.func @transform_5(%arg0: i32) -> (i32, i32, i32) {
    %c0_i32 = arith.constant 0 : i32
    %c0_i32_0 = arith.constant 0 : i32
    %c0_i32_1 = arith.constant 0 : i32
    return %arg0, %c0_i32, %c0_i32_0 : i32, i32, i32
  }
}

</mosaic_0001>

<bundles_post_ra>
// kernel: basic_block_forward.9
= control target key start
LH: loop header
LB: loop body
LE: loop exit
PB: predicated region body
PF: predicated region fallthrough
CT: control target
= control target key end

     0   :  { %s611_s9 = smov 0   ;;  %s754_s0 = inlined_call_operand.vmem [shape: f32[2,16,16,8], index: 0, kind: input, shape index: {}]   ;;  %s755_s1 = inlined_call_operand.vmem [shape: bf16[1,8,16], index: 1, kind: input, shape index: {}]   ;;  %s756_s2 = inlined_call_operand.vmem [shape: f32[2,16,16,16], index: 2, kind: output, shape index: {}]  }
   0x1 LB: > { %s496_s10 = sadd.s32 4294967295, %s594_s9   ;;  %p500_p0 = scmp.ge.s32.totalorder %s594_s9, 1  ;;  %s594_s9 = sphi %s611_s9, %s12_s9  }
   0x2   : > { %p112_p1 = scmp.lt.s32.totalorder %s594_s9, 3 }
   0x4   : > { %p113_p2 = pnand %p500_p0, %p112_p1 }
   0x5   : > { %v193_v0 = vld [vmem:[%s755_s1] sm:$0xf] (!%p113_p2)  ;;  %vm243_vm0 = vcmask (!%p113_p2), 1043456   ;;  %p134_p3 = scmp.lt.s32.totalorder (!%p113_p2), %s496_s10, 1  ;;  %vm194_vm1 = vcmask (!%p113_p2), 64512   ;;  %vm408_vm2 = vcmask (!%p113_p2), 130048  }
   0x6   : > { %116 = sbr.rel (%p113_p2) target bundleno = 261 (0x105), region = 28  ;;  %578 = vmatprep.subr.msk.bf16.mxu0 (!%p113_p2), %vm243_vm0, %v193_v0  ;;  %579 = vmatprep.subr.msk.bf16.mxu1 (!%p113_p2), %vm243_vm0, %v193_v0  ;;  %v245_v1 = vsel (!%p113_p2), %vm243_vm0, %v193_v0, 0 }
   0x7   : > { %543 = vmatpush3.bf16.msra.mxu0 (!%p113_p2), %v245_v1  ;;  %577 = vmatpush3.bf16.msra.mxu1 (!%p113_p2), %v245_v1 }
   0xd   : > { %s758_s10 = smov (!%p134_p3, %s496_s10), 1 }
   0xe   : > { %s523_s13 = sshll.u32 %s758_s10, 8 }
   0xf   : > { %s630_s16 = scalar_lea.vmem %s754_s0, %s523_s13  ;;  %s685_s19 = scalar_lea.vmem %s756_s2, %s523_s13 }
  0x10   : > { %v145_v2 = vld [vmem:[%s630_s16] sm:$0xff]  ;;  %v146_v3 = vld [vmem:[%s630_s16 + $0x8] sm:$0xff]  ;;  %v147_v7 = vld [vmem:[%s630_s16 + $0x10] sm:$0xff] }
  0x11   : > { %v161_v4 = vld [vmem:[%s630_s16 + $0x80] sm:$0xff]  ;;  %v177_v5 = vpack.c.bf16 %v146_v3, %v145_v2  ;;  %v162_v6 = vld [vmem:[%s630_s16 + $0x88] sm:$0xff]  ;;  %v148_v8 = vld [vmem:[%s630_s16 + $0x18] sm:$0xff] }
  0x12   : > { %v185_v9 = vpack.c.bf16 %v162_v6, %v161_v4  ;;  %v178_v10 = vpack.c.bf16 %v148_v8, %v147_v7  ;;  %v163_v11 = vld [vmem:[%s630_s16 + $0x90] sm:$0xff]  ;;  %v164_v12 = vld [vmem:[%s630_s16 + $0x98] sm:$0xff]  ;;  %v149_v13 = vld [vmem:[%s630_s16 + $0x20] sm:$0xff] }
  0x13   : > { %544 = vmatprep.mubr.msk.bf16.mxu0 %vm194_vm1, %v177_v5  ;;  %v186_v14 = vpack.c.bf16 %v164_v12, %v163_v11  ;;  %v150_v15 = vld [vmem:[%s630_s16 + $0x28] sm:$0xff]  ;;  %v165_v16 = vld [vmem:[%s630_s16 + $0xa0] sm:$0xff]  ;;  %v151_v20 = vld [vmem:[%s630_s16 + $0x30] sm:$0xff] }
  0x14   : > { %v166_v17 = vld [vmem:[%s630_s16 + $0xa8] sm:$0xff]  ;;  %560 = vmatprep.mubr.msk.bf16.mxu1 %vm194_vm1, %v185_v9  ;;  %545 = vmatmul.mubr.msk.bf16.vlgmr.msra.gmra.mrb[0].mxu0 %vm194_vm1, %v178_v10  ;;  %v179_v18 = vpack.c.bf16 %v150_v15, %v149_v13  ;;  %v152_v21 = vld [vmem:[%s630_s16 + $0x38] sm:$0xff]  ;;  %v167_v22 = vld [vmem:[%s630_s16 + $0xb0] sm:$0xff] }
  0x15   : > { %v187_v19 = vpack.c.bf16 %v166_v17, %v165_v16  ;;  %561 = vmatmul.mubr.msk.bf16.vlgmr.msra.gmra.mrb[0].mxu1 %vm194_vm1, %v186_v14  ;;  %v168_v23 = vld [vmem:[%s630_s16 + $0xb8] sm:$0xff]  ;;  %v153_v24 = vld [vmem:[%s630_s16 + $0x40] sm:$0xff]  ;;  %v154_v25 = vld [vmem:[%s630_s16 + $0x48] sm:$0xff]  ;;  %v180_v28 = vpack.c.bf16 %v152_v21, %v151_v20 }
  0x16   : > { %548 = vmatprep.mubr.msk.bf16.mxu0 %vm194_vm1, %v179_v18  ;;  %v169_v26 = vld [vmem:[%s630_s16 + $0xc0] sm:$0xff]  ;;  %v170_v27 = vld [vmem:[%s630_s16 + $0xc8] sm:$0xff]  ;;  %v188_v29 = vpack.c.bf16 %v168_v23, %v167_v22  ;;  %v181_v30 = vpack.c.bf16 %v154_v25, %v153_v24  ;;  %v155_v32 = vld [vmem:[%s630_s16 + $0x50] sm:$0xff] }
  0x17   : > { %564 = vmatprep.mubr.msk.bf16.mxu1 %vm194_vm1, %v187_v19  ;;  %v189_v31 = vpack.c.bf16 %v170_v27, %v169_v26  ;;  %v156_v33 = vld [vmem:[%s630_s16 + $0x58] sm:$0xff]  ;;  %v171_v34 = vld [vmem:[%s630_s16 + $0xd0] sm:$0xff]  ;;  %v157_v36 = vld [vmem:[%s630_s16 + $0x60] sm:$0xff] }
  0x18   : > { %v172_v35 = vld [vmem:[%s630_s16 + $0xd8] sm:$0xff]  ;;  %v158_v37 = vld [vmem:[%s630_s16 + $0x68] sm:$0xff]  ;;  %v173_v38 = vld [vmem:[%s630_s16 + $0xe0] sm:$0xff]  ;;  %v182_v40 = vpack.c.bf16 %v156_v33, %v155_v32 }
  0x19   : > { %v174_v39 = vld [vmem:[%s630_s16 + $0xe8] sm:$0xff]  ;;  %v190_v41 = vpack.c.bf16 %v172_v35, %v171_v34  ;;  %v183_v42 = vpack.c.bf16 %v158_v37, %v157_v36  ;;  %v159_v44 = vld [vmem:[%s630_s16 + $0x70] sm:$0xff]  ;;  %v160_v45 = vld [vmem:[%s630_s16 + $0x78] sm:$0xff] }
  0x1a   : > { %v191_v43 = vpack.c.bf16 %v174_v39, %v173_v38  ;;  %v175_v46 = vld [vmem:[%s630_s16 + $0xf0] sm:$0xff]  ;;  %v176_v47 = vld [vmem:[%s630_s16 + $0xf8] sm:$0xff]  ;;  %v184_v48 = vpack.c.bf16 %v160_v45, %v159_v44 }
  0x1b   : > { %v192_v49 = vpack.c.bf16 %v176_v47, %v175_v46 }
  0x1c   : > { %549 = vmatmul.mubr.msk.bf16.gmra.mrb[4].mxu0 %vm194_vm1, %v180_v28 }
  0x1d   : > { %565 = vmatmul.mubr.msk.bf16.gmra.mrb[4].mxu1 %vm194_vm1, %v188_v29  ;;  %552 = vmatprep.mubr.msk.bf16.mxu0 %vm194_vm1, %v181_v30 }
  0x1e   : > { %568 = vmatprep.mubr.msk.bf16.mxu1 %vm194_vm1, %v189_v31 }
  0x24   : > { %553 = vmatmul.mubr.msk.bf16.gmra.mrb[8].mxu0 %vm194_vm1, %v182_v40 }
  0x25   : > { %569 = vmatmul.mubr.msk.bf16.gmra.mrb[8].mxu1 %vm194_vm1, %v190_v41  ;;  %556 = vmatprep.mubr.msk.bf16.mxu0 %vm194_vm1, %v183_v42 }
  0x26   : > { %572 = vmatprep.mubr.msk.bf16.mxu1 %vm194_vm1, %v191_v43 }
  0x2c   : > { %557 = vmatmul.mubr.msk.bf16.gmra.mrb[12].mxu0 %vm194_vm1, %v184_v48 }
  0x2d   : > { %573 = vmatmul.mubr.msk.bf16.gmra.mrb[12].mxu1 %vm194_vm1, %v192_v49 }
  0xe7   : > { %v546_v50 = vpop.f32.mrb[0].mxu0 }
  0xe8   : > { %411 = vst.msk [vmem:[%s685_s19 + $0x10] sm:$0xff] %vm408_vm2, %v546_v50  ;;  %v562_v51 = vpop.f32.mrb[0].mxu1  ;;  %v281_v52 = vpop.f32.mrb[1].mxu0 }
  0xe9   : > { %427 = vst.msk [vmem:[%s685_s19 + $0x90] sm:$0xff] %vm408_vm2, %v562_v51  ;;  %409 = vst.msk [vmem:[%s685_s19] sm:$0xff] %vm408_vm2, %v281_v52  ;;  %v345_v53 = vpop.f32.mrb[1].mxu1  ;;  %v547_v54 = vpop.f32.mrb[2].mxu0 }
  0xea   : > { %425 = vst.msk [vmem:[%s685_s19 + $0x80] sm:$0xff] %vm408_vm2, %v345_v53  ;;  %412 = vst.msk [vmem:[%s685_s19 + $0x18] sm:$0xff] %vm408_vm2, %v547_v54  ;;  %v563_v55 = vpop.f32.mrb[2].mxu1  ;;  %v284_v56 = vpop.f32.mrb[3].mxu0 }
  0xeb   : > { %428 = vst.msk [vmem:[%s685_s19 + $0x98] sm:$0xff] %vm408_vm2, %v563_v55  ;;  %410 = vst.msk [vmem:[%s685_s19 + $0x8] sm:$0xff] %vm408_vm2, %v284_v56  ;;  %v348_v57 = vpop.f32.mrb[3].mxu1 }
  0xec   : > { %426 = vst.msk [vmem:[%s685_s19 + $0x88] sm:$0xff] %vm408_vm2, %v348_v57 }
  0xef   : > { %v550_v58 = vpop.f32.mrb[4].mxu0 }
  0xf0   : > { %415 = vst.msk [vmem:[%s685_s19 + $0x30] sm:$0xff] %vm408_vm2, %v550_v58  ;;  %v566_v59 = vpop.f32.mrb[4].mxu1  ;;  %v297_v60 = vpop.f32.mrb[5].mxu0 }
  0xf1   : > { %431 = vst.msk [vmem:[%s685_s19 + $0xb0] sm:$0xff] %vm408_vm2, %v566_v59  ;;  %413 = vst.msk [vmem:[%s685_s19 + $0x20] sm:$0xff] %vm408_vm2, %v297_v60  ;;  %v361_v61 = vpop.f32.mrb[5].mxu1  ;;  %v551_v62 = vpop.f32.mrb[6].mxu0 }
  0xf2   : > { %429 = vst.msk [vmem:[%s685_s19 + $0xa0] sm:$0xff] %vm408_vm2, %v361_v61  ;;  %416 = vst.msk [vmem:[%s685_s19 + $0x38] sm:$0xff] %vm408_vm2, %v551_v62  ;;  %v567_v63 = vpop.f32.mrb[6].mxu1  ;;  %v300_v0 = vpop.f32.mrb[7].mxu0 }
  0xf3   : > { %432 = vst.msk [vmem:[%s685_s19 + $0xb8] sm:$0xff] %vm408_vm2, %v567_v63  ;;  %414 = vst.msk [vmem:[%s685_s19 + $0x28] sm:$0xff] %vm408_vm2, %v300_v0  ;;  %v364_v1 = vpop.f32.mrb[7].mxu1 }
  0xf4   : > { %430 = vst.msk [vmem:[%s685_s19 + $0xa8] sm:$0xff] %vm408_vm2, %v364_v1 }
  0xf7   : > { %v554_v2 = vpop.f32.mrb[8].mxu0 }
  0xf8   : > { %419 = vst.msk [vmem:[%s685_s19 + $0x50] sm:$0xff] %vm408_vm2, %v554_v2  ;;  %v570_v3 = vpop.f32.mrb[8].mxu1  ;;  %v313_v4 = vpop.f32.mrb[9].mxu0 }
  0xf9   : > { %435 = vst.msk [vmem:[%s685_s19 + $0xd0] sm:$0xff] %vm408_vm2, %v570_v3  ;;  %417 = vst.msk [vmem:[%s685_s19 + $0x40] sm:$0xff] %vm408_vm2, %v313_v4  ;;  %v377_v5 = vpop.f32.mrb[9].mxu1  ;;  %v555_v6 = vpop.f32.mrb[10].mxu0 }
  0xfa   : > { %433 = vst.msk [vmem:[%s685_s19 + $0xc0] sm:$0xff] %vm408_vm2, %v377_v5  ;;  %420 = vst.msk [vmem:[%s685_s19 + $0x58] sm:$0xff] %vm408_vm2, %v555_v6  ;;  %v571_v7 = vpop.f32.mrb[10].mxu1  ;;  %v316_v8 = vpop.f32.mrb[11].mxu0 }
  0xfb   : > { %436 = vst.msk [vmem:[%s685_s19 + $0xd8] sm:$0xff] %vm408_vm2, %v571_v7  ;;  %418 = vst.msk [vmem:[%s685_s19 + $0x48] sm:$0xff] %vm408_vm2, %v316_v8  ;;  %v380_v9 = vpop.f32.mrb[11].mxu1 }
  0xfc   : > { %434 = vst.msk [vmem:[%s685_s19 + $0xc8] sm:$0xff] %vm408_vm2, %v380_v9 }
  0xff   : > { %v558_v10 = vpop.f32.mrb[12].mxu0 }
 0x100   : > { %423 = vst.msk [vmem:[%s685_s19 + $0x70] sm:$0xff] %vm408_vm2, %v558_v10  ;;  %v574_v11 = vpop.f32.mrb[12].mxu1  ;;  %v329_v12 = vpop.f32.mrb[13].mxu0 }
 0x101   : > { %439 = vst.msk [vmem:[%s685_s19 + $0xf0] sm:$0xff] %vm408_vm2, %v574_v11  ;;  %421 = vst.msk [vmem:[%s685_s19 + $0x60] sm:$0xff] %vm408_vm2, %v329_v12  ;;  %v393_v13 = vpop.f32.mrb[13].mxu1  ;;  %v559_v14 = vpop.f32.mrb[14].mxu0 }
 0x102   : > { %437 = vst.msk [vmem:[%s685_s19 + $0xe0] sm:$0xff] %vm408_vm2, %v393_v13  ;;  %424 = vst.msk [vmem:[%s685_s19 + $0x78] sm:$0xff] %vm408_vm2, %v559_v14  ;;  %v575_v15 = vpop.f32.mrb[14].mxu1  ;;  %v332_v16 = vpop.f32.mrb[15].mxu0 }
 0x103   : > { %440 = vst.msk [vmem:[%s685_s19 + $0xf8] sm:$0xff] %vm408_vm2, %v575_v15  ;;  %422 = vst.msk [vmem:[%s685_s19 + $0x68] sm:$0xff] %vm408_vm2, %v332_v16  ;;  %v396_v17 = vpop.f32.mrb[15].mxu1 }
 0x104   : > { %438 = vst.msk [vmem:[%s685_s19 + $0xe8] sm:$0xff] %vm408_vm2, %v396_v17 }
 0x105 PF: > { %s12_s9 = sadd.s32 1, %s594_s9  }
 0x106   : > { %p9_p4 = scmp.ge.s32.totalorder %s12_s9, 4  }
 0x108   :  { %11 = sbr.rel (!%p9_p4) target bundleno = 1 (0x1), region = 58 }

// kernel: basic_block_forward.7
= control target key start
LH: loop header
LB: loop body
LE: loop exit
PB: predicated region body
PF: predicated region fallthrough
CT: control target
= control target key end

     0   :  { %s1804_s15 = smov 0   ;;  %s2427_s0 = inlined_call_operand.vmem [shape: f32[2,256,16], index: 0, kind: input, shape index: {}]   ;;  %s2428_s1 = inlined_call_operand.vmem [shape: f32[16,16], index: 1, kind: input, shape index: {}]   ;;  %s2429_s2 = inlined_call_operand.vmem [shape: f32[1,16], index: 2, kind: input, shape index: {}]   ;;  %s2430_s3 = inlined_call_operand.vmem [shape: f32[1,16], index: 3, kind: input, shape index: {}]   ;;  %s2431_s4 = inlined_call_operand.vmem [shape: f32[2,256,16], index: 4, kind: output, shape index: {}]  }
   0x1 LB: > { %s1565_s16 = sadd.s32 4294967295, %s1774_s15   ;;  %p1569_p0 = scmp.ge.s32.totalorder %s1774_s15, 1  ;;  %s1774_s15 = sphi %s1804_s15, %s14_s15  }
   0x2   : > { %p162_p1 = scmp.lt.s32.totalorder %s1774_s15, 3 }
   0x4   : > { %p163_p2 = pnand %p1569_p0, %p162_p1 }
   0x5   : > { %v230_v0 = vld [vmem:[%s2428_s1] sm:$0xff] (!%p163_p2)  ;;  %v231_v1 = vld [vmem:[%s2428_s1 + $0x8] sm:$0xff] (!%p163_p2)  ;;  %p188_p3 = scmp.lt.s32.totalorder (!%p163_p2), %s1565_s16, 1  ;;  %v1776_v2 = vmov (!%p163_p2), 0.0|0.0   ;;  %vm1777_vm0 = vmmov (!%p163_p2), 0   ;;  %v1778_v5 = vmov (!%p163_p2), 0.0  }
   0x6   : > { %166 = sbr.rel (%p163_p2) target bundleno = 754 (0x2f2), region = 36  ;;  %1699 = vmatprep.subr.bf16.mxu0 (!%p163_p2), %v1776_v2  ;;  %v306_v3 = vand.u32 (!%p163_p2), 4294901760, %v230_v0  ;;  %v309_v4 = vand.u32 (!%p163_p2), 4294901760, %v231_v1  ;;  %1619 = vmatprep.mubr.msk.f32.mxu0 (!%p163_p2), %vm1777_vm0, %v1778_v5  ;;  %vm232_vm1 = vcmask (!%p163_p2), 130048  }
   0x7   : > { %1717 = vmatprep.subr.bf16.mxu1 (!%p163_p2), %v1776_v2  ;;  %1661 = vmatprep.mubr.msk.f32.mxu1 (!%p163_p2), %vm1777_vm0, %v1778_v5 }
   0x8   : > { %v1826_v6 = vpack.c.bf16 (!%p163_p2), %v309_v4, %v306_v3  ;;  %v384_v7 = vsub.f32 (!%p163_p2), %v230_v0, %v306_v3  ;;  %v391_v8 = vsub.f32 (!%p163_p2), %v231_v1, %v309_v4 }
   0xa   : > { %1701 = vmatpush3.bf16.msra.mxu0 (!%p163_p2), %v1826_v6  ;;  %v1837_v9 = vpack.c.bf16 (!%p163_p2), %v391_v8, %v384_v7  ;;  %1719 = vmatpush3.bf16.msra.mxu1 (!%p163_p2), %v1826_v6  ;;  %v385_v20 = vand.u32 (!%p163_p2), 4294901760, %v384_v7  ;;  %v392_v21 = vand.u32 (!%p163_p2), 4294901760, %v391_v8 }
   0xb   : > { %1702 = vmatprep.subr.bf16.mxu0 (!%p163_p2), %v1776_v2  ;;  %1720 = vmatprep.subr.bf16.mxu1 (!%p163_p2), %v1776_v2 }
   0xc   : > { %v1870_v25 = vpack.c.bf16 (!%p163_p2), %v392_v21, %v385_v20  ;;  %v386_v29 = vsub.f32 (!%p163_p2), %v384_v7, %v385_v20  ;;  %v393_v30 = vsub.f32 (!%p163_p2), %v391_v8, %v392_v21 }
   0xd   : > { %s2433_s16 = smov (!%p188_p3, %s1565_s16), 1 }
   0xe   : > { %s1577_s21 = sshll.u32 %s2433_s16, 8  ;;  %v387_v37 = vand.u32 4294901760, %v386_v29  ;;  %v394_v38 = vand.u32 4294901760, %v393_v30 }
   0xf   : > { %s1835_s24 = scalar_lea.vmem %s2427_s0, %s1577_s21  ;;  %s2338_s5 = scalar_lea.vmem %s2431_s4, %s1577_s21 }
  0x10   : > { %v1842_v10 = vld [vmem:[%s1835_s24] sm:$0xff]  ;;  %v1845_v11 = vld [vmem:[%s1835_s24 + $0x8] sm:$0xff]  ;;  %v1848_v12 = vld [vmem:[%s1835_s24 + $0x10] sm:$0xff]  ;;  %v1892_v42 = vpack.c.bf16 %v394_v38, %v387_v37 }
  0x11   : > { %v1852_v13 = vld [vmem:[%s1835_s24 + $0x18] sm:$0xff]  ;;  %v233_v14 = vsel %vm232_vm1, %v1842_v10, 0.0  ;;  %v234_v15 = vsel %vm232_vm1, %v1845_v11, 0.0  ;;  %v236_v16 = vsel %vm232_vm1, %v1848_v12, 0.0  ;;  %v1861_v17 = vld [vmem:[%s1835_s24 + $0x20] sm:$0xff]  ;;  %v1866_v22 = vld [vmem:[%s1835_s24 + $0x28] sm:$0xff] }
  0x12   : > { %v235_v18 = vadd.f32 %v234_v15, %v233_v14  ;;  %v238_v19 = vsel %vm232_vm1, %v1852_v13, 0.0  ;;  %v240_v24 = vsel %vm232_vm1, %v1861_v17, 0.0  ;;  %v1873_v26 = vld [vmem:[%s1835_s24 + $0x30] sm:$0xff]  ;;  %v242_v28 = vsel %vm232_vm1, %v1866_v22, 0.0  ;;  %v1878_v31 = vld [vmem:[%s1835_s24 + $0x38] sm:$0xff]  ;;  %v1883_v34 = vld [vmem:[%s1835_s24 + $0x40] sm:$0xff] }
  0x13   : > { %v244_v33 = vsel %vm232_vm1, %v1873_v26, 0.0  ;;  %v246_v36 = vsel %vm232_vm1, %v1878_v31, 0.0  ;;  %v1888_v39 = vld [vmem:[%s1835_s24 + $0x48] sm:$0xff]  ;;  %v248_v41 = vsel %vm232_vm1, %v1883_v34, 0.0  ;;  %v1895_v43 = vld [vmem:[%s1835_s24 + $0x50] sm:$0xff]  ;;  %v1900_v46 = vld [vmem:[%s1835_s24 + $0x58] sm:$0xff] }
  0x14   : > { %v237_v23 = vadd.f32 %v236_v16, %v235_v18  ;;  %v250_v45 = vsel %vm232_vm1, %v1888_v39, 0.0  ;;  %v252_v48 = vsel %vm232_vm1, %v1895_v43, 0.0  ;;  %v1905_v49 = vld [vmem:[%s1835_s24 + $0x60] sm:$0xff]  ;;  %v254_v51 = vsel %vm232_vm1, %v1900_v46, 0.0  ;;  %v1910_v52 = vld [vmem:[%s1835_s24 + $0x68] sm:$0xff]  ;;  %v1915_v55 = vld [vmem:[%s1835_s24 + $0x70] sm:$0xff] }
  0x15   : > { %v256_v54 = vsel %vm232_vm1, %v1905_v49, 0.0  ;;  %v258_v57 = vsel %vm232_vm1, %v1910_v52, 0.0  ;;  %v1920_v58 = vld [vmem:[%s1835_s24 + $0x78] sm:$0xff]  ;;  %v260_v60 = vsel %vm232_vm1, %v1915_v55, 0.0  ;;  %v1925_v61 = vld [vmem:[%s1835_s24 + $0x80] sm:$0xff]  ;;  %v1930_v0 = vld [vmem:[%s1835_s24 + $0x88] sm:$0xff] }
  0x16   : > { %v239_v27 = vadd.f32 %v238_v19, %v237_v23  ;;  %v262_v63 = vsel %vm232_vm1, %v1920_v58, 0.0  ;;  %v264_v3 = vsel %vm232_vm1, %v1925_v61, 0.0  ;;  %v1935_v4 = vld [vmem:[%s1835_s24 + $0x90] sm:$0xff]  ;;  %v266_v8 = vsel %vm232_vm1, %v1930_v0, 0.0  ;;  %v1940_v14 = vld [vmem:[%s1835_s24 + $0x98] sm:$0xff]  ;;  %v1945_v18 = vld [vmem:[%s1835_s24 + $0xa0] sm:$0xff] }
  0x17   : > { %v268_v16 = vsel %vm232_vm1, %v1935_v4, 0.0  ;;  %v270_v20 = vsel %vm232_vm1, %v1940_v14, 0.0  ;;  %v1950_v21 = vld [vmem:[%s1835_s24 + $0xa8] sm:$0xff]  ;;  %v1960_v30 = vld [vmem:[%s1835_s24 + $0xb8] sm:$0xff] }
  0x18   : > { %v241_v32 = vadd.f32 %v240_v24, %v239_v27  ;;  %v272_v24 = vsel %vm232_vm1, %v1945_v18, 0.0  ;;  %v1955_v27 = vld [vmem:[%s1835_s24 + $0xb0] sm:$0xff]  ;;  %v274_v29 = vsel %vm232_vm1, %v1950_v21, 0.0  ;;  %v278_v37 = vsel %vm232_vm1, %v1960_v30, 0.0  ;;  %v1970_v38 = vld [vmem:[%s1835_s24 + $0xc8] sm:$0xff] }
  0x1a   : > { %v243_v35 = vadd.f32 %v242_v28, %v241_v32 }
  0x1c   : > { %v245_v40 = vadd.f32 %v244_v33, %v243_v35  ;;  %v276_v33 = vsel %vm232_vm1, %v1955_v27, 0.0  ;;  %v1965_v35 = vld [vmem:[%s1835_s24 + $0xc0] sm:$0xff] }
  0x1e   : > { %v247_v44 = vadd.f32 %v246_v36, %v245_v40 }
  0x20   : > { %v249_v47 = vadd.f32 %v248_v41, %v247_v44  ;;  %v280_v41 = vsel %vm232_vm1, %v1965_v35, 0.0  ;;  %v1975_v44 = vld [vmem:[%s1835_s24 + $0xd0] sm:$0xff] }
  0x22   : > { %v251_v50 = vadd.f32 %v250_v45, %v249_v47  ;;  %v282_v47 = vsel %vm232_vm1, %v1970_v38, 0.0 }
  0x24   : > { %v253_v53 = vadd.f32 %v252_v48, %v251_v50  ;;  %v1980_v48 = vld [vmem:[%s1835_s24 + $0xd8] sm:$0xff] }
  0x26   : > { %v255_v56 = vadd.f32 %v254_v51, %v253_v53  ;;  %v284_v51 = vsel %vm232_vm1, %v1975_v44, 0.0  ;;  %v1985_v53 = vld [vmem:[%s1835_s24 + $0xe0] sm:$0xff] }
  0x28   : > { %v257_v59 = vadd.f32 %v256_v54, %v255_v56  ;;  %v286_v56 = vsel %vm232_vm1, %v1980_v48, 0.0 }
  0x2a   : > { %v259_v62 = vadd.f32 %v258_v57, %v257_v59  ;;  %v1990_v57 = vld [vmem:[%s1835_s24 + $0xe8] sm:$0xff] }
  0x2c   : > { %v261_v1 = vadd.f32 %v260_v60, %v259_v62  ;;  %v288_v60 = vsel %vm232_vm1, %v1985_v53, 0.0  ;;  %v1995_v62 = vld [vmem:[%s1835_s24 + $0xf0] sm:$0xff] }
  0x2e   : > { %v263_v7 = vadd.f32 %v262_v63, %v261_v1  ;;  %v290_v1 = vsel %vm232_vm1, %v1990_v57, 0.0 }
  0x30   : > { %v265_v15 = vadd.f32 %v264_v3, %v263_v7  ;;  %v2000_v3 = vld [vmem:[%s1835_s24 + $0xf8] sm:$0xff] }
  0x32   : > { %v267_v19 = vadd.f32 %v266_v8, %v265_v15  ;;  %v292_v8 = vsel %vm232_vm1, %v1995_v62, 0.0 }
  0x34   : > { %v269_v23 = vadd.f32 %v268_v16, %v267_v19  ;;  %v294_v16 = vsel %vm232_vm1, %v2000_v3, 0.0 }
  0x36   : > { %v271_v28 = vadd.f32 %v270_v20, %v269_v23 }
  0x38   : > { %v273_v32 = vadd.f32 %v272_v24, %v271_v28 }
  0x3a   : > { %v275_v36 = vadd.f32 %v274_v29, %v273_v32 }
  0x3c   : > { %v277_v40 = vadd.f32 %v276_v33, %v275_v36 }
  0x3e   : > { %v279_v45 = vadd.f32 %v278_v37, %v277_v40 }
  0x40   : > { %v281_v50 = vadd.f32 %v280_v41, %v279_v45 }
  0x42   : > { %v283_v54 = vadd.f32 %v282_v47, %v281_v50  ;;  %v765_v50 = vlaneseq }
  0x44   : > { %v285_v59 = vadd.f32 %v284_v51, %v283_v54  ;;  %v2026_v54 = vshrl.u32 %v765_v50, 7 }
  0x46   : > { %v287_v63 = vadd.f32 %v286_v56, %v285_v59 }
  0x48   : > { %v289_v7 = vadd.f32 %v288_v60, %v287_v63  ;;  %v767_v60 = vsub.s32 0, %v2026_v54 }
  0x4a   : > { %v291_v15 = vadd.f32 %v290_v1, %v289_v7 }
  0x4c   : > { %v293_v19 = vadd.f32 %v292_v8, %v291_v15 }
  0x4e   : > { %v295_v20 = vadd.f32 %v294_v16, %v293_v19 }
  0x50   : > { %v296_v23 = vrot.slane %v295_v20, 4 }
  0x52   : > { %v297_v24 = vadd.f32 %v296_v23, %v295_v20 }
  0x54   : > { %v298_v28 = vrot.slane %v297_v24, 2 }
  0x56   : > { %v299_v29 = vadd.f32 %v298_v28, %v297_v24 }
  0x58   : > { %v300_v32 = vrot.slane %v299_v29, 1 }
  0x5a   : > { %v301_v33 = vadd.f32 %v300_v32, %v299_v29 }
  0x5c   : > { %v303_v36 = vsel %vm232_vm1, %v301_v33, 0 }
  0x5d   : > { %v372_v37 = vand.u32 4294901760, %v303_v36 }
  0x5f   : > { %v373_v40 = vsub.f32 %v303_v36, %v372_v37 }
  0x61   : > { %v374_v41 = vand.u32 4294901760, %v373_v40 }
  0x63   : > { %v375_v45 = vsub.f32 %v373_v40, %v374_v41 }
  0x65   : > { %v376_v47 = vand.u32 4294901760, %v375_v45 }
  0x67   : > { %1620 = vmatmul.mubr.f32.vlgmr.msra.gmra.mrb[0].mxu0 %v376_v47 }
  0x68   : > { %1704 = vmatpush3.bf16.msra.mxu0 %v1892_v42  ;;  %1626 = vmatprep.mubr.msk.f32.mxu0 %vm1777_vm0, %v1778_v5 }
  0x69   : > { %1705 = vmatprep.subr.bf16.mxu0 %v1776_v2 }
  0x6f   : > { %1627 = vmatmul.mubr.f32.vlgmr.msra.gmra.mrb[0].mxu0 %v372_v37 }
  0x70   : > { %1707 = vmatpush3.bf16.msra.mxu0 %v1837_v9  ;;  %1633 = vmatprep.mubr.msk.f32.mxu0 %vm1777_vm0, %v1778_v5 }
  0x71   : > { %1708 = vmatprep.subr.bf16.mxu0 %v1776_v2 }
  0x77   : > { %1634 = vmatmul.mubr.f32.vlgmr.msra.gmra.mrb[0].mxu0 %v373_v40 }
  0x78   : > { %1710 = vmatpush3.bf16.msra.mxu0 %v1826_v6  ;;  %1640 = vmatprep.mubr.msk.f32.mxu0 %vm1777_vm0, %v1778_v5 }
  0x79   : > { %1711 = vmatprep.subr.bf16.mxu0 %v1776_v2 }
  0x7f   : > { %1641 = vmatmul.mubr.f32.vlgmr.msra.gmra.mrb[0].mxu0 %v374_v41 }
  0x80   : > { %1713 = vmatpush3.bf16.msra.mxu0 %v1870_v25  ;;  %1647 = vmatprep.mubr.msk.f32.mxu0 %vm1777_vm0, %v1778_v5 }
  0x81   : > { %1714 = vmatprep.subr.bf16.mxu0 %v1776_v2 }
  0x87   : > { %1648 = vmatmul.mubr.f32.vlgmr.msra.gmra.mrb[0].mxu0 %v372_v37 }
  0x88   : > { %1716 = vmatpush3.bf16.msra.mxu0 %v1826_v6  ;;  %1654 = vmatprep.mubr.msk.f32.mxu0 %vm1777_vm0, %v1778_v5 }
  0x8f   : > { %1655 = vmatmul.mubr.f32.vlgmr.msra.gmra.mrb[0].mxu0 %v372_v37 }
 0x162   : > { %v760_v51 = vpop.f32.mrb[0].mxu0 }
 0x163   : > { %v1656_v56 = vpop.f32.mrb[1].mxu0  ;;  %v764_v59 = vmul.f32 0.001953125, %v760_v51 }
 0x165   : > { %v2031_v63 = vrot.slane %v764_v59, %v767_v60 }
 0x167   : > { %v2035_v1 = vsub.f32 %v1842_v10, %v2031_v63  ;;  %v2039_v7 = vsub.f32 %v1845_v11, %v2031_v63  ;;  %v2043_v8 = vsub.f32 %v1848_v12, %v2031_v63  ;;  %v2047_v15 = vsub.f32 %v1852_v13, %v2031_v63 }
 0x168   : > { %v2055_v10 = vsub.f32 %v1861_v17, %v2031_v63  ;;  %v2061_v12 = vsub.f32 %v1866_v22, %v2031_v63  ;;  %v2069_v28 = vsub.f32 %v1873_v26, %v2031_v63  ;;  %v2076_v22 = vsub.f32 %v1878_v31, %v2031_v63 }
 0x169   : > { %v801_v16 = vmul.f32 %v2035_v1, %v2035_v1  ;;  %v802_v19 = vmul.f32 %v2039_v7, %v2039_v7  ;;  %v803_v11 = vmul.f32 %v2043_v8, %v2043_v8  ;;  %v804_v13 = vmul.f32 %v2047_v15, %v2047_v15 }
 0x16a   : > { %v805_v17 = vmul.f32 %v2055_v10, %v2055_v10  ;;  %v806_v33 = vmul.f32 %v2061_v12, %v2061_v12  ;;  %v2083_v26 = vsub.f32 %v1883_v34, %v2031_v63  ;;  %v807_v40 = vmul.f32 %v2069_v28, %v2069_v28 }
 0x16b   : > { %v833_v20 = vsel %vm232_vm1, %v801_v16, 0.0  ;;  %v834_v23 = vsel %vm232_vm1, %v802_v19, 0.0  ;;  %v836_v29 = vsel %vm232_vm1, %v803_v11, 0.0  ;;  %v838_v36 = vsel %vm232_vm1, %v804_v13, 0.0 }
 0x16c   : > { %v835_v24 = vadd.f32 %v834_v23, %v833_v20  ;;  %v840_v41 = vsel %vm232_vm1, %v805_v17, 0.0  ;;  %v2090_v31 = vsub.f32 %v1888_v39, %v2031_v63  ;;  %v808_v47 = vmul.f32 %v2076_v22, %v2076_v22 }
 0x16d   : > { %v842_v50 = vsel %vm232_vm1, %v806_v33, 0.0  ;;  %v2097_v34 = vsub.f32 %v1895_v43, %v2031_v63  ;;  %v809_v56 = vmul.f32 %v2083_v26, %v2083_v26  ;;  %v844_v59 = vsel %vm232_vm1, %v807_v40, 0.0 }
 0x16e   : > { %v837_v32 = vadd.f32 %v836_v29, %v835_v24  ;;  %v2104_v39 = vsub.f32 %v1900_v46, %v2031_v63  ;;  %v810_v19 = vmul.f32 %v2090_v31, %v2090_v31  ;;  %v846_v11 = vsel %vm232_vm1, %v808_v47, 0.0 }
 0x16f   : > { %v2111_v43 = vsub.f32 %v1905_v49, %v2031_v63  ;;  %v811_v20 = vmul.f32 %v2097_v34, %v2097_v34  ;;  %v848_v23 = vsel %vm232_vm1, %v809_v56, 0.0  ;;  %v2118_v46 = vsub.f32 %v1910_v52, %v2031_v63 }
 0x170   : > { %v839_v37 = vadd.f32 %v838_v36, %v837_v32  ;;  %v812_v17 = vmul.f32 %v2104_v39, %v2104_v39  ;;  %v850_v29 = vsel %vm232_vm1, %v810_v19, 0.0  ;;  %v2125_v49 = vsub.f32 %v1915_v55, %v2031_v63 }
 0x171   : > { %v813_v33 = vmul.f32 %v2111_v43, %v2111_v43  ;;  %v852_v36 = vsel %vm232_vm1, %v811_v20, 0.0  ;;  %v2132_v52 = vsub.f32 %v1920_v58, %v2031_v63  ;;  %v814_v40 = vmul.f32 %v2118_v46, %v2118_v46 }
 0x172   : > { %v841_v45 = vadd.f32 %v840_v41, %v839_v37  ;;  %v854_v41 = vsel %vm232_vm1, %v812_v17, 0.0  ;;  %v2139_v55 = vsub.f32 %v1925_v61, %v2031_v63  ;;  %v815_v47 = vmul.f32 %v2125_v49, %v2125_v49 }
 0x173   : > { %v2146_v58 = vsub.f32 %v1930_v0, %v2031_v63  ;;  %v816_v56 = vmul.f32 %v2132_v52, %v2132_v52  ;;  %v2153_v61 = vsub.f32 %v1935_v4, %v2031_v63  ;;  %v2160_v0 = vsub.f32 %v1940_v14, %v2031_v63 }
 0x174   : > { %v843_v51 = vadd.f32 %v842_v50, %v841_v45  ;;  %v856_v50 = vsel %vm232_vm1, %v813_v33, 0.0  ;;  %v817_v19 = vmul.f32 %v2139_v55, %v2139_v55  ;;  %v2167_v4 = vsub.f32 %v1945_v18, %v2031_v63 }
 0x175   : > { %v818_v20 = vmul.f32 %v2146_v58, %v2146_v58  ;;  %v819_v17 = vmul.f32 %v2153_v61, %v2153_v61  ;;  %v2174_v14 = vsub.f32 %v1950_v21, %v2031_v63  ;;  %v820_v33 = vmul.f32 %v2160_v0, %v2160_v0 }
 0x176   : > { %v845_v16 = vadd.f32 %v844_v59, %v843_v51  ;;  %v858_v59 = vsel %vm232_vm1, %v814_v40, 0.0  ;;  %v2181_v18 = vsub.f32 %v1955_v27, %v2031_v63  ;;  %v821_v40 = vmul.f32 %v2167_v4, %v2167_v4 }
 0x177   : > { %v2188_v21 = vsub.f32 %v1960_v30, %v2031_v63  ;;  %v2195_v27 = vsub.f32 %v1965_v35, %v2031_v63  ;;  %v2202_v30 = vsub.f32 %v1970_v38, %v2031_v63  ;;  %v2209_v35 = vsub.f32 %v1975_v44, %v2031_v63 }
 0x178   : > { %v847_v13 = vadd.f32 %v846_v11, %v845_v16  ;;  %v860_v11 = vsel %vm232_vm1, %v815_v47, 0.0  ;;  %v822_v47 = vmul.f32 %v2174_v14, %v2174_v14  ;;  %v2216_v38 = vsub.f32 %v1980_v48, %v2031_v63 }
 0x179   : > { %v2223_v44 = vsub.f32 %v1985_v53, %v2031_v63  ;;  %v2230_v48 = vsub.f32 %v1990_v57, %v2031_v63  ;;  %v2237_v53 = vsub.f32 %v1995_v62, %v2031_v63  ;;  %v2244_v57 = vsub.f32 %v2000_v3, %v2031_v63 }
 0x17a   : > { %v849_v24 = vadd.f32 %v848_v23, %v847_v13  ;;  %v862_v23 = vsel %vm232_vm1, %v816_v56, 0.0  ;;  %v823_v56 = vmul.f32 %v2181_v18, %v2181_v18 }
 0x17b   : > { %v831_v62 = vmul.f32 %v2237_v53, %v2237_v53 }
 0x17c   : > { %v851_v32 = vadd.f32 %v850_v29, %v849_v24  ;;  %v864_v29 = vsel %vm232_vm1, %v817_v19, 0.0  ;;  %v824_v19 = vmul.f32 %v2188_v21, %v2188_v21 }
 0x17d   : > { %v892_v3 = vsel %vm232_vm1, %v831_v62, 0.0 }
 0x17e   : > { %v853_v37 = vadd.f32 %v852_v36, %v851_v32  ;;  %v866_v36 = vsel %vm232_vm1, %v818_v20, 0.0  ;;  %v825_v20 = vmul.f32 %v2195_v27, %v2195_v27 }
 0x180   : > { %v855_v45 = vadd.f32 %v854_v41, %v853_v37  ;;  %v868_v41 = vsel %vm232_vm1, %v819_v17, 0.0  ;;  %v826_v17 = vmul.f32 %v2202_v30, %v2202_v30 }
 0x182   : > { %v857_v51 = vadd.f32 %v856_v50, %v855_v45  ;;  %v870_v50 = vsel %vm232_vm1, %v820_v33, 0.0  ;;  %v827_v33 = vmul.f32 %v2209_v35, %v2209_v35 }
 0x184   : > { %v859_v16 = vadd.f32 %v858_v59, %v857_v51  ;;  %v872_v59 = vsel %vm232_vm1, %v821_v40, 0.0  ;;  %v828_v40 = vmul.f32 %v2216_v38, %v2216_v38 }
 0x186   : > { %v861_v13 = vadd.f32 %v860_v11, %v859_v16  ;;  %v874_v11 = vsel %vm232_vm1, %v822_v47, 0.0  ;;  %v829_v47 = vmul.f32 %v2223_v44, %v2223_v44 }
 0x188   : > { %v863_v24 = vadd.f32 %v862_v23, %v861_v13  ;;  %v876_v23 = vsel %vm232_vm1, %v823_v56, 0.0  ;;  %v830_v56 = vmul.f32 %v2230_v48, %v2230_v48 }
 0x18a   : > { %v865_v32 = vadd.f32 %v864_v29, %v863_v24  ;;  %v878_v29 = vsel %vm232_vm1, %v824_v19, 0.0  ;;  %v888_v19 = vsel %vm232_vm1, %v829_v47, 0.0 }
 0x18c   : > { %v867_v37 = vadd.f32 %v866_v36, %v865_v32  ;;  %v880_v36 = vsel %vm232_vm1, %v825_v20, 0.0  ;;  %v890_v20 = vsel %vm232_vm1, %v830_v56, 0.0 }
 0x18e   : > { %v869_v45 = vadd.f32 %v868_v41, %v867_v37  ;;  %v882_v41 = vsel %vm232_vm1, %v826_v17, 0.0 }
 0x190   : > { %v871_v51 = vadd.f32 %v870_v50, %v869_v45  ;;  %v884_v50 = vsel %vm232_vm1, %v827_v33, 0.0 }
 0x192   : > { %v873_v16 = vadd.f32 %v872_v59, %v871_v51  ;;  %v886_v59 = vsel %vm232_vm1, %v828_v40, 0.0 }
 0x194   : > { %v875_v13 = vadd.f32 %v874_v11, %v873_v16 }
 0x196   : > { %v877_v24 = vadd.f32 %v876_v23, %v875_v13  ;;  %v832_v13 = vmul.f32 %v2244_v57, %v2244_v57 }
 0x198   : > { %v879_v32 = vadd.f32 %v878_v29, %v877_v24  ;;  %v894_v24 = vsel %vm232_vm1, %v832_v13, 0.0 }
 0x19a   : > { %v881_v37 = vadd.f32 %v880_v36, %v879_v32 }
 0x19c   : > { %v883_v45 = vadd.f32 %v882_v41, %v881_v37 }
 0x19e   : > { %v885_v51 = vadd.f32 %v884_v50, %v883_v45 }
 0x1a0   : > { %v887_v16 = vadd.f32 %v886_v59, %v885_v51 }
 0x1a2   : > { %v889_v11 = vadd.f32 %v888_v19, %v887_v16 }
 0x1a4   : > { %v891_v23 = vadd.f32 %v890_v20, %v889_v11 }
 0x1a6   : > { %v893_v63 = vadd.f32 %v892_v3, %v891_v23 }
 0x1a8   : > { %v895_v17 = vadd.f32 %v894_v24, %v893_v63 }
 0x1aa   : > { %v896_v29 = vrot.slane %v895_v17, 4 }
 0x1ac   : > { %v897_v32 = vadd.f32 %v896_v29, %v895_v17 }
 0x1ae   : > { %v898_v33 = vrot.slane %v897_v32, 2 }
 0x1b0   : > { %v899_v36 = vadd.f32 %v898_v33, %v897_v32 }
 0x1b2   : > { %v900_v37 = vrot.slane %v899_v36, 1 }
 0x1b4   : > { %v901_v40 = vadd.f32 %v900_v37, %v899_v36 }
 0x1b6   : > { %v903_v41 = vsel %vm232_vm1, %v901_v40, 0 }
 0x1b7   : > { %v972_v45 = vand.u32 4294901760, %v903_v41 }
 0x1b9   : > { %v973_v47 = vsub.f32 %v903_v41, %v972_v45 }
 0x1bb   : > { %v974_v50 = vand.u32 4294901760, %v973_v47 }
 0x1bd   : > { %v975_v51 = vsub.f32 %v973_v47, %v974_v50 }
 0x1bf   : > { %v976_v56 = vand.u32 4294901760, %v975_v51 }
 0x1c1   : > { %1662 = vmatmul.mubr.f32.vlgmr.msra.gmra.mrb[0].mxu1 %v976_v56 }
 0x1c2   : > { %1722 = vmatpush3.bf16.msra.mxu1 %v1892_v42  ;;  %1668 = vmatprep.mubr.msk.f32.mxu1 %vm1777_vm0, %v1778_v5 }
 0x1c3   : > { %1723 = vmatprep.subr.bf16.mxu1 %v1776_v2 }
 0x1c9   : > { %1669 = vmatmul.mubr.f32.vlgmr.msra.gmra.mrb[0].mxu1 %v972_v45 }
 0x1ca   : > { %1725 = vmatpush3.bf16.msra.mxu1 %v1837_v9  ;;  %1675 = vmatprep.mubr.msk.f32.mxu1 %vm1777_vm0, %v1778_v5 }
 0x1cb   : > { %1726 = vmatprep.subr.bf16.mxu1 %v1776_v2 }
 0x1d1   : > { %1676 = vmatmul.mubr.f32.vlgmr.msra.gmra.mrb[0].mxu1 %v973_v47 }
 0x1d2   : > { %1728 = vmatpush3.bf16.msra.mxu1 %v1826_v6  ;;  %1682 = vmatprep.mubr.msk.f32.mxu1 %vm1777_vm0, %v1778_v5 }
 0x1d3   : > { %1729 = vmatprep.subr.bf16.mxu1 %v1776_v2 }
 0x1d9   : > { %1683 = vmatmul.mubr.f32.vlgmr.msra.gmra.mrb[0].mxu1 %v974_v50 }
 0x1da   : > { %1731 = vmatpush3.bf16.msra.mxu1 %v1870_v25  ;;  %1689 = vmatprep.mubr.msk.f32.mxu1 %vm1777_vm0, %v1778_v5  ;;  %v1365_v25 = vld [vmem:[%s2429_s2] sm:$0x1] }
 0x1db   : > { %1732 = vmatprep.subr.bf16.mxu1 %v1776_v2 }
 0x1e1   : > { %1690 = vmatmul.mubr.f32.vlgmr.msra.gmra.mrb[0].mxu1 %v972_v45 }
 0x1e2   : > { %1734 = vmatpush3.bf16.msra.mxu1 %v1826_v6  ;;  %1696 = vmatprep.mubr.msk.f32.mxu1 %vm1777_vm0, %v1778_v5 }
 0x1e9   : > { %1697 = vmatmul.mubr.f32.vlgmr.msra.gmra.mrb[0].mxu1 %v972_v45 }
 0x2bc   : > { %v1360_v9 = vpop.f32.mrb[0].mxu1 }
 0x2bd   : > { %v1364_v42 = vmul.f32 0.001953125, %v1360_v9  ;;  %v1698_v59 = vpop.f32.mrb[1].mxu1 }
 0x2bf   : > { %v1366_v16 = vadd.f32 1e-05, %v1364_v42 }
 0x2c1   : > { %1766 = vrsqrt.f32 %v1366_v16 }
 0x2cb   : > { %v1767_v62 = vpop.eup %1766 }
 0x2cc   : > { %v1368_v19 = vmul.f32 %v1767_v62, %v1365_v25 }
 0x2ce   : > { %v1373_v2 = vrot.slane %v1368_v19, %v767_v60 }
 0x2d0   : > { %v1375_v6 = vmul.f32 %v1373_v2, %v2035_v1  ;;  %v1376_v11 = vmul.f32 %v1373_v2, %v2039_v7  ;;  %v1377_v5 = vmul.f32 %v1373_v2, %v2043_v8  ;;  %v1378_v13 = vmul.f32 %v1373_v2, %v2047_v15 }
 0x2d1   : > { %v1379_v20 = vmul.f32 %v1373_v2, %v2055_v10  ;;  %v1380_v23 = vmul.f32 %v1373_v2, %v2061_v12  ;;  %v1381_v3 = vmul.f32 %v1373_v2, %v2069_v28  ;;  %v1382_v63 = vmul.f32 %v1373_v2, %v2076_v22 }
 0x2d2   : > { %v1383_v24 = vmul.f32 %v1373_v2, %v2083_v26  ;;  %v1384_v54 = vmul.f32 %v1373_v2, %v2090_v31  ;;  %v1385_v60 = vmul.f32 %v1373_v2, %v2097_v34  ;;  %v1386_v1 = vmul.f32 %v1373_v2, %v2104_v39 }
 0x2d3   : > { %v1387_v7 = vmul.f32 %v1373_v2, %v2111_v43  ;;  %v1388_v8 = vmul.f32 %v1373_v2, %v2118_v46  ;;  %v1389_v15 = vmul.f32 %v1373_v2, %v2125_v49  ;;  %v1390_v10 = vmul.f32 %v1373_v2, %v2132_v52  ;;  %v1574_v46 = vld [vmem:[%s2430_s3] ss:$0 sm:$0xff] }
 0x2d4   : > { %v1391_v12 = vmul.f32 %v1373_v2, %v2139_v55  ;;  %v1392_v28 = vmul.f32 %v1373_v2, %v2146_v58  ;;  %v1393_v22 = vmul.f32 %v1373_v2, %v2153_v61  ;;  %v1394_v26 = vmul.f32 %v1373_v2, %v2160_v0 }
 0x2d5   : > { %v1395_v31 = vmul.f32 %v1373_v2, %v2167_v4  ;;  %v1396_v34 = vmul.f32 %v1373_v2, %v2174_v14  ;;  %v1397_v39 = vmul.f32 %v1373_v2, %v2181_v18  ;;  %v1398_v43 = vmul.f32 %v1373_v2, %v2188_v21 }
 0x2d6   : > { %v1399_v49 = vmul.f32 %v1373_v2, %v2195_v27  ;;  %v1400_v52 = vmul.f32 %v1373_v2, %v2202_v30  ;;  %v1401_v55 = vmul.f32 %v1373_v2, %v2209_v35  ;;  %v1402_v58 = vmul.f32 %v1373_v2, %v2216_v38 }
 0x2d7   : > { %v1403_v61 = vmul.f32 %v1373_v2, %v2223_v44  ;;  %v1404_v0 = vmul.f32 %v1373_v2, %v2230_v48  ;;  %v1405_v4 = vmul.f32 %v1373_v2, %v2237_v53  ;;  %v1406_v14 = vmul.f32 %v1373_v2, %v2244_v57 }
 0x2d8   : > { %v1414_v18 = vadd.f32 %v1574_v46, %v1375_v6  ;;  %v1415_v21 = vadd.f32 %v1574_v46, %v1376_v11  ;;  %v1416_v17 = vadd.f32 %v1574_v46, %v1377_v5  ;;  %v1417_v29 = vadd.f32 %v1574_v46, %v1378_v13 }
 0x2d9   : > { %v1418_v32 = vadd.f32 %v1574_v46, %v1379_v20  ;;  %v1419_v27 = vadd.f32 %v1574_v46, %v1380_v23  ;;  %v1420_v33 = vadd.f32 %v1574_v46, %v1381_v3  ;;  %v1421_v30 = vadd.f32 %v1574_v46, %v1382_v63 }
 0x2da   : > { %v1422_v36 = vadd.f32 %v1574_v46, %v1383_v24  ;;  %v1423_v35 = vadd.f32 %v1574_v46, %v1384_v54  ;;  %v1424_v37 = vadd.f32 %v1574_v46, %v1385_v60  ;;  %v1425_v38 = vadd.f32 %v1574_v46, %v1386_v1 }
 0x2db   : > { %v1426_v40 = vadd.f32 %v1574_v46, %v1387_v7  ;;  %v1427_v44 = vadd.f32 %v1574_v46, %v1388_v8  ;;  %v1428_v48 = vadd.f32 %v1574_v46, %v1389_v15  ;;  %v1429_v41 = vadd.f32 %v1574_v46, %v1390_v10 }
 0x2dc   : > { %v1430_v53 = vadd.f32 %v1574_v46, %v1391_v12  ;;  %v1431_v45 = vadd.f32 %v1574_v46, %v1392_v28  ;;  %v1432_v57 = vadd.f32 %v1574_v46, %v1393_v22  ;;  %v1433_v47 = vadd.f32 %v1574_v46, %v1394_v26 }
 0x2dd   : > { %v2317_v50 = vadd.f32 %v1574_v46, %v1395_v31  ;;  %v2319_v51 = vadd.f32 %v1574_v46, %v1396_v34  ;;  %v2321_v56 = vadd.f32 %v1574_v46, %v1397_v39  ;;  %v2323_v9 = vadd.f32 %v1574_v46, %v1398_v43 }
 0x2de   : > { %v2325_v42 = vadd.f32 %v1574_v46, %v1399_v49  ;;  %v2327_v59 = vadd.f32 %v1574_v46, %v1400_v52  ;;  %v2329_v16 = vadd.f32 %v1574_v46, %v1401_v55  ;;  %v2331_v25 = vadd.f32 %v1574_v46, %v1402_v58 }
 0x2df   : > { %v2340_v62 = vadd.f32 %v1574_v46, %v1403_v61  ;;  %v2342_v19 = vadd.f32 %v1574_v46, %v1404_v0  ;;  %v2344_v2 = vadd.f32 %v1574_v46, %v1405_v4  ;;  %v2346_v6 = vadd.f32 %v1574_v46, %v1406_v14 }
 0x2e0   : > { %v1446_v11 = vmax.f32 %v1414_v18, 0.0  ;;  %v1447_v5 = vmax.f32 %v1415_v21, 0.0  ;;  %v1448_v13 = vmax.f32 %v1416_v17, 0.0  ;;  %v1449_v20 = vmax.f32 %v1417_v29, 0.0 }
 0x2e1   : > { %v1450_v23 = vmax.f32 %v1418_v32, 0.0  ;;  %v1451_v3 = vmax.f32 %v1419_v27, 0.0  ;;  %v1452_v63 = vmax.f32 %v1420_v33, 0.0  ;;  %v1453_v24 = vmax.f32 %v1421_v30, 0.0 }
 0x2e2   : > { %v1454_v54 = vmax.f32 %v1422_v36, 0.0  ;;  %v1455_v60 = vmax.f32 %v1423_v35, 0.0  ;;  %v1456_v1 = vmax.f32 %v1424_v37, 0.0  ;;  %v1457_v7 = vmax.f32 %v1425_v38, 0.0  ;;  %1478 = vst.msk [vmem:[%s2338_s5] sm:$0xff] %vm232_vm1, %v1446_v11  ;;  %1479 = vst.msk [vmem:[%s2338_s5 + $0x8] sm:$0xff] %vm232_vm1, %v1447_v5 }
 0x2e3   : > { %1480 = vst.msk [vmem:[%s2338_s5 + $0x10] sm:$0xff] %vm232_vm1, %v1448_v13  ;;  %1481 = vst.msk [vmem:[%s2338_s5 + $0x18] sm:$0xff] %vm232_vm1, %v1449_v20  ;;  %v1458_v8 = vmax.f32 %v1426_v40, 0.0  ;;  %v1459_v15 = vmax.f32 %v1427_v44, 0.0  ;;  %v1460_v10 = vmax.f32 %v1428_v48, 0.0  ;;  %v1461_v12 = vmax.f32 %v1429_v41, 0.0 }
 0x2e4   : > { %1482 = vst.msk [vmem:[%s2338_s5 + $0x20] sm:$0xff] %vm232_vm1, %v1450_v23  ;;  %1483 = vst.msk [vmem:[%s2338_s5 + $0x28] sm:$0xff] %vm232_vm1, %v1451_v3  ;;  %v1462_v28 = vmax.f32 %v1430_v53, 0.0  ;;  %v1463_v22 = vmax.f32 %v1431_v45, 0.0  ;;  %v1464_v26 = vmax.f32 %v1432_v57, 0.0  ;;  %v1465_v31 = vmax.f32 %v1433_v47, 0.0 }
 0x2e5   : > { %1484 = vst.msk [vmem:[%s2338_s5 + $0x30] sm:$0xff] %vm232_vm1, %v1452_v63  ;;  %1485 = vst.msk [vmem:[%s2338_s5 + $0x38] sm:$0xff] %vm232_vm1, %v1453_v24  ;;  %v1466_v34 = vmax.f32 %v2317_v50, 0.0  ;;  %v1467_v39 = vmax.f32 %v2319_v51, 0.0  ;;  %v1468_v43 = vmax.f32 %v2321_v56, 0.0  ;;  %v1469_v46 = vmax.f32 %v2323_v9, 0.0 }
 0x2e6   : > { %1486 = vst.msk [vmem:[%s2338_s5 + $0x40] sm:$0xff] %vm232_vm1, %v1454_v54  ;;  %1487 = vst.msk [vmem:[%s2338_s5 + $0x48] sm:$0xff] %vm232_vm1, %v1455_v60  ;;  %v1470_v49 = vmax.f32 %v2325_v42, 0.0  ;;  %v1471_v52 = vmax.f32 %v2327_v59, 0.0  ;;  %v1472_v55 = vmax.f32 %v2329_v16, 0.0  ;;  %v1473_v58 = vmax.f32 %v2331_v25, 0.0 }
 0x2e7   : > { %1488 = vst.msk [vmem:[%s2338_s5 + $0x50] sm:$0xff] %vm232_vm1, %v1456_v1  ;;  %1489 = vst.msk [vmem:[%s2338_s5 + $0x58] sm:$0xff] %vm232_vm1, %v1457_v7  ;;  %v1474_v61 = vmax.f32 %v2340_v62, 0.0  ;;  %v1475_v0 = vmax.f32 %v2342_v19, 0.0  ;;  %v1476_v4 = vmax.f32 %v2344_v2, 0.0  ;;  %v1477_v14 = vmax.f32 %v2346_v6, 0.0 }
 0x2e8   : > { %1490 = vst.msk [vmem:[%s2338_s5 + $0x60] sm:$0xff] %vm232_vm1, %v1458_v8  ;;  %1491 = vst.msk [vmem:[%s2338_s5 + $0x68] sm:$0xff] %vm232_vm1, %v1459_v15 }
 0x2e9   : > { %1492 = vst.msk [vmem:[%s2338_s5 + $0x70] sm:$0xff] %vm232_vm1, %v1460_v10  ;;  %1493 = vst.msk [vmem:[%s2338_s5 + $0x78] sm:$0xff] %vm232_vm1, %v1461_v12 }
 0x2ea   : > { %1494 = vst.msk [vmem:[%s2338_s5 + $0x80] sm:$0xff] %vm232_vm1, %v1462_v28  ;;  %1495 = vst.msk [vmem:[%s2338_s5 + $0x88] sm:$0xff] %vm232_vm1, %v1463_v22 }
 0x2eb   : > { %1496 = vst.msk [vmem:[%s2338_s5 + $0x90] sm:$0xff] %vm232_vm1, %v1464_v26  ;;  %1497 = vst.msk [vmem:[%s2338_s5 + $0x98] sm:$0xff] %vm232_vm1, %v1465_v31 }
 0x2ec   : > { %1498 = vst.msk [vmem:[%s2338_s5 + $0xa0] sm:$0xff] %vm232_vm1, %v1466_v34  ;;  %1499 = vst.msk [vmem:[%s2338_s5 + $0xa8] sm:$0xff] %vm232_vm1, %v1467_v39 }
 0x2ed   : > { %1500 = vst.msk [vmem:[%s2338_s5 + $0xb0] sm:$0xff] %vm232_vm1, %v1468_v43  ;;  %1501 = vst.msk [vmem:[%s2338_s5 + $0xb8] sm:$0xff] %vm232_vm1, %v1469_v46 }
 0x2ee   : > { %1502 = vst.msk [vmem:[%s2338_s5 + $0xc0] sm:$0xff] %vm232_vm1, %v1470_v49  ;;  %1503 = vst.msk [vmem:[%s2338_s5 + $0xc8] sm:$0xff] %vm232_vm1, %v1471_v52 }
 0x2ef   : > { %1504 = vst.msk [vmem:[%s2338_s5 + $0xd0] sm:$0xff] %vm232_vm1, %v1472_v55  ;;  %1505 = vst.msk [vmem:[%s2338_s5 + $0xd8] sm:$0xff] %vm232_vm1, %v1473_v58 }
 0x2f0   : > { %1506 = vst.msk [vmem:[%s2338_s5 + $0xe0] sm:$0xff] %vm232_vm1, %v1474_v61  ;;  %1507 = vst.msk [vmem:[%s2338_s5 + $0xe8] sm:$0xff] %vm232_vm1, %v1475_v0 }
 0x2f1   : > { %1508 = vst.msk [vmem:[%s2338_s5 + $0xf0] sm:$0xff] %vm232_vm1, %v1476_v4  ;;  %1509 = vst.msk [vmem:[%s2338_s5 + $0xf8] sm:$0xff] %vm232_vm1, %v1477_v14 }
 0x2f2 PF: > { %s14_s15 = sadd.s32 1, %s1774_s15  }
 0x2f3   : > { %p11_p4 = scmp.ge.s32.totalorder %s14_s15, 4  }
 0x2f5   :  { %13 = sbr.rel (!%p11_p4) target bundleno = 1 (0x1), region = 66 }

// kernel: basic_block_forward.6
= control target key start
LH: loop header
LB: loop body
LE: loop exit
PB: predicated region body
PF: predicated region fallthrough
CT: control target
= control target key end

     0   :  { %s3932_s9 = smov 0   ;;  %s4566_s0 = inlined_call_operand.vmem [shape: f32[2,18,18,8], index: 0, kind: input, shape index: {}]   ;;  %s4567_s1 = inlined_call_operand.vmem [shape: bf16[9,8,16], index: 1, kind: input, shape index: {}]   ;;  %s4568_s2 = inlined_call_operand.vmem [shape: f32[2,16,16,16], index: 2, kind: output, shape index: {}]  }
   0x1 LB: > { %s2818_s10 = sadd.s32 4294967295, %s3915_s9   ;;  %p2822_p0 = scmp.ge.s32.totalorder %s3915_s9, 1  ;;  %s3915_s9 = sphi %s3932_s9, %s12_s9  }
   0x2   : > { %p112_p1 = scmp.lt.s32.totalorder %s3915_s9, 3 }
   0x4   : > { %p113_p2 = pnand %p2822_p0, %p112_p1 }
   0x5   : > { %v2826_v0 = vld [vmem:[%s4567_s1 + $0x4] sm:$0xf] (!%p113_p2)  ;;  %vm293_vm0 = vcmask (!%p113_p2), 1043456   ;;  %v3946_v1 = vld [vmem:[%s4567_s1 + $0x10] sm:$0xf] (!%p113_p2)  ;;  %p134_p3 = scmp.lt.s32.totalorder (!%p113_p2), %s2818_s10, 1 }
   0x6   : > { %116 = sbr.rel (%p113_p2) target bundleno = 520 (0x208), region = 28  ;;  %3890 = vmatprep.subr.msk.bf16.mxu1 (!%p113_p2), %vm293_vm0, %v2826_v0  ;;  %3894 = vmatprep.subr.msk.bf16.mxu0 (!%p113_p2), %vm293_vm0, %v3946_v1  ;;  %v295_v2 = vsel (!%p113_p2), %vm293_vm0, %v2826_v0, 0  ;;  %v3954_v3 = vsel (!%p113_p2), %vm293_vm0, %v3946_v1, 0  ;;  %v193_v4 = vld [vmem:[%s4567_s1] sm:$0xf] (!%p113_p2)  ;;  %vm244_vm1 = vcmask (!%p113_p2), 64512  }
   0x7   : > { %3327 = vmatpush3.bf16.msra.mxu1 (!%p113_p2), %v295_v2  ;;  %3463 = vmatpush3.bf16.msra.mxu0 (!%p113_p2), %v3954_v3  ;;  %v3006_v5 = vld [vmem:[%s4567_s1 + $0x14] sm:$0xf] (!%p113_p2)  ;;  %v507_v14 = vsel (!%p113_p2), %vm293_vm0, %v193_v4, 0  ;;  %v3055_v20 = vld [vmem:[%s4567_s1 + $0x18] sm:$0xf] (!%p113_p2)  ;;  %vm2730_vm2 = vcmask (!%p113_p2), 130048  }
   0x8   : > { %3891 = vmatprep.subr.msk.bf16.mxu1 (!%p113_p2), %vm293_vm0, %v193_v4  ;;  %3896 = vmatprep.subr.msk.bf16.mxu0 (!%p113_p2), %vm293_vm0, %v3006_v5  ;;  %v1652_v18 = vsel (!%p113_p2), %vm293_vm0, %v3006_v5, 0  ;;  %v3998_v21 = vld [vmem:[%s4567_s1 + $0x8] sm:$0xf] (!%p113_p2)  ;;  %v1947_v52 = vsel (!%p113_p2), %vm293_vm0, %v3055_v20, 0  ;;  %v4077_v53 = vld [vmem:[%s4567_s1 + $0x1c] sm:$0xf] (!%p113_p2) }
   0xd   : > { %s4570_s10 = smov (!%p134_p3, %s2818_s10), 1 }
   0xe   : > { %s3900_s19 = smul.u32 432, %s4570_s10  ;;  %s3172_s5 = sshll.u32 %s4570_s10, 8 }
   0xf   : > { %s4497_s8 = scalar_lea.vmem %s4568_s2, %s3172_s5 }
  0x10   : > { %s3971_s22 = scalar_lea.vmem %s4566_s0, %s3900_s19 }
  0x11   : > { %v194_v6 = vld [vmem:[%s3971_s22 + $0x1] sm:$0xff]  ;;  %v195_v7 = vld [vmem:[%s3971_s22 + $0x9] sm:$0xff]  ;;  %v2925_v8 = vld [vmem:[%s3971_s22 + $0x19] sm:$0xff] }
  0x12   : > { %v226_v9 = vpack.c.bf16 %v195_v7, %v194_v6  ;;  %v2926_v10 = vld [vmem:[%s3971_s22 + $0x21] sm:$0xff]  ;;  %v2927_v11 = vld [vmem:[%s3971_s22 + $0x31] sm:$0xff]  ;;  %v2928_v12 = vld [vmem:[%s3971_s22 + $0x39] sm:$0xff] }
  0x13   : > { %v1291_v13 = vpack.c.bf16 %v2926_v10, %v2925_v8  ;;  %v3980_v15 = vpack.c.bf16 %v2928_v12, %v2927_v11  ;;  %v2929_v16 = vld [vmem:[%s3971_s22 + $0x49] sm:$0xff]  ;;  %v2930_v17 = vld [vmem:[%s3971_s22 + $0x51] sm:$0xff]  ;;  %v2931_v22 = vld [vmem:[%s3971_s22 + $0x61] sm:$0xff] }
  0x14   : > { %3328 = vmatprep.mubr.msk.bf16.mxu1 %vm244_vm1, %v226_v9  ;;  %v3986_v19 = vpack.c.bf16 %v2930_v17, %v2929_v16  ;;  %v2932_v23 = vld [vmem:[%s3971_s22 + $0x69] sm:$0xff]  ;;  %v2933_v24 = vld [vmem:[%s3971_s22 + $0x79] sm:$0xff]  ;;  %v2934_v25 = vld [vmem:[%s3971_s22 + $0x81] sm:$0xff] }
  0x15   : > { %3464 = vmatprep.mubr.msk.bf16.mxu0 %vm244_vm1, %v1291_v13  ;;  %3329 = vmatmul.mubr.msk.bf16.vlgmr.msra.gmra.mrb[0].mxu1 %vm244_vm1, %v1291_v13  ;;  %v4011_v26 = vpack.c.bf16 %v2932_v23, %v2931_v22  ;;  %v4013_v27 = vpack.c.bf16 %v2934_v25, %v2933_v24  ;;  %v2935_v28 = vld [vmem:[%s3971_s22 + $0x91] sm:$0xff]  ;;  %v2936_v29 = vld [vmem:[%s3971_s22 + $0x99] sm:$0xff]  ;;  %v2937_v30 = vld [vmem:[%s3971_s22 + $0xa9] sm:$0xff] }
  0x16   : > { %3361 = vmatpush3.bf16.msra.mxu1 %v507_v14  ;;  %3465 = vmatmul.mubr.msk.bf16.vlgmr.msra.gmra.mrb[0].mxu0 %vm244_vm1, %v3980_v15  ;;  %v2938_v31 = vld [vmem:[%s3971_s22 + $0xb1] sm:$0xff]  ;;  %v4027_v32 = vpack.c.bf16 %v2936_v29, %v2935_v28  ;;  %v2939_v34 = vld [vmem:[%s3971_s22 + $0xc1] sm:$0xff]  ;;  %v2940_v35 = vld [vmem:[%s3971_s22 + $0xc9] sm:$0xff] }
  0x17   : > { %3497 = vmatpush3.bf16.msra.mxu0 %v1652_v18  ;;  %3332 = vmatprep.mubr.msk.bf16.mxu1 %vm244_vm1, %v3980_v15  ;;  %v4029_v33 = vpack.c.bf16 %v2938_v31, %v2937_v30  ;;  %v2974_v36 = vld [vmem:[%s3971_s22 + $0x1a] sm:$0xff]  ;;  %v2975_v37 = vld [vmem:[%s3971_s22 + $0x22] sm:$0xff]  ;;  %v4043_v38 = vpack.c.bf16 %v2940_v35, %v2939_v34  ;;  %v2976_v42 = vld [vmem:[%s3971_s22 + $0x32] sm:$0xff] }
  0x18   : > { %3468 = vmatprep.mubr.msk.bf16.mxu0 %vm244_vm1, %v3986_v19  ;;  %3897 = vmatprep.subr.msk.bf16.mxu0 %vm293_vm0, %v3055_v20  ;;  %v4045_v39 = vpack.c.bf16 %v2975_v37, %v2974_v36  ;;  %v212_v40 = vld [vmem:[%s3971_s22 + $0xd9] sm:$0xff]  ;;  %v213_v41 = vld [vmem:[%s3971_s22 + $0xe1] sm:$0xff]  ;;  %v214_v44 = vld [vmem:[%s3971_s22 + $0xf1] sm:$0xff] }
  0x19   : > { %3892 = vmatprep.subr.msk.bf16.mxu1 %vm293_vm0, %v3998_v21  ;;  %v2977_v43 = vld [vmem:[%s3971_s22 + $0x3a] sm:$0xff]  ;;  %v2978_v46 = vld [vmem:[%s3971_s22 + $0x4a] sm:$0xff]  ;;  %v2979_v47 = vld [vmem:[%s3971_s22 + $0x52] sm:$0xff]  ;;  %v4063_v48 = vpack.c.bf16 %v213_v41, %v212_v40 }
  0x1a   : > { %v215_v45 = vld [vmem:[%s3971_s22 + $0xf9] sm:$0xff]  ;;  %v4065_v49 = vpack.c.bf16 %v2977_v43, %v2976_v42  ;;  %v4069_v51 = vpack.c.bf16 %v2979_v47, %v2978_v46  ;;  %v216_v54 = vld [vmem:[%s3971_s22 + $0x109] sm:$0xff]  ;;  %v217_v55 = vld [vmem:[%s3971_s22 + $0x111] sm:$0xff]  ;;  %v769_v47 = vsel %vm293_vm0, %v3998_v21, 0 }
  0x1b   : > { %v4067_v50 = vpack.c.bf16 %v215_v45, %v214_v44  ;;  %v2980_v56 = vld [vmem:[%s3971_s22 + $0x62] sm:$0xff]  ;;  %v2981_v57 = vld [vmem:[%s3971_s22 + $0x6a] sm:$0xff]  ;;  %v2982_v60 = vld [vmem:[%s3971_s22 + $0x7a] sm:$0xff]  ;;  %v4095_v62 = vpack.c.bf16 %v217_v55, %v216_v54 }
  0x1c   : > { %v218_v58 = vld [vmem:[%s3971_s22 + $0x121] sm:$0xff]  ;;  %v219_v59 = vld [vmem:[%s3971_s22 + $0x129] sm:$0xff]  ;;  %v4097_v63 = vpack.c.bf16 %v2981_v57, %v2980_v56  ;;  %v220_v4 = vld [vmem:[%s3971_s22 + $0x139] sm:$0xff] }
  0x1d   : > { %3333 = vmatmul.mubr.msk.bf16.gmra.mrb[4].mxu1 %vm244_vm1, %v3986_v19  ;;  %v2983_v61 = vld [vmem:[%s3971_s22 + $0x82] sm:$0xff]  ;;  %v4099_v0 = vpack.c.bf16 %v219_v59, %v218_v58  ;;  %v2984_v6 = vld [vmem:[%s3971_s22 + $0x92] sm:$0xff]  ;;  %v2985_v7 = vld [vmem:[%s3971_s22 + $0x9a] sm:$0xff] }
  0x1e   : > { %3469 = vmatmul.mubr.msk.bf16.gmra.mrb[4].mxu0 %vm244_vm1, %v4011_v26  ;;  %3336 = vmatprep.mubr.msk.bf16.mxu1 %vm244_vm1, %v4011_v26  ;;  %v4101_v2 = vpack.c.bf16 %v2983_v61, %v2982_v60  ;;  %v221_v5 = vld [vmem:[%s3971_s22 + $0x141] sm:$0xff]  ;;  %v222_v8 = vld [vmem:[%s3971_s22 + $0x151] sm:$0xff]  ;;  %v223_v9 = vld [vmem:[%s3971_s22 + $0x159] sm:$0xff]  ;;  %v4121_v13 = vpack.c.bf16 %v2985_v7, %v2984_v6 }
  0x1f   : > { %3472 = vmatprep.mubr.msk.bf16.mxu0 %vm244_vm1, %v4013_v27  ;;  %v2986_v10 = vld [vmem:[%s3971_s22 + $0xaa] sm:$0xff]  ;;  %v2987_v11 = vld [vmem:[%s3971_s22 + $0xb2] sm:$0xff]  ;;  %v4119_v12 = vpack.c.bf16 %v221_v5, %v220_v4  ;;  %v4123_v14 = vpack.c.bf16 %v223_v9, %v222_v8  ;;  %v2988_v20 = vld [vmem:[%s3971_s22 + $0xc2] sm:$0xff] }
  0x20   : > { %v4125_v16 = vpack.c.bf16 %v2987_v11, %v2986_v10  ;;  %v224_v17 = vld [vmem:[%s3971_s22 + $0x169] sm:$0xff]  ;;  %v225_v18 = vld [vmem:[%s3971_s22 + $0x171] sm:$0xff]  ;;  %v145_v23 = vld [vmem:[%s3971_s22] sm:$0xff] }
  0x21   : > { %v2989_v22 = vld [vmem:[%s3971_s22 + $0xca] sm:$0xff]  ;;  %v2990_v25 = vld [vmem:[%s3971_s22 + $0xda] sm:$0xff]  ;;  %v2991_v28 = vld [vmem:[%s3971_s22 + $0xe2] sm:$0xff]  ;;  %v4143_v29 = vpack.c.bf16 %v225_v18, %v224_v17 }
  0x22   : > { %v146_v24 = vld [vmem:[%s3971_s22 + $0x8] sm:$0xff]  ;;  %v4145_v30 = vpack.c.bf16 %v2989_v22, %v2988_v20  ;;  %v4147_v34 = vpack.c.bf16 %v2991_v28, %v2990_v25  ;;  %v147_v35 = vld [vmem:[%s3971_s22 + $0x18] sm:$0xff]  ;;  %v148_v36 = vld [vmem:[%s3971_s22 + $0x20] sm:$0xff] }
  0x23   : > { %v177_v31 = vpack.c.bf16 %v146_v24, %v145_v23  ;;  %v2992_v37 = vld [vmem:[%s3971_s22 + $0xf2] sm:$0xff]  ;;  %v2993_v40 = vld [vmem:[%s3971_s22 + $0xfa] sm:$0xff]  ;;  %v2994_v43 = vld [vmem:[%s3971_s22 + $0x10a] sm:$0xff]  ;;  %v4164_v45 = vpack.c.bf16 %v148_v36, %v147_v35 }
  0x24   : > { %v149_v41 = vld [vmem:[%s3971_s22 + $0x30] sm:$0xff]  ;;  %v150_v42 = vld [vmem:[%s3971_s22 + $0x38] sm:$0xff]  ;;  %v4166_v46 = vpack.c.bf16 %v2993_v40, %v2992_v37  ;;  %v4179_v55 = vld [vmem:[%s4567_s1 + $0xc] sm:$0xf] }
  0x25   : > { %3337 = vmatmul.mubr.msk.bf16.gmra.mrb[8].mxu1 %vm244_vm1, %v4013_v27  ;;  %v2995_v44 = vld [vmem:[%s3971_s22 + $0x112] sm:$0xff]  ;;  %v151_v56 = vld [vmem:[%s3971_s22 + $0x48] sm:$0xff]  ;;  %v153_v59 = vld [vmem:[%s3971_s22 + $0x60] sm:$0xff] }
  0x26   : > { %3473 = vmatmul.mubr.msk.bf16.gmra.mrb[8].mxu0 %vm244_vm1, %v4027_v32  ;;  %3340 = vmatprep.mubr.msk.bf16.mxu1 %vm244_vm1, %v4027_v32  ;;  %v4172_v54 = vpack.c.bf16 %v2995_v44, %v2994_v43  ;;  %v152_v57 = vld [vmem:[%s3971_s22 + $0x50] sm:$0xff]  ;;  %v2996_v21 = vld [vmem:[%s3971_s22 + $0x122] sm:$0xff]  ;;  %v2998_v61 = vld [vmem:[%s3971_s22 + $0x13a] sm:$0xff] }
  0x27   : > { %3476 = vmatprep.mubr.msk.bf16.mxu0 %vm244_vm1, %v4029_v33  ;;  %v2997_v58 = vld [vmem:[%s3971_s22 + $0x12a] sm:$0xff]  ;;  %v2999_v4 = vld [vmem:[%s3971_s22 + $0x142] sm:$0xff]  ;;  %v4197_v5 = vpack.c.bf16 %v152_v57, %v151_v56  ;;  %v155_v9 = vld [vmem:[%s3971_s22 + $0x78] sm:$0xff] }
  0x28   : > { %v154_v60 = vld [vmem:[%s3971_s22 + $0x68] sm:$0xff]  ;;  %v4199_v6 = vpack.c.bf16 %v2997_v58, %v2996_v21  ;;  %v4203_v8 = vpack.c.bf16 %v2999_v4, %v2998_v61  ;;  %v156_v10 = vld [vmem:[%s3971_s22 + $0x80] sm:$0xff]  ;;  %v3000_v11 = vld [vmem:[%s3971_s22 + $0x152] sm:$0xff]  ;;  %v2241_v61 = vsel %vm293_vm0, %v4077_v53, 0 }
  0x29   : > { %v4201_v7 = vpack.c.bf16 %v154_v60, %v153_v59  ;;  %v3001_v17 = vld [vmem:[%s3971_s22 + $0x15a] sm:$0xff]  ;;  %v157_v18 = vld [vmem:[%s3971_s22 + $0x90] sm:$0xff]  ;;  %v4221_v24 = vpack.c.bf16 %v156_v10, %v155_v9  ;;  %v159_v35 = vld [vmem:[%s3971_s22 + $0xa8] sm:$0xff] }
  0x2a   : > { %v158_v20 = vld [vmem:[%s3971_s22 + $0x98] sm:$0xff]  ;;  %v3002_v22 = vld [vmem:[%s3971_s22 + $0x16a] sm:$0xff]  ;;  %v4223_v25 = vpack.c.bf16 %v3001_v17, %v3000_v11  ;;  %v3004_v37 = vld [vmem:[%s3971_s22 + $0x182] sm:$0xff] }
  0x2b   : > { %v3003_v23 = vld [vmem:[%s3971_s22 + $0x172] sm:$0xff]  ;;  %v4225_v28 = vpack.c.bf16 %v158_v20, %v157_v18  ;;  %v3005_v40 = vld [vmem:[%s3971_s22 + $0x18a] sm:$0xff]  ;;  %v164_v57 = vld [vmem:[%s3971_s22 + $0xe0] sm:$0xff] }
  0x2c   : > { %v160_v36 = vld [vmem:[%s3971_s22 + $0xb0] sm:$0xff]  ;;  %v4245_v44 = vpack.c.bf16 %v3005_v40, %v3004_v37  ;;  %v163_v56 = vld [vmem:[%s3971_s22 + $0xd8] sm:$0xff]  ;;  %v3153_v4 = vld [vmem:[%s4567_s1 + $0x20] sm:$0xf] }
  0x2d   : > { %3341 = vmatmul.mubr.msk.bf16.gmra.mrb[12].mxu1 %vm244_vm1, %v4029_v33  ;;  %v4243_v43 = vpack.c.bf16 %v160_v36, %v159_v35  ;;  %v165_v21 = vld [vmem:[%s3971_s22 + $0xf0] sm:$0xff]  ;;  %v166_v58 = vld [vmem:[%s3971_s22 + $0xf8] sm:$0xff]  ;;  %v4261_v59 = vpack.c.bf16 %v164_v57, %v163_v56  ;;  %v167_v9 = vld [vmem:[%s3971_s22 + $0x108] sm:$0xff] }
  0x2e   : > { %3477 = vmatmul.mubr.msk.bf16.gmra.mrb[12].mxu0 %vm244_vm1, %v4043_v38  ;;  %3344 = vmatprep.mubr.msk.bf16.mxu1 %vm244_vm1, %v4043_v38  ;;  %v4263_v60 = vpack.c.bf16 %v166_v58, %v165_v21  ;;  %v168_v10 = vld [vmem:[%s3971_s22 + $0x110] sm:$0xff]  ;;  %v170_v11 = vld [vmem:[%s3971_s22 + $0x128] sm:$0xff]  ;;  %v171_v20 = vld [vmem:[%s3971_s22 + $0x138] sm:$0xff]  ;;  %v1064_v58 = vsel %vm293_vm0, %v4179_v55, 0 }
  0x2f   : > { %3498 = vmatprep.mubr.msk.bf16.mxu0 %vm244_vm1, %v4045_v39  ;;  %v4283_v17 = vpack.c.bf16 %v168_v10, %v167_v9  ;;  %v174_v35 = vld [vmem:[%s3971_s22 + $0x158] sm:$0xff]  ;;  %v175_v40 = vld [vmem:[%s3971_s22 + $0x168] sm:$0xff]  ;;  %v3054_v9 = vld [vmem:[%s3971_s22 + $0x1a0] sm:$0xff] }
  0x30   : > { %v671_v56 = vld [vmem:[%s3971_s22 + $0xa] sm:$0xff] }
  0x35   : > { %3345 = vmatmul.mubr.msk.bf16.gmra.mrb[16].mxu1 %vm244_vm1, %v4063_v48 }
  0x36   : > { %3499 = vmatmul.mubr.msk.bf16.vlgmr.msra.gmra.mrb[0].mxu0 %vm244_vm1, %v4065_v49  ;;  %3348 = vmatprep.mubr.msk.bf16.mxu1 %vm244_vm1, %v4067_v50 }
  0x37   : > { %3531 = vmatpush3.bf16.msra.mxu0 %v1947_v52  ;;  %3502 = vmatprep.mubr.msk.bf16.mxu0 %vm244_vm1, %v4069_v51  ;;  %v4170_v52 = vpack.c.bf16 %v150_v42, %v149_v41  ;;  %v161_v41 = vld [vmem:[%s3971_s22 + $0xc0] sm:$0xff]  ;;  %v162_v42 = vld [vmem:[%s3971_s22 + $0xc8] sm:$0xff] }
  0x38   : > { %3898 = vmatprep.subr.msk.bf16.mxu0 %vm293_vm0, %v4077_v53  ;;  %v169_v53 = vld [vmem:[%s3971_s22 + $0x120] sm:$0xff] }
  0x39   : > { %v4285_v18 = vpack.c.bf16 %v170_v11, %v169_v53  ;;  %v2535_v53 = vsel %vm293_vm0, %v3153_v4, 0 }
  0x3d   : > { %3349 = vmatmul.mubr.msk.bf16.gmra.mrb[20].mxu1 %vm244_vm1, %v4095_v62 }
  0x3e   : > { %3503 = vmatmul.mubr.msk.bf16.gmra.mrb[4].mxu0 %vm244_vm1, %v4097_v63  ;;  %3352 = vmatprep.mubr.msk.bf16.mxu1 %vm244_vm1, %v4099_v0 }
  0x3f   : > { %3506 = vmatprep.mubr.msk.bf16.mxu0 %vm244_vm1, %v4101_v2 }
  0x45   : > { %3353 = vmatmul.mubr.msk.bf16.gmra.mrb[24].mxu1 %vm244_vm1, %v4119_v12 }
  0x46   : > { %3507 = vmatmul.mubr.msk.bf16.gmra.mrb[8].mxu0 %vm244_vm1, %v4121_v13  ;;  %3356 = vmatprep.mubr.msk.bf16.mxu1 %vm244_vm1, %v4123_v14 }
  0x47   : > { %3510 = vmatprep.mubr.msk.bf16.mxu0 %vm244_vm1, %v4125_v16 }
  0x4d   : > { %3357 = vmatmul.mubr.msk.bf16.gmra.mrb[28].mxu1 %vm244_vm1, %v4143_v29 }
  0x4e   : > { %3511 = vmatmul.mubr.msk.bf16.gmra.mrb[12].mxu0 %vm244_vm1, %v4145_v30  ;;  %3362 = vmatprep.mubr.msk.bf16.mxu1 %vm244_vm1, %v177_v31  ;;  %v4227_v31 = vpack.c.bf16 %v3003_v23, %v3002_v22  ;;  %v172_v22 = vld [vmem:[%s3971_s22 + $0x140] sm:$0xff]  ;;  %v173_v23 = vld [vmem:[%s3971_s22 + $0x150] sm:$0xff] }
  0x4f   : > { %3514 = vmatprep.mubr.msk.bf16.mxu0 %vm244_vm1, %v4147_v34  ;;  %v4299_v36 = vpack.c.bf16 %v172_v22, %v171_v20  ;;  %v4301_v37 = vpack.c.bf16 %v174_v35, %v173_v23 }
  0x55   : > { %3363 = vmatmul.mubr.msk.bf16.vlgmr.msra.gmra.mrb[0].mxu1 %vm244_vm1, %v4164_v45 }
  0x56   : > { %3395 = vmatpush3.bf16.msra.mxu1 %v769_v47  ;;  %3515 = vmatmul.mubr.msk.bf16.gmra.mrb[16].mxu0 %vm244_vm1, %v4166_v46  ;;  %v4247_v47 = vpack.c.bf16 %v162_v42, %v161_v41  ;;  %v176_v41 = vld [vmem:[%s3971_s22 + $0x170] sm:$0xff]  ;;  %v670_v42 = vld [vmem:[%s3971_s22 + $0x2] sm:$0xff] }
  0x57   : > { %3366 = vmatprep.mubr.msk.bf16.mxu1 %vm244_vm1, %v4170_v52  ;;  %3518 = vmatprep.mubr.msk.bf16.mxu0 %vm244_vm1, %v4172_v54  ;;  %v4315_v57 = vpack.c.bf16 %v176_v41, %v175_v40  ;;  %v702_v21 = vpack.c.bf16 %v671_v56, %v670_v42 }
  0x58   : > { %3893 = vmatprep.subr.msk.bf16.mxu1 %vm293_vm0, %v4179_v55  ;;  %v3052_v55 = vld [vmem:[%s3971_s22 + $0x188] sm:$0xff] }
  0x5d   : > { %3367 = vmatmul.mubr.msk.bf16.gmra.mrb[4].mxu1 %vm244_vm1, %v4197_v5 }
  0x5e   : > { %3519 = vmatmul.mubr.msk.bf16.gmra.mrb[20].mxu0 %vm244_vm1, %v4199_v6  ;;  %3370 = vmatprep.mubr.msk.bf16.mxu1 %vm244_vm1, %v4201_v7 }
  0x5f   : > { %3522 = vmatprep.mubr.msk.bf16.mxu0 %vm244_vm1, %v4203_v8 }
  0x65   : > { %3371 = vmatmul.mubr.msk.bf16.gmra.mrb[8].mxu1 %vm244_vm1, %v4221_v24 }
  0x66   : > { %3523 = vmatmul.mubr.msk.bf16.gmra.mrb[24].mxu0 %vm244_vm1, %v4223_v25  ;;  %3374 = vmatprep.mubr.msk.bf16.mxu1 %vm244_vm1, %v4225_v28 }
  0x67   : > { %3526 = vmatprep.mubr.msk.bf16.mxu0 %vm244_vm1, %v4227_v31 }
  0x6d   : > { %3375 = vmatmul.mubr.msk.bf16.gmra.mrb[12].mxu1 %vm244_vm1, %v4243_v43 }
  0x6e   : > { %3527 = vmatmul.mubr.msk.bf16.gmra.mrb[28].mxu0 %vm244_vm1, %v4245_v44  ;;  %3378 = vmatprep.mubr.msk.bf16.mxu1 %vm244_vm1, %v4247_v47 }
  0x6f   : > { %3532 = vmatprep.mubr.msk.bf16.mxu0 %vm244_vm1, %v4170_v52 }
  0x75   : > { %3379 = vmatmul.mubr.msk.bf16.gmra.mrb[16].mxu1 %vm244_vm1, %v4261_v59 }
  0x76   : > { %3533 = vmatmul.mubr.msk.bf16.vlgmr.msra.gmra.mrb[0].mxu0 %vm244_vm1, %v4197_v5  ;;  %3382 = vmatprep.mubr.msk.bf16.mxu1 %vm244_vm1, %v4263_v60 }
  0x77   : > { %3565 = vmatpush3.bf16.msra.mxu0 %v2241_v61  ;;  %3536 = vmatprep.mubr.msk.bf16.mxu0 %vm244_vm1, %v4201_v7 }
  0x78   : > { %3899 = vmatprep.subr.msk.bf16.mxu0 %vm293_vm0, %v3153_v4 }
  0x7d   : > { %3383 = vmatmul.mubr.msk.bf16.gmra.mrb[20].mxu1 %vm244_vm1, %v4283_v17 }
  0x7e   : > { %3537 = vmatmul.mubr.msk.bf16.gmra.mrb[4].mxu0 %vm244_vm1, %v4221_v24  ;;  %3386 = vmatprep.mubr.msk.bf16.mxu1 %vm244_vm1, %v4285_v18 }
  0x7f   : > { %3540 = vmatprep.mubr.msk.bf16.mxu0 %vm244_vm1, %v4225_v28 }
  0x85   : > { %3387 = vmatmul.mubr.msk.bf16.gmra.mrb[24].mxu1 %vm244_vm1, %v4299_v36 }
  0x86   : > { %3541 = vmatmul.mubr.msk.bf16.gmra.mrb[8].mxu0 %vm244_vm1, %v4243_v43  ;;  %3390 = vmatprep.mubr.msk.bf16.mxu1 %vm244_vm1, %v4301_v37 }
  0x87   : > { %3544 = vmatprep.mubr.msk.bf16.mxu0 %vm244_vm1, %v4247_v47 }
  0x8d   : > { %3391 = vmatmul.mubr.msk.bf16.gmra.mrb[28].mxu1 %vm244_vm1, %v4315_v57 }
  0x8e   : > { %3545 = vmatmul.mubr.msk.bf16.gmra.mrb[12].mxu0 %vm244_vm1, %v4261_v59  ;;  %3396 = vmatprep.mubr.msk.bf16.mxu1 %vm244_vm1, %v702_v21 }
  0x8f   : > { %3548 = vmatprep.mubr.msk.bf16.mxu0 %vm244_vm1, %v4263_v60 }
  0x95   : > { %3397 = vmatmul.mubr.msk.bf16.vlgmr.msra.gmra.mrb[0].mxu1 %vm244_vm1, %v4045_v39  ;;  %v3051_v39 = vld [vmem:[%s3971_s22 + $0x180] sm:$0xff] }
  0x96   : > { %3429 = vmatpush3.bf16.msra.mxu1 %v1064_v58  ;;  %3549 = vmatmul.mubr.msk.bf16.gmra.mrb[16].mxu0 %vm244_vm1, %v4283_v17  ;;  %v4346_v61 = vpack.c.bf16 %v3052_v55, %v3051_v39 }
  0x97   : > { %3400 = vmatprep.mubr.msk.bf16.mxu1 %vm244_vm1, %v4065_v49  ;;  %3552 = vmatprep.mubr.msk.bf16.mxu0 %vm244_vm1, %v4285_v18 }
  0x98   : > { %3895 = vmatprep.subr.msk.bf16.mxu1 %vm293_vm0, %v3946_v1  ;;  %v3053_v1 = vld [vmem:[%s3971_s22 + $0x198] sm:$0xff] }
  0x99   : > { %v1895_v10 = vpack.c.bf16 %v3054_v9, %v3053_v1 }
  0x9d   : > { %3401 = vmatmul.mubr.msk.bf16.gmra.mrb[4].mxu1 %vm244_vm1, %v4069_v51 }
  0x9e   : > { %3553 = vmatmul.mubr.msk.bf16.gmra.mrb[20].mxu0 %vm244_vm1, %v4299_v36  ;;  %3404 = vmatprep.mubr.msk.bf16.mxu1 %vm244_vm1, %v4097_v63 }
  0x9f   : > { %3556 = vmatprep.mubr.msk.bf16.mxu0 %vm244_vm1, %v4301_v37 }
  0xa5   : > { %3405 = vmatmul.mubr.msk.bf16.gmra.mrb[8].mxu1 %vm244_vm1, %v4101_v2 }
  0xa6   : > { %3557 = vmatmul.mubr.msk.bf16.gmra.mrb[24].mxu0 %vm244_vm1, %v4315_v57  ;;  %3408 = vmatprep.mubr.msk.bf16.mxu1 %vm244_vm1, %v4121_v13 }
  0xa7   : > { %3560 = vmatprep.mubr.msk.bf16.mxu0 %vm244_vm1, %v4346_v61 }
  0xad   : > { %3409 = vmatmul.mubr.msk.bf16.gmra.mrb[12].mxu1 %vm244_vm1, %v4125_v16 }
  0xae   : > { %3561 = vmatmul.mubr.msk.bf16.gmra.mrb[28].mxu0 %vm244_vm1, %v1895_v10  ;;  %3412 = vmatprep.mubr.msk.bf16.mxu1 %vm244_vm1, %v4145_v30 }
  0xaf   : > { %3566 = vmatprep.mubr.msk.bf16.mxu0 %vm244_vm1, %v3980_v15  ;;  %v3101_v15 = vld [vmem:[%s3971_s22 + $0x189] sm:$0xff] }
  0xb5   : > { %3413 = vmatmul.mubr.msk.bf16.gmra.mrb[16].mxu1 %vm244_vm1, %v4147_v34 }
  0xb6   : > { %3567 = vmatmul.mubr.msk.bf16.vlgmr.msra.gmra.mrb[0].mxu0 %vm244_vm1, %v3986_v19  ;;  %3416 = vmatprep.mubr.msk.bf16.mxu1 %vm244_vm1, %v4166_v46 }
  0xb7   : > { %3599 = vmatpush3.bf16.msra.mxu0 %v2535_v53  ;;  %3570 = vmatprep.mubr.msk.bf16.mxu0 %vm244_vm1, %v4011_v26  ;;  %v3102_v26 = vld [vmem:[%s3971_s22 + $0x199] sm:$0xff] }
  0xbd   : > { %3417 = vmatmul.mubr.msk.bf16.gmra.mrb[20].mxu1 %vm244_vm1, %v4172_v54 }
  0xbe   : > { %3571 = vmatmul.mubr.msk.bf16.gmra.mrb[4].mxu0 %vm244_vm1, %v4013_v27  ;;  %3420 = vmatprep.mubr.msk.bf16.mxu1 %vm244_vm1, %v4199_v6  ;;  %v3103_v27 = vld [vmem:[%s3971_s22 + $0x1a1] sm:$0xff] }
  0xbf   : > { %3574 = vmatprep.mubr.msk.bf16.mxu0 %vm244_vm1, %v4027_v32  ;;  %v2189_v32 = vpack.c.bf16 %v3103_v27, %v3102_v26 }
  0xc5   : > { %3421 = vmatmul.mubr.msk.bf16.gmra.mrb[24].mxu1 %vm244_vm1, %v4203_v8 }
  0xc6   : > { %3575 = vmatmul.mubr.msk.bf16.gmra.mrb[8].mxu0 %vm244_vm1, %v4029_v33  ;;  %3424 = vmatprep.mubr.msk.bf16.mxu1 %vm244_vm1, %v4223_v25  ;;  %v3151_v33 = vld [vmem:[%s3971_s22 + $0x19a] sm:$0xff] }
  0xc7   : > { %3578 = vmatprep.mubr.msk.bf16.mxu0 %vm244_vm1, %v4043_v38  ;;  %v3152_v38 = vld [vmem:[%s3971_s22 + $0x1a2] sm:$0xff] }
  0xcd   : > { %3425 = vmatmul.mubr.msk.bf16.gmra.mrb[28].mxu1 %vm244_vm1, %v4227_v31 }
  0xce   : > { %3579 = vmatmul.mubr.msk.bf16.gmra.mrb[12].mxu0 %vm244_vm1, %v4063_v48  ;;  %3430 = vmatprep.mubr.msk.bf16.mxu1 %vm244_vm1, %v4164_v45 }
  0xcf   : > { %3582 = vmatprep.mubr.msk.bf16.mxu0 %vm244_vm1, %v4067_v50 }
  0xd5   : > { %3431 = vmatmul.mubr.msk.bf16.vlgmr.msra.gmra.mrb[0].mxu1 %vm244_vm1, %v4170_v52 }
  0xd6   : > { %3633 = vmatpush3.bf16.msra.mxu1 %v3954_v3  ;;  %3583 = vmatmul.mubr.msk.bf16.gmra.mrb[16].mxu0 %vm244_vm1, %v4095_v62  ;;  %v3100_v3 = vld [vmem:[%s3971_s22 + $0x181] sm:$0xff] }
  0xd7   : > { %3434 = vmatprep.mubr.msk.bf16.mxu1 %vm244_vm1, %v4197_v5  ;;  %3586 = vmatprep.mubr.msk.bf16.mxu0 %vm244_vm1, %v4099_v0  ;;  %v2188_v19 = vpack.c.bf16 %v3101_v15, %v3100_v3 }
  0xdd   : > { %3435 = vmatmul.mubr.msk.bf16.gmra.mrb[4].mxu1 %vm244_vm1, %v4201_v7 }
  0xde   : > { %3587 = vmatmul.mubr.msk.bf16.gmra.mrb[20].mxu0 %vm244_vm1, %v4119_v12  ;;  %3438 = vmatprep.mubr.msk.bf16.mxu1 %vm244_vm1, %v4221_v24 }
  0xdf   : > { %3590 = vmatprep.mubr.msk.bf16.mxu0 %vm244_vm1, %v4123_v14 }
  0xe5   : > { %3439 = vmatmul.mubr.msk.bf16.gmra.mrb[8].mxu1 %vm244_vm1, %v4225_v28 }
  0xe6   : > { %3591 = vmatmul.mubr.msk.bf16.gmra.mrb[24].mxu0 %vm244_vm1, %v4143_v29  ;;  %3442 = vmatprep.mubr.msk.bf16.mxu1 %vm244_vm1, %v4243_v43 }
  0xe7   : > { %3594 = vmatprep.mubr.msk.bf16.mxu0 %vm244_vm1, %v2188_v19 }
  0xed   : > { %3443 = vmatmul.mubr.msk.bf16.gmra.mrb[12].mxu1 %vm244_vm1, %v4247_v47 }
  0xee   : > { %3595 = vmatmul.mubr.msk.bf16.gmra.mrb[28].mxu0 %vm244_vm1, %v2189_v32  ;;  %3446 = vmatprep.mubr.msk.bf16.mxu1 %vm244_vm1, %v4261_v59 }
  0xef   : > { %3600 = vmatprep.mubr.msk.bf16.mxu0 %vm244_vm1, %v4065_v49 }
  0xf5   : > { %3447 = vmatmul.mubr.msk.bf16.gmra.mrb[16].mxu1 %vm244_vm1, %v4263_v60 }
  0xf6   : > { %3601 = vmatmul.mubr.msk.bf16.vlgmr.msra.gmra.mrb[0].mxu0 %vm244_vm1, %v4069_v51  ;;  %3450 = vmatprep.mubr.msk.bf16.mxu1 %vm244_vm1, %v4283_v17 }
  0xf7   : > { %3604 = vmatprep.mubr.msk.bf16.mxu0 %vm244_vm1, %v4097_v63 }
  0xfd   : > { %3451 = vmatmul.mubr.msk.bf16.gmra.mrb[20].mxu1 %vm244_vm1, %v4285_v18 }
  0xfe   : > { %3605 = vmatmul.mubr.msk.bf16.gmra.mrb[4].mxu0 %vm244_vm1, %v4101_v2  ;;  %3454 = vmatprep.mubr.msk.bf16.mxu1 %vm244_vm1, %v4299_v36 }
  0xff   : > { %3608 = vmatprep.mubr.msk.bf16.mxu0 %vm244_vm1, %v4121_v13 }
 0x105   : > { %3455 = vmatmul.mubr.msk.bf16.gmra.mrb[24].mxu1 %vm244_vm1, %v4301_v37 }
 0x106   : > { %3609 = vmatmul.mubr.msk.bf16.gmra.mrb[8].mxu0 %vm244_vm1, %v4125_v16  ;;  %3458 = vmatprep.mubr.msk.bf16.mxu1 %vm244_vm1, %v4315_v57 }
 0x107   : > { %3612 = vmatprep.mubr.msk.bf16.mxu0 %vm244_vm1, %v4145_v30 }
 0x10d   : > { %3459 = vmatmul.mubr.msk.bf16.gmra.mrb[28].mxu1 %vm244_vm1, %v4346_v61 }
 0x10e   : > { %3613 = vmatmul.mubr.msk.bf16.gmra.mrb[12].mxu0 %vm244_vm1, %v4147_v34  ;;  %3480 = vmatprep.mubr.msk.bf16.mxu1 %vm244_vm1, %v4063_v48  ;;  %v2483_v48 = vpack.c.bf16 %v3152_v38, %v3151_v33 }
 0x10f   : > { %3616 = vmatprep.mubr.msk.bf16.mxu0 %vm244_vm1, %v4166_v46 }
 0x115   : > { %3481 = vmatmul.mubr.msk.bf16.vlgmr.msra.gmra.mrb[16].mxu1 %vm244_vm1, %v4067_v50 }
 0x116   : > { %3617 = vmatmul.mubr.msk.bf16.gmra.mrb[16].mxu0 %vm244_vm1, %v4172_v54  ;;  %3484 = vmatprep.mubr.msk.bf16.mxu1 %vm244_vm1, %v4095_v62 }
 0x117   : > { %3620 = vmatprep.mubr.msk.bf16.mxu0 %vm244_vm1, %v4199_v6 }
 0x11d   : > { %3485 = vmatmul.mubr.msk.bf16.gmra.mrb[20].mxu1 %vm244_vm1, %v4099_v0 }
 0x11e   : > { %3621 = vmatmul.mubr.msk.bf16.gmra.mrb[20].mxu0 %vm244_vm1, %v4203_v8  ;;  %3488 = vmatprep.mubr.msk.bf16.mxu1 %vm244_vm1, %v4119_v12 }
 0x11f   : > { %3624 = vmatprep.mubr.msk.bf16.mxu0 %vm244_vm1, %v4223_v25 }
 0x125   : > { %3489 = vmatmul.mubr.msk.bf16.gmra.mrb[24].mxu1 %vm244_vm1, %v4123_v14 }
 0x126   : > { %3625 = vmatmul.mubr.msk.bf16.gmra.mrb[24].mxu0 %vm244_vm1, %v4227_v31  ;;  %3492 = vmatprep.mubr.msk.bf16.mxu1 %vm244_vm1, %v4143_v29 }
 0x127   : > { %3628 = vmatprep.mubr.msk.bf16.mxu0 %vm244_vm1, %v4245_v44 }
 0x12d   : > { %3493 = vmatmul.mubr.msk.bf16.gmra.mrb[28].mxu1 %vm244_vm1, %v2188_v19 }
 0x12e   : > { %3629 = vmatmul.mubr.msk.bf16.gmra.mrb[28].mxu0 %vm244_vm1, %v2483_v48 }
 0x1a8   : > { %v3432_v49 = vpop.f32.mrb[0].mxu1 }
 0x1a9   : > { %v1100_v50 = vpop.f32.mrb[1].mxu1 }
 0x1aa   : > { %v3433_v51 = vpop.f32.mrb[2].mxu1 }
 0x1ab   : > { %v1103_v62 = vpop.f32.mrb[3].mxu1 }
 0x1b0   : > { %v3436_v63 = vpop.f32.mrb[4].mxu1 }
 0x1b1   : > { %v1116_v0 = vpop.f32.mrb[5].mxu1 }
 0x1b2   : > { %v3437_v2 = vpop.f32.mrb[6].mxu1 }
 0x1b3   : > { %v1119_v12 = vpop.f32.mrb[7].mxu1 }
 0x1b8   : > { %v3440_v13 = vpop.f32.mrb[8].mxu1 }
 0x1b9   : > { %v1132_v14 = vpop.f32.mrb[9].mxu1 }
 0x1ba   : > { %v3441_v16 = vpop.f32.mrb[10].mxu1 }
 0x1bb   : > { %v1135_v29 = vpop.f32.mrb[11].mxu1 }
 0x1c0   : > { %v3444_v30 = vpop.f32.mrb[12].mxu1 }
 0x1c1   : > { %v1148_v34 = vpop.f32.mrb[13].mxu1 }
 0x1c2   : > { %v3445_v45 = vpop.f32.mrb[14].mxu1 }
 0x1c3   : > { %v1151_v46 = vpop.f32.mrb[15].mxu1 }
 0x1c9   : > { %v3602_v52 = vpop.f32.mrb[0].mxu0 }
 0x1ca   : > { %v3634_v54 = vadd.f32 %v3602_v52, %v3432_v49  ;;  %v2571_v5 = vpop.f32.mrb[1].mxu0 }
 0x1cb   : > { %v3635_v6 = vadd.f32 %v2571_v5, %v1100_v50  ;;  %v3603_v7 = vpop.f32.mrb[2].mxu0 }
 0x1cc   : > { %2733 = vst.msk [vmem:[%s4497_s8 + $0x10] sm:$0xff] %vm2730_vm2, %v3634_v54  ;;  %v3636_v8 = vadd.f32 %v3603_v7, %v3433_v51  ;;  %v2574_v24 = vpop.f32.mrb[3].mxu0 }
 0x1cd   : > { %2731 = vst.msk [vmem:[%s4497_s8] sm:$0xff] %vm2730_vm2, %v3635_v6  ;;  %v3637_v25 = vadd.f32 %v2574_v24, %v1103_v62 }
 0x1ce   : > { %2734 = vst.msk [vmem:[%s4497_s8 + $0x18] sm:$0xff] %vm2730_vm2, %v3636_v8 }
 0x1cf   : > { %2732 = vst.msk [vmem:[%s4497_s8 + $0x8] sm:$0xff] %vm2730_vm2, %v3637_v25 }
 0x1d1   : > { %v3606_v28 = vpop.f32.mrb[4].mxu0 }
 0x1d2   : > { %v3638_v31 = vadd.f32 %v3606_v28, %v3436_v63  ;;  %v2587_v43 = vpop.f32.mrb[5].mxu0 }
 0x1d3   : > { %v3639_v44 = vadd.f32 %v2587_v43, %v1116_v0  ;;  %v3607_v47 = vpop.f32.mrb[6].mxu0 }
 0x1d4   : > { %2737 = vst.msk [vmem:[%s4497_s8 + $0x30] sm:$0xff] %vm2730_vm2, %v3638_v31  ;;  %v3640_v59 = vadd.f32 %v3607_v47, %v3437_v2  ;;  %v2590_v60 = vpop.f32.mrb[7].mxu0 }
 0x1d5   : > { %2735 = vst.msk [vmem:[%s4497_s8 + $0x20] sm:$0xff] %vm2730_vm2, %v3639_v44  ;;  %v3641_v4 = vadd.f32 %v2590_v60, %v1119_v12 }
 0x1d6   : > { %2738 = vst.msk [vmem:[%s4497_s8 + $0x38] sm:$0xff] %vm2730_vm2, %v3640_v59 }
 0x1d7   : > { %2736 = vst.msk [vmem:[%s4497_s8 + $0x28] sm:$0xff] %vm2730_vm2, %v3641_v4 }
 0x1d9   : > { %v3610_v11 = vpop.f32.mrb[8].mxu0 }
 0x1da   : > { %v3642_v17 = vadd.f32 %v3610_v11, %v3440_v13  ;;  %v2603_v18 = vpop.f32.mrb[9].mxu0 }
 0x1db   : > { %v3643_v20 = vadd.f32 %v2603_v18, %v1132_v14  ;;  %v3611_v22 = vpop.f32.mrb[10].mxu0 }
 0x1dc   : > { %2741 = vst.msk [vmem:[%s4497_s8 + $0x50] sm:$0xff] %vm2730_vm2, %v3642_v17  ;;  %v3644_v23 = vadd.f32 %v3611_v22, %v3441_v16  ;;  %v2606_v35 = vpop.f32.mrb[11].mxu0 }
 0x1dd   : > { %2739 = vst.msk [vmem:[%s4497_s8 + $0x40] sm:$0xff] %vm2730_vm2, %v3643_v20  ;;  %v3645_v36 = vadd.f32 %v2606_v35, %v1135_v29 }
 0x1de   : > { %2742 = vst.msk [vmem:[%s4497_s8 + $0x58] sm:$0xff] %vm2730_vm2, %v3644_v23 }
 0x1df   : > { %2740 = vst.msk [vmem:[%s4497_s8 + $0x48] sm:$0xff] %vm2730_vm2, %v3645_v36 }
 0x1e1   : > { %v3614_v37 = vpop.f32.mrb[12].mxu0 }
 0x1e2   : > { %v3646_v40 = vadd.f32 %v3614_v37, %v3444_v30  ;;  %v2619_v41 = vpop.f32.mrb[13].mxu0 }
 0x1e3   : > { %v3647_v42 = vadd.f32 %v2619_v41, %v1148_v34  ;;  %v3615_v56 = vpop.f32.mrb[14].mxu0 }
 0x1e4   : > { %2745 = vst.msk [vmem:[%s4497_s8 + $0x70] sm:$0xff] %vm2730_vm2, %v3646_v40  ;;  %v3648_v57 = vadd.f32 %v3615_v56, %v3445_v45  ;;  %v2622_v21 = vpop.f32.mrb[15].mxu0 }
 0x1e5   : > { %2743 = vst.msk [vmem:[%s4497_s8 + $0x60] sm:$0xff] %vm2730_vm2, %v3647_v42  ;;  %v3649_v58 = vadd.f32 %v2622_v21, %v1151_v46 }
 0x1e6   : > { %2746 = vst.msk [vmem:[%s4497_s8 + $0x78] sm:$0xff] %vm2730_vm2, %v3648_v57 }
 0x1e7   : > { %2744 = vst.msk [vmem:[%s4497_s8 + $0x68] sm:$0xff] %vm2730_vm2, %v3649_v58 }
 0x1e8   : > { %v3482_v39 = vpop.f32.mrb[16].mxu1 }
 0x1e9   : > { %v3618_v55 = vpop.f32.mrb[16].mxu0  ;;  %v1458_v61 = vpop.f32.mrb[17].mxu1 }
 0x1ea   : > { %v3650_v1 = vadd.f32 %v3618_v55, %v3482_v39  ;;  %v2635_v9 = vpop.f32.mrb[17].mxu0  ;;  %v3483_v10 = vpop.f32.mrb[18].mxu1 }
 0x1eb   : > { %v3651_v53 = vadd.f32 %v2635_v9, %v1458_v61  ;;  %v3619_v3 = vpop.f32.mrb[18].mxu0  ;;  %v1461_v15 = vpop.f32.mrb[19].mxu1 }
 0x1ec   : > { %2749 = vst.msk [vmem:[%s4497_s8 + $0x90] sm:$0xff] %vm2730_vm2, %v3650_v1  ;;  %v3652_v19 = vadd.f32 %v3619_v3, %v3483_v10  ;;  %v2638_v26 = vpop.f32.mrb[19].mxu0 }
 0x1ed   : > { %2747 = vst.msk [vmem:[%s4497_s8 + $0x80] sm:$0xff] %vm2730_vm2, %v3651_v53  ;;  %v3653_v27 = vadd.f32 %v2638_v26, %v1461_v15 }
 0x1ee   : > { %2750 = vst.msk [vmem:[%s4497_s8 + $0x98] sm:$0xff] %vm2730_vm2, %v3652_v19 }
 0x1ef   : > { %2748 = vst.msk [vmem:[%s4497_s8 + $0x88] sm:$0xff] %vm2730_vm2, %v3653_v27 }
 0x1f0   : > { %v3486_v32 = vpop.f32.mrb[20].mxu1 }
 0x1f1   : > { %v3622_v33 = vpop.f32.mrb[20].mxu0  ;;  %v1474_v38 = vpop.f32.mrb[21].mxu1 }
 0x1f2   : > { %v3654_v48 = vadd.f32 %v3622_v33, %v3486_v32  ;;  %v2651_v49 = vpop.f32.mrb[21].mxu0  ;;  %v3487_v50 = vpop.f32.mrb[22].mxu1 }
 0x1f3   : > { %v3655_v51 = vadd.f32 %v2651_v49, %v1474_v38  ;;  %v3623_v62 = vpop.f32.mrb[22].mxu0  ;;  %v1477_v63 = vpop.f32.mrb[23].mxu1 }
 0x1f4   : > { %2753 = vst.msk [vmem:[%s4497_s8 + $0xb0] sm:$0xff] %vm2730_vm2, %v3654_v48  ;;  %v3656_v0 = vadd.f32 %v3623_v62, %v3487_v50  ;;  %v2654_v2 = vpop.f32.mrb[23].mxu0 }
 0x1f5   : > { %2751 = vst.msk [vmem:[%s4497_s8 + $0xa0] sm:$0xff] %vm2730_vm2, %v3655_v51  ;;  %v3657_v12 = vadd.f32 %v2654_v2, %v1477_v63 }
 0x1f6   : > { %2754 = vst.msk [vmem:[%s4497_s8 + $0xb8] sm:$0xff] %vm2730_vm2, %v3656_v0 }
 0x1f7   : > { %2752 = vst.msk [vmem:[%s4497_s8 + $0xa8] sm:$0xff] %vm2730_vm2, %v3657_v12 }
 0x1f8   : > { %v3490_v13 = vpop.f32.mrb[24].mxu1 }
 0x1f9   : > { %v3626_v14 = vpop.f32.mrb[24].mxu0  ;;  %v1490_v16 = vpop.f32.mrb[25].mxu1 }
 0x1fa   : > { %v3658_v29 = vadd.f32 %v3626_v14, %v3490_v13  ;;  %v2667_v30 = vpop.f32.mrb[25].mxu0  ;;  %v3491_v34 = vpop.f32.mrb[26].mxu1 }
 0x1fb   : > { %v3659_v45 = vadd.f32 %v2667_v30, %v1490_v16  ;;  %v3627_v46 = vpop.f32.mrb[26].mxu0  ;;  %v1493_v52 = vpop.f32.mrb[27].mxu1 }
 0x1fc   : > { %2757 = vst.msk [vmem:[%s4497_s8 + $0xd0] sm:$0xff] %vm2730_vm2, %v3658_v29  ;;  %v3660_v54 = vadd.f32 %v3627_v46, %v3491_v34  ;;  %v2670_v5 = vpop.f32.mrb[27].mxu0 }
 0x1fd   : > { %2755 = vst.msk [vmem:[%s4497_s8 + $0xc0] sm:$0xff] %vm2730_vm2, %v3659_v45  ;;  %v3661_v6 = vadd.f32 %v2670_v5, %v1493_v52 }
 0x1fe   : > { %2758 = vst.msk [vmem:[%s4497_s8 + $0xd8] sm:$0xff] %vm2730_vm2, %v3660_v54 }
 0x1ff   : > { %2756 = vst.msk [vmem:[%s4497_s8 + $0xc8] sm:$0xff] %vm2730_vm2, %v3661_v6 }
 0x200   : > { %v3494_v7 = vpop.f32.mrb[28].mxu1 }
 0x201   : > { %v3630_v8 = vpop.f32.mrb[28].mxu0  ;;  %v1506_v24 = vpop.f32.mrb[29].mxu1 }
 0x202   : > { %v3662_v25 = vadd.f32 %v3630_v8, %v3494_v7  ;;  %v2683_v28 = vpop.f32.mrb[29].mxu0  ;;  %v3495_v31 = vpop.f32.mrb[30].mxu1 }
 0x203   : > { %v3663_v43 = vadd.f32 %v2683_v28, %v1506_v24  ;;  %v3631_v44 = vpop.f32.mrb[30].mxu0  ;;  %v1509_v47 = vpop.f32.mrb[31].mxu1 }
 0x204   : > { %2761 = vst.msk [vmem:[%s4497_s8 + $0xf0] sm:$0xff] %vm2730_vm2, %v3662_v25  ;;  %v3664_v59 = vadd.f32 %v3631_v44, %v3495_v31  ;;  %v2686_v60 = vpop.f32.mrb[31].mxu0 }
 0x205   : > { %2759 = vst.msk [vmem:[%s4497_s8 + $0xe0] sm:$0xff] %vm2730_vm2, %v3663_v43  ;;  %v3665_v4 = vadd.f32 %v2686_v60, %v1509_v47 }
 0x206   : > { %2762 = vst.msk [vmem:[%s4497_s8 + $0xf8] sm:$0xff] %vm2730_vm2, %v3664_v59 }
 0x207   : > { %2760 = vst.msk [vmem:[%s4497_s8 + $0xe8] sm:$0xff] %vm2730_vm2, %v3665_v4 }
 0x208 PF: > { %s12_s9 = sadd.s32 1, %s3915_s9  }
 0x209   : > { %p9_p4 = scmp.ge.s32.totalorder %s12_s9, 4  }
 0x20b   :  { %11 = sbr.rel (!%p9_p4) target bundleno = 1 (0x1), region = 68 }

// kernel: basic_block_forward.10
= control target key start
LH: loop header
LB: loop body
LE: loop exit
PB: predicated region body
PF: predicated region fallthrough
CT: control target
= control target key end

     0   :  { %s1772_s15 = smov 0   ;;  %s2359_s0 = inlined_call_operand.vmem [shape: f32[2,256,16], index: 0, kind: input, shape index: {}]   ;;  %s2360_s1 = inlined_call_operand.vmem [shape: f32[16,16], index: 1, kind: input, shape index: {}]   ;;  %s2361_s2 = inlined_call_operand.vmem [shape: f32[1,16], index: 2, kind: input, shape index: {}]   ;;  %s2362_s3 = inlined_call_operand.vmem [shape: f32[1,16], index: 3, kind: input, shape index: {}]   ;;  %s2363_s4 = inlined_call_operand.vmem [shape: f32[2,256,16], index: 4, kind: output, shape index: {}]  }
   0x1 LB: > { %s1533_s16 = sadd.s32 4294967295, %s1742_s15   ;;  %p1537_p0 = scmp.ge.s32.totalorder %s1742_s15, 1  ;;  %s1742_s15 = sphi %s1772_s15, %s14_s15  }
   0x2   : > { %p162_p1 = scmp.lt.s32.totalorder %s1742_s15, 3 }
   0x4   : > { %p163_p2 = pnand %p1537_p0, %p162_p1 }
   0x5   : > { %v230_v0 = vld [vmem:[%s2360_s1] sm:$0xff] (!%p163_p2)  ;;  %v231_v1 = vld [vmem:[%s2360_s1 + $0x8] sm:$0xff] (!%p163_p2)  ;;  %p188_p3 = scmp.lt.s32.totalorder (!%p163_p2), %s1533_s16, 1  ;;  %v1744_v2 = vmov (!%p163_p2), 0.0|0.0   ;;  %vm1745_vm0 = vmmov (!%p163_p2), 0   ;;  %v1746_v5 = vmov (!%p163_p2), 0.0  }
   0x6   : > { %166 = sbr.rel (%p163_p2) target bundleno = 747 (0x2eb), region = 36  ;;  %1667 = vmatprep.subr.bf16.mxu0 (!%p163_p2), %v1744_v2  ;;  %v306_v3 = vand.u32 (!%p163_p2), 4294901760, %v230_v0  ;;  %v309_v4 = vand.u32 (!%p163_p2), 4294901760, %v231_v1  ;;  %1587 = vmatprep.mubr.msk.f32.mxu0 (!%p163_p2), %vm1745_vm0, %v1746_v5  ;;  %vm232_vm1 = vcmask (!%p163_p2), 130048  }
   0x7   : > { %1685 = vmatprep.subr.bf16.mxu1 (!%p163_p2), %v1744_v2  ;;  %1629 = vmatprep.mubr.msk.f32.mxu1 (!%p163_p2), %vm1745_vm0, %v1746_v5 }
   0x8   : > { %v1794_v6 = vpack.c.bf16 (!%p163_p2), %v309_v4, %v306_v3  ;;  %v384_v7 = vsub.f32 (!%p163_p2), %v230_v0, %v306_v3  ;;  %v391_v8 = vsub.f32 (!%p163_p2), %v231_v1, %v309_v4 }
   0xa   : > { %1669 = vmatpush3.bf16.msra.mxu0 (!%p163_p2), %v1794_v6  ;;  %v1805_v9 = vpack.c.bf16 (!%p163_p2), %v391_v8, %v384_v7  ;;  %1687 = vmatpush3.bf16.msra.mxu1 (!%p163_p2), %v1794_v6  ;;  %v385_v20 = vand.u32 (!%p163_p2), 4294901760, %v384_v7  ;;  %v392_v21 = vand.u32 (!%p163_p2), 4294901760, %v391_v8 }
   0xb   : > { %1670 = vmatprep.subr.bf16.mxu0 (!%p163_p2), %v1744_v2  ;;  %1688 = vmatprep.subr.bf16.mxu1 (!%p163_p2), %v1744_v2 }
   0xc   : > { %v1838_v25 = vpack.c.bf16 (!%p163_p2), %v392_v21, %v385_v20  ;;  %v386_v29 = vsub.f32 (!%p163_p2), %v384_v7, %v385_v20  ;;  %v393_v30 = vsub.f32 (!%p163_p2), %v391_v8, %v392_v21 }
   0xd   : > { %s2365_s16 = smov (!%p188_p3, %s1533_s16), 1 }
   0xe   : > { %s1545_s21 = sshll.u32 %s2365_s16, 8  ;;  %v387_v37 = vand.u32 4294901760, %v386_v29  ;;  %v394_v38 = vand.u32 4294901760, %v393_v30 }
   0xf   : > { %s1803_s24 = scalar_lea.vmem %s2359_s0, %s1545_s21  ;;  %s2286_s5 = scalar_lea.vmem %s2363_s4, %s1545_s21 }
  0x10   : > { %v1810_v10 = vld [vmem:[%s1803_s24] sm:$0xff]  ;;  %v1813_v11 = vld [vmem:[%s1803_s24 + $0x8] sm:$0xff]  ;;  %v1816_v12 = vld [vmem:[%s1803_s24 + $0x10] sm:$0xff]  ;;  %v1860_v42 = vpack.c.bf16 %v394_v38, %v387_v37 }
  0x11   : > { %v1820_v13 = vld [vmem:[%s1803_s24 + $0x18] sm:$0xff]  ;;  %v233_v14 = vsel %vm232_vm1, %v1810_v10, 0.0  ;;  %v234_v15 = vsel %vm232_vm1, %v1813_v11, 0.0  ;;  %v236_v16 = vsel %vm232_vm1, %v1816_v12, 0.0  ;;  %v1829_v17 = vld [vmem:[%s1803_s24 + $0x20] sm:$0xff]  ;;  %v1834_v22 = vld [vmem:[%s1803_s24 + $0x28] sm:$0xff] }
  0x12   : > { %v235_v18 = vadd.f32 %v234_v15, %v233_v14  ;;  %v238_v19 = vsel %vm232_vm1, %v1820_v13, 0.0  ;;  %v240_v24 = vsel %vm232_vm1, %v1829_v17, 0.0  ;;  %v1841_v26 = vld [vmem:[%s1803_s24 + $0x30] sm:$0xff]  ;;  %v242_v28 = vsel %vm232_vm1, %v1834_v22, 0.0  ;;  %v1846_v31 = vld [vmem:[%s1803_s24 + $0x38] sm:$0xff]  ;;  %v1851_v34 = vld [vmem:[%s1803_s24 + $0x40] sm:$0xff] }
  0x13   : > { %v244_v33 = vsel %vm232_vm1, %v1841_v26, 0.0  ;;  %v246_v36 = vsel %vm232_vm1, %v1846_v31, 0.0  ;;  %v1856_v39 = vld [vmem:[%s1803_s24 + $0x48] sm:$0xff]  ;;  %v248_v41 = vsel %vm232_vm1, %v1851_v34, 0.0  ;;  %v1863_v43 = vld [vmem:[%s1803_s24 + $0x50] sm:$0xff]  ;;  %v1868_v46 = vld [vmem:[%s1803_s24 + $0x58] sm:$0xff] }
  0x14   : > { %v237_v23 = vadd.f32 %v236_v16, %v235_v18  ;;  %v250_v45 = vsel %vm232_vm1, %v1856_v39, 0.0  ;;  %v252_v48 = vsel %vm232_vm1, %v1863_v43, 0.0  ;;  %v1873_v49 = vld [vmem:[%s1803_s24 + $0x60] sm:$0xff]  ;;  %v254_v51 = vsel %vm232_vm1, %v1868_v46, 0.0  ;;  %v1878_v52 = vld [vmem:[%s1803_s24 + $0x68] sm:$0xff]  ;;  %v1883_v55 = vld [vmem:[%s1803_s24 + $0x70] sm:$0xff] }
  0x15   : > { %v256_v54 = vsel %vm232_vm1, %v1873_v49, 0.0  ;;  %v258_v57 = vsel %vm232_vm1, %v1878_v52, 0.0  ;;  %v1888_v58 = vld [vmem:[%s1803_s24 + $0x78] sm:$0xff]  ;;  %v260_v60 = vsel %vm232_vm1, %v1883_v55, 0.0  ;;  %v1893_v61 = vld [vmem:[%s1803_s24 + $0x80] sm:$0xff]  ;;  %v1898_v0 = vld [vmem:[%s1803_s24 + $0x88] sm:$0xff] }
  0x16   : > { %v239_v27 = vadd.f32 %v238_v19, %v237_v23  ;;  %v262_v63 = vsel %vm232_vm1, %v1888_v58, 0.0  ;;  %v264_v3 = vsel %vm232_vm1, %v1893_v61, 0.0  ;;  %v1903_v4 = vld [vmem:[%s1803_s24 + $0x90] sm:$0xff]  ;;  %v266_v8 = vsel %vm232_vm1, %v1898_v0, 0.0  ;;  %v1908_v14 = vld [vmem:[%s1803_s24 + $0x98] sm:$0xff]  ;;  %v1913_v18 = vld [vmem:[%s1803_s24 + $0xa0] sm:$0xff] }
  0x17   : > { %v268_v16 = vsel %vm232_vm1, %v1903_v4, 0.0  ;;  %v270_v20 = vsel %vm232_vm1, %v1908_v14, 0.0  ;;  %v1918_v21 = vld [vmem:[%s1803_s24 + $0xa8] sm:$0xff]  ;;  %v1928_v30 = vld [vmem:[%s1803_s24 + $0xb8] sm:$0xff] }
  0x18   : > { %v241_v32 = vadd.f32 %v240_v24, %v239_v27  ;;  %v272_v24 = vsel %vm232_vm1, %v1913_v18, 0.0  ;;  %v1923_v27 = vld [vmem:[%s1803_s24 + $0xb0] sm:$0xff]  ;;  %v274_v29 = vsel %vm232_vm1, %v1918_v21, 0.0  ;;  %v278_v37 = vsel %vm232_vm1, %v1928_v30, 0.0  ;;  %v1938_v38 = vld [vmem:[%s1803_s24 + $0xc8] sm:$0xff] }
  0x1a   : > { %v243_v35 = vadd.f32 %v242_v28, %v241_v32 }
  0x1c   : > { %v245_v40 = vadd.f32 %v244_v33, %v243_v35  ;;  %v276_v33 = vsel %vm232_vm1, %v1923_v27, 0.0  ;;  %v1933_v35 = vld [vmem:[%s1803_s24 + $0xc0] sm:$0xff] }
  0x1e   : > { %v247_v44 = vadd.f32 %v246_v36, %v245_v40 }
  0x20   : > { %v249_v47 = vadd.f32 %v248_v41, %v247_v44  ;;  %v280_v41 = vsel %vm232_vm1, %v1933_v35, 0.0  ;;  %v1943_v44 = vld [vmem:[%s1803_s24 + $0xd0] sm:$0xff] }
  0x22   : > { %v251_v50 = vadd.f32 %v250_v45, %v249_v47  ;;  %v282_v47 = vsel %vm232_vm1, %v1938_v38, 0.0 }
  0x24   : > { %v253_v53 = vadd.f32 %v252_v48, %v251_v50  ;;  %v1948_v48 = vld [vmem:[%s1803_s24 + $0xd8] sm:$0xff] }
  0x26   : > { %v255_v56 = vadd.f32 %v254_v51, %v253_v53  ;;  %v284_v51 = vsel %vm232_vm1, %v1943_v44, 0.0  ;;  %v1953_v53 = vld [vmem:[%s1803_s24 + $0xe0] sm:$0xff] }
  0x28   : > { %v257_v59 = vadd.f32 %v256_v54, %v255_v56  ;;  %v286_v56 = vsel %vm232_vm1, %v1948_v48, 0.0 }
  0x2a   : > { %v259_v62 = vadd.f32 %v258_v57, %v257_v59  ;;  %v1958_v57 = vld [vmem:[%s1803_s24 + $0xe8] sm:$0xff] }
  0x2c   : > { %v261_v1 = vadd.f32 %v260_v60, %v259_v62  ;;  %v288_v60 = vsel %vm232_vm1, %v1953_v53, 0.0  ;;  %v1963_v62 = vld [vmem:[%s1803_s24 + $0xf0] sm:$0xff] }
  0x2e   : > { %v263_v7 = vadd.f32 %v262_v63, %v261_v1  ;;  %v290_v1 = vsel %vm232_vm1, %v1958_v57, 0.0 }
  0x30   : > { %v265_v15 = vadd.f32 %v264_v3, %v263_v7  ;;  %v1968_v3 = vld [vmem:[%s1803_s24 + $0xf8] sm:$0xff] }
  0x32   : > { %v267_v19 = vadd.f32 %v266_v8, %v265_v15  ;;  %v292_v8 = vsel %vm232_vm1, %v1963_v62, 0.0 }
  0x34   : > { %v269_v23 = vadd.f32 %v268_v16, %v267_v19  ;;  %v294_v16 = vsel %vm232_vm1, %v1968_v3, 0.0 }
  0x36   : > { %v271_v28 = vadd.f32 %v270_v20, %v269_v23 }
  0x38   : > { %v273_v32 = vadd.f32 %v272_v24, %v271_v28 }
  0x3a   : > { %v275_v36 = vadd.f32 %v274_v29, %v273_v32 }
  0x3c   : > { %v277_v40 = vadd.f32 %v276_v33, %v275_v36 }
  0x3e   : > { %v279_v45 = vadd.f32 %v278_v37, %v277_v40 }
  0x40   : > { %v281_v50 = vadd.f32 %v280_v41, %v279_v45 }
  0x42   : > { %v283_v54 = vadd.f32 %v282_v47, %v281_v50  ;;  %v765_v50 = vlaneseq }
  0x44   : > { %v285_v59 = vadd.f32 %v284_v51, %v283_v54  ;;  %v1994_v54 = vshrl.u32 %v765_v50, 7 }
  0x46   : > { %v287_v63 = vadd.f32 %v286_v56, %v285_v59 }
  0x48   : > { %v289_v7 = vadd.f32 %v288_v60, %v287_v63  ;;  %v767_v60 = vsub.s32 0, %v1994_v54 }
  0x4a   : > { %v291_v15 = vadd.f32 %v290_v1, %v289_v7 }
  0x4c   : > { %v293_v19 = vadd.f32 %v292_v8, %v291_v15 }
  0x4e   : > { %v295_v20 = vadd.f32 %v294_v16, %v293_v19 }
  0x50   : > { %v296_v23 = vrot.slane %v295_v20, 4 }
  0x52   : > { %v297_v24 = vadd.f32 %v296_v23, %v295_v20 }
  0x54   : > { %v298_v28 = vrot.slane %v297_v24, 2 }
  0x56   : > { %v299_v29 = vadd.f32 %v298_v28, %v297_v24 }
  0x58   : > { %v300_v32 = vrot.slane %v299_v29, 1 }
  0x5a   : > { %v301_v33 = vadd.f32 %v300_v32, %v299_v29 }
  0x5c   : > { %v303_v36 = vsel %vm232_vm1, %v301_v33, 0 }
  0x5d   : > { %v372_v37 = vand.u32 4294901760, %v303_v36 }
  0x5f   : > { %v373_v40 = vsub.f32 %v303_v36, %v372_v37 }
  0x61   : > { %v374_v41 = vand.u32 4294901760, %v373_v40 }
  0x63   : > { %v375_v45 = vsub.f32 %v373_v40, %v374_v41 }
  0x65   : > { %v376_v47 = vand.u32 4294901760, %v375_v45 }
  0x67   : > { %1588 = vmatmul.mubr.f32.vlgmr.msra.gmra.mrb[0].mxu0 %v376_v47 }
  0x68   : > { %1672 = vmatpush3.bf16.msra.mxu0 %v1860_v42  ;;  %1594 = vmatprep.mubr.msk.f32.mxu0 %vm1745_vm0, %v1746_v5 }
  0x69   : > { %1673 = vmatprep.subr.bf16.mxu0 %v1744_v2 }
  0x6f   : > { %1595 = vmatmul.mubr.f32.vlgmr.msra.gmra.mrb[0].mxu0 %v372_v37 }
  0x70   : > { %1675 = vmatpush3.bf16.msra.mxu0 %v1805_v9  ;;  %1601 = vmatprep.mubr.msk.f32.mxu0 %vm1745_vm0, %v1746_v5 }
  0x71   : > { %1676 = vmatprep.subr.bf16.mxu0 %v1744_v2 }
  0x77   : > { %1602 = vmatmul.mubr.f32.vlgmr.msra.gmra.mrb[0].mxu0 %v373_v40 }
  0x78   : > { %1678 = vmatpush3.bf16.msra.mxu0 %v1794_v6  ;;  %1608 = vmatprep.mubr.msk.f32.mxu0 %vm1745_vm0, %v1746_v5 }
  0x79   : > { %1679 = vmatprep.subr.bf16.mxu0 %v1744_v2 }
  0x7f   : > { %1609 = vmatmul.mubr.f32.vlgmr.msra.gmra.mrb[0].mxu0 %v374_v41 }
  0x80   : > { %1681 = vmatpush3.bf16.msra.mxu0 %v1838_v25  ;;  %1615 = vmatprep.mubr.msk.f32.mxu0 %vm1745_vm0, %v1746_v5 }
  0x81   : > { %1682 = vmatprep.subr.bf16.mxu0 %v1744_v2 }
  0x87   : > { %1616 = vmatmul.mubr.f32.vlgmr.msra.gmra.mrb[0].mxu0 %v372_v37 }
  0x88   : > { %1684 = vmatpush3.bf16.msra.mxu0 %v1794_v6  ;;  %1622 = vmatprep.mubr.msk.f32.mxu0 %vm1745_vm0, %v1746_v5 }
  0x8f   : > { %1623 = vmatmul.mubr.f32.vlgmr.msra.gmra.mrb[0].mxu0 %v372_v37 }
 0x162   : > { %v760_v51 = vpop.f32.mrb[0].mxu0 }
 0x163   : > { %v1624_v56 = vpop.f32.mrb[1].mxu0  ;;  %v764_v59 = vmul.f32 0.001953125, %v760_v51 }
 0x165   : > { %v1999_v63 = vrot.slane %v764_v59, %v767_v60 }
 0x167   : > { %v2003_v1 = vsub.f32 %v1810_v10, %v1999_v63  ;;  %v2007_v7 = vsub.f32 %v1813_v11, %v1999_v63  ;;  %v2011_v8 = vsub.f32 %v1816_v12, %v1999_v63  ;;  %v2015_v15 = vsub.f32 %v1820_v13, %v1999_v63 }
 0x168   : > { %v2023_v10 = vsub.f32 %v1829_v17, %v1999_v63  ;;  %v2029_v12 = vsub.f32 %v1834_v22, %v1999_v63  ;;  %v2037_v28 = vsub.f32 %v1841_v26, %v1999_v63  ;;  %v2044_v22 = vsub.f32 %v1846_v31, %v1999_v63 }
 0x169   : > { %v801_v16 = vmul.f32 %v2003_v1, %v2003_v1  ;;  %v802_v19 = vmul.f32 %v2007_v7, %v2007_v7  ;;  %v803_v11 = vmul.f32 %v2011_v8, %v2011_v8  ;;  %v804_v13 = vmul.f32 %v2015_v15, %v2015_v15 }
 0x16a   : > { %v805_v17 = vmul.f32 %v2023_v10, %v2023_v10  ;;  %v806_v33 = vmul.f32 %v2029_v12, %v2029_v12  ;;  %v2051_v26 = vsub.f32 %v1851_v34, %v1999_v63  ;;  %v807_v40 = vmul.f32 %v2037_v28, %v2037_v28 }
 0x16b   : > { %v833_v20 = vsel %vm232_vm1, %v801_v16, 0.0  ;;  %v834_v23 = vsel %vm232_vm1, %v802_v19, 0.0  ;;  %v836_v29 = vsel %vm232_vm1, %v803_v11, 0.0  ;;  %v838_v36 = vsel %vm232_vm1, %v804_v13, 0.0 }
 0x16c   : > { %v835_v24 = vadd.f32 %v834_v23, %v833_v20  ;;  %v840_v41 = vsel %vm232_vm1, %v805_v17, 0.0  ;;  %v2058_v31 = vsub.f32 %v1856_v39, %v1999_v63  ;;  %v808_v47 = vmul.f32 %v2044_v22, %v2044_v22 }
 0x16d   : > { %v842_v50 = vsel %vm232_vm1, %v806_v33, 0.0  ;;  %v2065_v34 = vsub.f32 %v1863_v43, %v1999_v63  ;;  %v809_v56 = vmul.f32 %v2051_v26, %v2051_v26  ;;  %v844_v59 = vsel %vm232_vm1, %v807_v40, 0.0 }
 0x16e   : > { %v837_v32 = vadd.f32 %v836_v29, %v835_v24  ;;  %v2072_v39 = vsub.f32 %v1868_v46, %v1999_v63  ;;  %v810_v19 = vmul.f32 %v2058_v31, %v2058_v31  ;;  %v846_v11 = vsel %vm232_vm1, %v808_v47, 0.0 }
 0x16f   : > { %v2079_v43 = vsub.f32 %v1873_v49, %v1999_v63  ;;  %v811_v20 = vmul.f32 %v2065_v34, %v2065_v34  ;;  %v848_v23 = vsel %vm232_vm1, %v809_v56, 0.0  ;;  %v2086_v46 = vsub.f32 %v1878_v52, %v1999_v63 }
 0x170   : > { %v839_v37 = vadd.f32 %v838_v36, %v837_v32  ;;  %v812_v17 = vmul.f32 %v2072_v39, %v2072_v39  ;;  %v850_v29 = vsel %vm232_vm1, %v810_v19, 0.0  ;;  %v2093_v49 = vsub.f32 %v1883_v55, %v1999_v63 }
 0x171   : > { %v813_v33 = vmul.f32 %v2079_v43, %v2079_v43  ;;  %v852_v36 = vsel %vm232_vm1, %v811_v20, 0.0  ;;  %v2100_v52 = vsub.f32 %v1888_v58, %v1999_v63  ;;  %v814_v40 = vmul.f32 %v2086_v46, %v2086_v46 }
 0x172   : > { %v841_v45 = vadd.f32 %v840_v41, %v839_v37  ;;  %v854_v41 = vsel %vm232_vm1, %v812_v17, 0.0  ;;  %v2107_v55 = vsub.f32 %v1893_v61, %v1999_v63  ;;  %v815_v47 = vmul.f32 %v2093_v49, %v2093_v49 }
 0x173   : > { %v2114_v58 = vsub.f32 %v1898_v0, %v1999_v63  ;;  %v816_v56 = vmul.f32 %v2100_v52, %v2100_v52  ;;  %v2121_v61 = vsub.f32 %v1903_v4, %v1999_v63  ;;  %v2128_v0 = vsub.f32 %v1908_v14, %v1999_v63 }
 0x174   : > { %v843_v51 = vadd.f32 %v842_v50, %v841_v45  ;;  %v856_v50 = vsel %vm232_vm1, %v813_v33, 0.0  ;;  %v817_v19 = vmul.f32 %v2107_v55, %v2107_v55  ;;  %v2135_v4 = vsub.f32 %v1913_v18, %v1999_v63 }
 0x175   : > { %v818_v20 = vmul.f32 %v2114_v58, %v2114_v58  ;;  %v819_v17 = vmul.f32 %v2121_v61, %v2121_v61  ;;  %v2142_v14 = vsub.f32 %v1918_v21, %v1999_v63  ;;  %v820_v33 = vmul.f32 %v2128_v0, %v2128_v0 }
 0x176   : > { %v845_v16 = vadd.f32 %v844_v59, %v843_v51  ;;  %v858_v59 = vsel %vm232_vm1, %v814_v40, 0.0  ;;  %v2149_v18 = vsub.f32 %v1923_v27, %v1999_v63  ;;  %v821_v40 = vmul.f32 %v2135_v4, %v2135_v4 }
 0x177   : > { %v2156_v21 = vsub.f32 %v1928_v30, %v1999_v63  ;;  %v2163_v27 = vsub.f32 %v1933_v35, %v1999_v63  ;;  %v2170_v30 = vsub.f32 %v1938_v38, %v1999_v63  ;;  %v2177_v35 = vsub.f32 %v1943_v44, %v1999_v63 }
 0x178   : > { %v847_v13 = vadd.f32 %v846_v11, %v845_v16  ;;  %v860_v11 = vsel %vm232_vm1, %v815_v47, 0.0  ;;  %v822_v47 = vmul.f32 %v2142_v14, %v2142_v14  ;;  %v2184_v38 = vsub.f32 %v1948_v48, %v1999_v63 }
 0x179   : > { %v2191_v44 = vsub.f32 %v1953_v53, %v1999_v63  ;;  %v2198_v48 = vsub.f32 %v1958_v57, %v1999_v63  ;;  %v2205_v53 = vsub.f32 %v1963_v62, %v1999_v63  ;;  %v2212_v57 = vsub.f32 %v1968_v3, %v1999_v63 }
 0x17a   : > { %v849_v24 = vadd.f32 %v848_v23, %v847_v13  ;;  %v862_v23 = vsel %vm232_vm1, %v816_v56, 0.0  ;;  %v823_v56 = vmul.f32 %v2149_v18, %v2149_v18 }
 0x17b   : > { %v831_v62 = vmul.f32 %v2205_v53, %v2205_v53 }
 0x17c   : > { %v851_v32 = vadd.f32 %v850_v29, %v849_v24  ;;  %v864_v29 = vsel %vm232_vm1, %v817_v19, 0.0  ;;  %v824_v19 = vmul.f32 %v2156_v21, %v2156_v21 }
 0x17d   : > { %v892_v3 = vsel %vm232_vm1, %v831_v62, 0.0 }
 0x17e   : > { %v853_v37 = vadd.f32 %v852_v36, %v851_v32  ;;  %v866_v36 = vsel %vm232_vm1, %v818_v20, 0.0  ;;  %v825_v20 = vmul.f32 %v2163_v27, %v2163_v27 }
 0x180   : > { %v855_v45 = vadd.f32 %v854_v41, %v853_v37  ;;  %v868_v41 = vsel %vm232_vm1, %v819_v17, 0.0  ;;  %v826_v17 = vmul.f32 %v2170_v30, %v2170_v30 }
 0x182   : > { %v857_v51 = vadd.f32 %v856_v50, %v855_v45  ;;  %v870_v50 = vsel %vm232_vm1, %v820_v33, 0.0  ;;  %v827_v33 = vmul.f32 %v2177_v35, %v2177_v35 }
 0x184   : > { %v859_v16 = vadd.f32 %v858_v59, %v857_v51  ;;  %v872_v59 = vsel %vm232_vm1, %v821_v40, 0.0  ;;  %v828_v40 = vmul.f32 %v2184_v38, %v2184_v38 }
 0x186   : > { %v861_v13 = vadd.f32 %v860_v11, %v859_v16  ;;  %v874_v11 = vsel %vm232_vm1, %v822_v47, 0.0  ;;  %v829_v47 = vmul.f32 %v2191_v44, %v2191_v44 }
 0x188   : > { %v863_v24 = vadd.f32 %v862_v23, %v861_v13  ;;  %v876_v23 = vsel %vm232_vm1, %v823_v56, 0.0  ;;  %v830_v56 = vmul.f32 %v2198_v48, %v2198_v48 }
 0x18a   : > { %v865_v32 = vadd.f32 %v864_v29, %v863_v24  ;;  %v878_v29 = vsel %vm232_vm1, %v824_v19, 0.0  ;;  %v888_v19 = vsel %vm232_vm1, %v829_v47, 0.0 }
 0x18c   : > { %v867_v37 = vadd.f32 %v866_v36, %v865_v32  ;;  %v880_v36 = vsel %vm232_vm1, %v825_v20, 0.0  ;;  %v890_v20 = vsel %vm232_vm1, %v830_v56, 0.0 }
 0x18e   : > { %v869_v45 = vadd.f32 %v868_v41, %v867_v37  ;;  %v882_v41 = vsel %vm232_vm1, %v826_v17, 0.0 }
 0x190   : > { %v871_v51 = vadd.f32 %v870_v50, %v869_v45  ;;  %v884_v50 = vsel %vm232_vm1, %v827_v33, 0.0 }
 0x192   : > { %v873_v16 = vadd.f32 %v872_v59, %v871_v51  ;;  %v886_v59 = vsel %vm232_vm1, %v828_v40, 0.0 }
 0x194   : > { %v875_v13 = vadd.f32 %v874_v11, %v873_v16 }
 0x196   : > { %v877_v24 = vadd.f32 %v876_v23, %v875_v13  ;;  %v832_v13 = vmul.f32 %v2212_v57, %v2212_v57 }
 0x198   : > { %v879_v32 = vadd.f32 %v878_v29, %v877_v24  ;;  %v894_v24 = vsel %vm232_vm1, %v832_v13, 0.0 }
 0x19a   : > { %v881_v37 = vadd.f32 %v880_v36, %v879_v32 }
 0x19c   : > { %v883_v45 = vadd.f32 %v882_v41, %v881_v37 }
 0x19e   : > { %v885_v51 = vadd.f32 %v884_v50, %v883_v45 }
 0x1a0   : > { %v887_v16 = vadd.f32 %v886_v59, %v885_v51 }
 0x1a2   : > { %v889_v11 = vadd.f32 %v888_v19, %v887_v16 }
 0x1a4   : > { %v891_v23 = vadd.f32 %v890_v20, %v889_v11 }
 0x1a6   : > { %v893_v63 = vadd.f32 %v892_v3, %v891_v23 }
 0x1a8   : > { %v895_v17 = vadd.f32 %v894_v24, %v893_v63 }
 0x1aa   : > { %v896_v29 = vrot.slane %v895_v17, 4 }
 0x1ac   : > { %v897_v32 = vadd.f32 %v896_v29, %v895_v17 }
 0x1ae   : > { %v898_v33 = vrot.slane %v897_v32, 2 }
 0x1b0   : > { %v899_v36 = vadd.f32 %v898_v33, %v897_v32 }
 0x1b2   : > { %v900_v37 = vrot.slane %v899_v36, 1 }
 0x1b4   : > { %v901_v40 = vadd.f32 %v900_v37, %v899_v36 }
 0x1b6   : > { %v903_v41 = vsel %vm232_vm1, %v901_v40, 0 }
 0x1b7   : > { %v972_v45 = vand.u32 4294901760, %v903_v41 }
 0x1b9   : > { %v973_v47 = vsub.f32 %v903_v41, %v972_v45 }
 0x1bb   : > { %v974_v50 = vand.u32 4294901760, %v973_v47 }
 0x1bd   : > { %v975_v51 = vsub.f32 %v973_v47, %v974_v50 }
 0x1bf   : > { %v976_v56 = vand.u32 4294901760, %v975_v51 }
 0x1c1   : > { %1630 = vmatmul.mubr.f32.vlgmr.msra.gmra.mrb[0].mxu1 %v976_v56 }
 0x1c2   : > { %1690 = vmatpush3.bf16.msra.mxu1 %v1860_v42  ;;  %1636 = vmatprep.mubr.msk.f32.mxu1 %vm1745_vm0, %v1746_v5 }
 0x1c3   : > { %1691 = vmatprep.subr.bf16.mxu1 %v1744_v2 }
 0x1c9   : > { %1637 = vmatmul.mubr.f32.vlgmr.msra.gmra.mrb[0].mxu1 %v972_v45 }
 0x1ca   : > { %1693 = vmatpush3.bf16.msra.mxu1 %v1805_v9  ;;  %1643 = vmatprep.mubr.msk.f32.mxu1 %vm1745_vm0, %v1746_v5 }
 0x1cb   : > { %1694 = vmatprep.subr.bf16.mxu1 %v1744_v2 }
 0x1d1   : > { %1644 = vmatmul.mubr.f32.vlgmr.msra.gmra.mrb[0].mxu1 %v973_v47 }
 0x1d2   : > { %1696 = vmatpush3.bf16.msra.mxu1 %v1794_v6  ;;  %1650 = vmatprep.mubr.msk.f32.mxu1 %vm1745_vm0, %v1746_v5 }
 0x1d3   : > { %1697 = vmatprep.subr.bf16.mxu1 %v1744_v2 }
 0x1d9   : > { %1651 = vmatmul.mubr.f32.vlgmr.msra.gmra.mrb[0].mxu1 %v974_v50 }
 0x1da   : > { %1699 = vmatpush3.bf16.msra.mxu1 %v1838_v25  ;;  %1657 = vmatprep.mubr.msk.f32.mxu1 %vm1745_vm0, %v1746_v5  ;;  %v1365_v25 = vld [vmem:[%s2361_s2] sm:$0x1] }
 0x1db   : > { %1700 = vmatprep.subr.bf16.mxu1 %v1744_v2 }
 0x1e1   : > { %1658 = vmatmul.mubr.f32.vlgmr.msra.gmra.mrb[0].mxu1 %v972_v45 }
 0x1e2   : > { %1702 = vmatpush3.bf16.msra.mxu1 %v1794_v6  ;;  %1664 = vmatprep.mubr.msk.f32.mxu1 %vm1745_vm0, %v1746_v5 }
 0x1e9   : > { %1665 = vmatmul.mubr.f32.vlgmr.msra.gmra.mrb[0].mxu1 %v972_v45 }
 0x2bc   : > { %v1360_v9 = vpop.f32.mrb[0].mxu1 }
 0x2bd   : > { %v1364_v42 = vmul.f32 0.001953125, %v1360_v9  ;;  %v1666_v59 = vpop.f32.mrb[1].mxu1 }
 0x2bf   : > { %v1366_v16 = vadd.f32 1e-05, %v1364_v42 }
 0x2c1   : > { %1734 = vrsqrt.f32 %v1366_v16 }
 0x2cb   : > { %v1735_v62 = vpop.eup %1734 }
 0x2cc   : > { %v1368_v19 = vmul.f32 %v1735_v62, %v1365_v25 }
 0x2ce   : > { %v1373_v2 = vrot.slane %v1368_v19, %v767_v60 }
 0x2d0   : > { %v1375_v6 = vmul.f32 %v1373_v2, %v2003_v1  ;;  %v1376_v11 = vmul.f32 %v1373_v2, %v2007_v7  ;;  %v1377_v5 = vmul.f32 %v1373_v2, %v2011_v8  ;;  %v1378_v13 = vmul.f32 %v1373_v2, %v2015_v15 }
 0x2d1   : > { %v1379_v20 = vmul.f32 %v1373_v2, %v2023_v10  ;;  %v1380_v23 = vmul.f32 %v1373_v2, %v2029_v12  ;;  %v1381_v3 = vmul.f32 %v1373_v2, %v2037_v28  ;;  %v1382_v63 = vmul.f32 %v1373_v2, %v2044_v22 }
 0x2d2   : > { %v1383_v24 = vmul.f32 %v1373_v2, %v2051_v26  ;;  %v1384_v54 = vmul.f32 %v1373_v2, %v2058_v31  ;;  %v1385_v60 = vmul.f32 %v1373_v2, %v2065_v34  ;;  %v1386_v1 = vmul.f32 %v1373_v2, %v2072_v39 }
 0x2d3   : > { %v1387_v7 = vmul.f32 %v1373_v2, %v2079_v43  ;;  %v1388_v8 = vmul.f32 %v1373_v2, %v2086_v46  ;;  %v1389_v15 = vmul.f32 %v1373_v2, %v2093_v49  ;;  %v1390_v10 = vmul.f32 %v1373_v2, %v2100_v52  ;;  %v1542_v46 = vld [vmem:[%s2362_s3] ss:$0 sm:$0xff] }
 0x2d4   : > { %v1391_v12 = vmul.f32 %v1373_v2, %v2107_v55  ;;  %v1392_v28 = vmul.f32 %v1373_v2, %v2114_v58  ;;  %v1393_v22 = vmul.f32 %v1373_v2, %v2121_v61  ;;  %v1394_v26 = vmul.f32 %v1373_v2, %v2128_v0 }
 0x2d5   : > { %v1395_v31 = vmul.f32 %v1373_v2, %v2135_v4  ;;  %v1396_v34 = vmul.f32 %v1373_v2, %v2142_v14  ;;  %v1397_v39 = vmul.f32 %v1373_v2, %v2149_v18  ;;  %v1398_v43 = vmul.f32 %v1373_v2, %v2156_v21 }
 0x2d6   : > { %v1399_v49 = vmul.f32 %v1373_v2, %v2163_v27  ;;  %v1400_v52 = vmul.f32 %v1373_v2, %v2170_v30  ;;  %v1401_v55 = vmul.f32 %v1373_v2, %v2177_v35  ;;  %v1402_v58 = vmul.f32 %v1373_v2, %v2184_v38 }
 0x2d7   : > { %v1403_v61 = vmul.f32 %v1373_v2, %v2191_v44  ;;  %v1404_v0 = vmul.f32 %v1373_v2, %v2198_v48  ;;  %v1405_v4 = vmul.f32 %v1373_v2, %v2205_v53  ;;  %v1406_v14 = vmul.f32 %v1373_v2, %v2212_v57 }
 0x2d8   : > { %v1414_v18 = vadd.f32 %v1542_v46, %v1375_v6  ;;  %v1415_v21 = vadd.f32 %v1542_v46, %v1376_v11  ;;  %v1416_v27 = vadd.f32 %v1542_v46, %v1377_v5  ;;  %v1417_v30 = vadd.f32 %v1542_v46, %v1378_v13 }
 0x2d9   : > { %v1418_v35 = vadd.f32 %v1542_v46, %v1379_v20  ;;  %v1419_v38 = vadd.f32 %v1542_v46, %v1380_v23  ;;  %v1420_v17 = vadd.f32 %v1542_v46, %v1381_v3  ;;  %v1421_v44 = vadd.f32 %v1542_v46, %v1382_v63 }
 0x2da   : > { %v1422_v48 = vadd.f32 %v1542_v46, %v1383_v24  ;;  %v1423_v29 = vadd.f32 %v1542_v46, %v1384_v54  ;;  %v1424_v32 = vadd.f32 %v1542_v46, %v1385_v60  ;;  %v1425_v53 = vadd.f32 %v1542_v46, %v1386_v1  ;;  %1446 = vst.msk [vmem:[%s2286_s5] sm:$0xff] %vm232_vm1, %v1414_v18 }
 0x2db   : > { %1447 = vst.msk [vmem:[%s2286_s5 + $0x8] sm:$0xff] %vm232_vm1, %v1415_v21  ;;  %1448 = vst.msk [vmem:[%s2286_s5 + $0x10] sm:$0xff] %vm232_vm1, %v1416_v27  ;;  %v1426_v57 = vadd.f32 %v1542_v46, %v1387_v7  ;;  %v1427_v33 = vadd.f32 %v1542_v46, %v1388_v8  ;;  %v1428_v36 = vadd.f32 %v1542_v46, %v1389_v15 }
 0x2dc   : > { %1449 = vst.msk [vmem:[%s2286_s5 + $0x18] sm:$0xff] %vm232_vm1, %v1417_v30  ;;  %v1429_v37 = vadd.f32 %v1542_v46, %v1390_v10  ;;  %1450 = vst.msk [vmem:[%s2286_s5 + $0x20] sm:$0xff] %vm232_vm1, %v1418_v35  ;;  %v1430_v40 = vadd.f32 %v1542_v46, %v1391_v12  ;;  %v1431_v41 = vadd.f32 %v1542_v46, %v1392_v28 }
 0x2dd   : > { %1451 = vst.msk [vmem:[%s2286_s5 + $0x28] sm:$0xff] %vm232_vm1, %v1419_v38  ;;  %1452 = vst.msk [vmem:[%s2286_s5 + $0x30] sm:$0xff] %vm232_vm1, %v1420_v17  ;;  %v1432_v45 = vadd.f32 %v1542_v46, %v1393_v22  ;;  %v1433_v47 = vadd.f32 %v1542_v46, %v1394_v26  ;;  %v1434_v50 = vadd.f32 %v1542_v46, %v1395_v31 }
 0x2de   : > { %1453 = vst.msk [vmem:[%s2286_s5 + $0x38] sm:$0xff] %vm232_vm1, %v1421_v44  ;;  %1454 = vst.msk [vmem:[%s2286_s5 + $0x40] sm:$0xff] %vm232_vm1, %v1422_v48  ;;  %v1435_v51 = vadd.f32 %v1542_v46, %v1396_v34  ;;  %v1436_v56 = vadd.f32 %v1542_v46, %v1397_v39  ;;  %v1437_v9 = vadd.f32 %v1542_v46, %v1398_v43 }
 0x2df   : > { %1455 = vst.msk [vmem:[%s2286_s5 + $0x48] sm:$0xff] %vm232_vm1, %v1423_v29  ;;  %1456 = vst.msk [vmem:[%s2286_s5 + $0x50] sm:$0xff] %vm232_vm1, %v1424_v32  ;;  %v1438_v42 = vadd.f32 %v1542_v46, %v1399_v49  ;;  %v1439_v59 = vadd.f32 %v1542_v46, %v1400_v52  ;;  %v1440_v16 = vadd.f32 %v1542_v46, %v1401_v55 }
 0x2e0   : > { %1457 = vst.msk [vmem:[%s2286_s5 + $0x58] sm:$0xff] %vm232_vm1, %v1425_v53  ;;  %1458 = vst.msk [vmem:[%s2286_s5 + $0x60] sm:$0xff] %vm232_vm1, %v1426_v57  ;;  %v1441_v25 = vadd.f32 %v1542_v46, %v1402_v58  ;;  %v1442_v62 = vadd.f32 %v1542_v46, %v1403_v61  ;;  %v1443_v19 = vadd.f32 %v1542_v46, %v1404_v0 }
 0x2e1   : > { %1459 = vst.msk [vmem:[%s2286_s5 + $0x68] sm:$0xff] %vm232_vm1, %v1427_v33  ;;  %1460 = vst.msk [vmem:[%s2286_s5 + $0x70] sm:$0xff] %vm232_vm1, %v1428_v36  ;;  %v1444_v2 = vadd.f32 %v1542_v46, %v1405_v4  ;;  %v1445_v6 = vadd.f32 %v1542_v46, %v1406_v14 }
 0x2e2   : > { %1461 = vst.msk [vmem:[%s2286_s5 + $0x78] sm:$0xff] %vm232_vm1, %v1429_v37  ;;  %1462 = vst.msk [vmem:[%s2286_s5 + $0x80] sm:$0xff] %vm232_vm1, %v1430_v40 }
 0x2e3   : > { %1463 = vst.msk [vmem:[%s2286_s5 + $0x88] sm:$0xff] %vm232_vm1, %v1431_v41  ;;  %1464 = vst.msk [vmem:[%s2286_s5 + $0x90] sm:$0xff] %vm232_vm1, %v1432_v45 }
 0x2e4   : > { %1465 = vst.msk [vmem:[%s2286_s5 + $0x98] sm:$0xff] %vm232_vm1, %v1433_v47  ;;  %1466 = vst.msk [vmem:[%s2286_s5 + $0xa0] sm:$0xff] %vm232_vm1, %v1434_v50 }
 0x2e5   : > { %1467 = vst.msk [vmem:[%s2286_s5 + $0xa8] sm:$0xff] %vm232_vm1, %v1435_v51  ;;  %1468 = vst.msk [vmem:[%s2286_s5 + $0xb0] sm:$0xff] %vm232_vm1, %v1436_v56 }
 0x2e6   : > { %1469 = vst.msk [vmem:[%s2286_s5 + $0xb8] sm:$0xff] %vm232_vm1, %v1437_v9  ;;  %1470 = vst.msk [vmem:[%s2286_s5 + $0xc0] sm:$0xff] %vm232_vm1, %v1438_v42 }
 0x2e7   : > { %1471 = vst.msk [vmem:[%s2286_s5 + $0xc8] sm:$0xff] %vm232_vm1, %v1439_v59  ;;  %1472 = vst.msk [vmem:[%s2286_s5 + $0xd0] sm:$0xff] %vm232_vm1, %v1440_v16 }
 0x2e8   : > { %1473 = vst.msk [vmem:[%s2286_s5 + $0xd8] sm:$0xff] %vm232_vm1, %v1441_v25  ;;  %1474 = vst.msk [vmem:[%s2286_s5 + $0xe0] sm:$0xff] %vm232_vm1, %v1442_v62 }
 0x2e9   : > { %1475 = vst.msk [vmem:[%s2286_s5 + $0xe8] sm:$0xff] %vm232_vm1, %v1443_v19  ;;  %1476 = vst.msk [vmem:[%s2286_s5 + $0xf0] sm:$0xff] %vm232_vm1, %v1444_v2 }
 0x2ea   : > { %1477 = vst.msk [vmem:[%s2286_s5 + $0xf8] sm:$0xff] %vm232_vm1, %v1445_v6 }
 0x2eb PF: > { %s14_s15 = sadd.s32 1, %s1742_s15  }
 0x2ec   : > { %p11_p4 = scmp.ge.s32.totalorder %s14_s15, 4  }
 0x2ee   :  { %13 = sbr.rel (!%p11_p4) target bundleno = 1 (0x1), region = 66 }

// kernel: basic_block_forward.8
= control target key start
LH: loop header
LB: loop body
LE: loop exit
PB: predicated region body
PF: predicated region fallthrough
CT: control target
= control target key end

     0   :  { %s3982_s9 = smov 0   ;;  %s4598_s0 = inlined_call_operand.vmem [shape: f32[2,18,18,16], index: 0, kind: input, shape index: {}]   ;;  %s4599_s1 = inlined_call_operand.vmem [shape: bf16[9,16,16], index: 1, kind: input, shape index: {}]   ;;  %s4600_s2 = inlined_call_operand.vmem [shape: f32[2,16,16,16], index: 2, kind: output, shape index: {}]  }
   0x1 LB: > { %s2852_s10 = sadd.s32 4294967295, %s3965_s9   ;;  %p2856_p0 = scmp.ge.s32.totalorder %s3965_s9, 1  ;;  %s3965_s9 = sphi %s3982_s9, %s12_s9  }
   0x2   : > { %p112_p1 = scmp.lt.s32.totalorder %s3965_s9, 3 }
   0x4   : > { %p113_p2 = pnand %p2856_p0, %p112_p1 }
   0x5   : > { %v3950_v0 = vld [vmem:[%s4599_s1 + $0x8] sm:$0xff] (!%p113_p2)   ;;  %p134_p3 = scmp.lt.s32.totalorder (!%p113_p2), %s2852_s10, 1  ;;  %v3996_v1 = vld [vmem:[%s4599_s1 + $0x20] sm:$0xff] (!%p113_p2)   ;;  %vm252_vm0 = vcmask (!%p113_p2), 130048   ;;  %v3954_v16 = vld [vmem:[%s4599_s1 + $0x30] sm:$0xff] (!%p113_p2)  }
   0x6   : > { %116 = sbr.rel (%p113_p2) target bundleno = 520 (0x208), region = 28  ;;  %3377 = vmatprep.subr.bf16.mxu1 (!%p113_p2), %v3950_v0  ;;  %v3952_v2 = vld [vmem:[%s4599_s1] sm:$0xff] (!%p113_p2)   ;;  %3513 = vmatprep.subr.bf16.mxu0 (!%p113_p2), %v3996_v1  ;;  %v3953_v3 = vld [vmem:[%s4599_s1 + $0x28] sm:$0xff] (!%p113_p2)   ;;  %v4035_v17 = vld [vmem:[%s4599_s1 + $0x10] sm:$0xff] (!%p113_p2)  }
   0x7   : > { %3378 = vmatpush3.bf16.msra.mxu1 (!%p113_p2), %v3950_v0  ;;  %3514 = vmatpush3.bf16.msra.mxu0 (!%p113_p2), %v3996_v1  ;;  %v4111_v48 = vld [vmem:[%s4599_s1 + $0x38] sm:$0xff] (!%p113_p2)  }
   0x8   : > { %3411 = vmatprep.subr.bf16.mxu1 (!%p113_p2), %v3952_v2  ;;  %3547 = vmatprep.subr.bf16.mxu0 (!%p113_p2), %v3953_v3 }
   0xd   : > { %s4602_s10 = smov (!%p134_p3, %s2852_s10), 1 }
   0xe   : > { %s3941_s19 = smul.u32 432, %s4602_s10  ;;  %s3223_s5 = sshll.u32 %s4602_s10, 8 }
   0xf   : > { %s4529_s8 = scalar_lea.vmem %s4600_s2, %s3223_s5 }
  0x10   : > { %s4012_s22 = scalar_lea.vmem %s4598_s0, %s3941_s19 }
  0x11   : > { %v195_v4 = vld [vmem:[%s4012_s22 + $0x1] sm:$0xff]  ;;  %v196_v5 = vld [vmem:[%s4012_s22 + $0x9] sm:$0xff]  ;;  %v2966_v6 = vld [vmem:[%s4012_s22 + $0x19] sm:$0xff] }
  0x12   : > { %v227_v7 = vpack.c.bf16 %v196_v5, %v195_v4  ;;  %v2967_v8 = vld [vmem:[%s4012_s22 + $0x21] sm:$0xff]  ;;  %v2968_v9 = vld [vmem:[%s4012_s22 + $0x31] sm:$0xff]  ;;  %v2969_v10 = vld [vmem:[%s4012_s22 + $0x39] sm:$0xff] }
  0x13   : > { %v1306_v11 = vpack.c.bf16 %v2967_v8, %v2966_v6  ;;  %v4020_v12 = vpack.c.bf16 %v2969_v10, %v2968_v9  ;;  %v2970_v13 = vld [vmem:[%s4012_s22 + $0x49] sm:$0xff]  ;;  %v2971_v14 = vld [vmem:[%s4012_s22 + $0x51] sm:$0xff]  ;;  %v2972_v18 = vld [vmem:[%s4012_s22 + $0x61] sm:$0xff] }
  0x14   : > { %3379 = vmatprep.mubr.msk.bf16.mxu1 %vm252_vm0, %v227_v7  ;;  %v4025_v15 = vpack.c.bf16 %v2971_v14, %v2970_v13  ;;  %v2973_v19 = vld [vmem:[%s4012_s22 + $0x69] sm:$0xff]  ;;  %v2974_v20 = vld [vmem:[%s4012_s22 + $0x79] sm:$0xff]  ;;  %v2975_v21 = vld [vmem:[%s4012_s22 + $0x81] sm:$0xff] }
  0x15   : > { %3515 = vmatprep.mubr.msk.bf16.mxu0 %vm252_vm0, %v1306_v11  ;;  %3380 = vmatmul.mubr.msk.bf16.vlgmr.msra.gmra.mrb[0].mxu1 %vm252_vm0, %v1306_v11  ;;  %v4048_v22 = vpack.c.bf16 %v2973_v19, %v2972_v18  ;;  %v4050_v23 = vpack.c.bf16 %v2975_v21, %v2974_v20  ;;  %v2976_v24 = vld [vmem:[%s4012_s22 + $0x91] sm:$0xff]  ;;  %v2977_v25 = vld [vmem:[%s4012_s22 + $0x99] sm:$0xff]  ;;  %v2978_v26 = vld [vmem:[%s4012_s22 + $0xa9] sm:$0xff] }
  0x16   : > { %3412 = vmatpush3.bf16.msra.mxu1 %v3952_v2  ;;  %3516 = vmatmul.mubr.msk.bf16.vlgmr.msra.gmra.mrb[0].mxu0 %vm252_vm0, %v4020_v12  ;;  %v2979_v27 = vld [vmem:[%s4012_s22 + $0xb1] sm:$0xff]  ;;  %v4064_v28 = vpack.c.bf16 %v2977_v25, %v2976_v24  ;;  %v2980_v30 = vld [vmem:[%s4012_s22 + $0xc1] sm:$0xff]  ;;  %v2981_v31 = vld [vmem:[%s4012_s22 + $0xc9] sm:$0xff] }
  0x17   : > { %3548 = vmatpush3.bf16.msra.mxu0 %v3953_v3  ;;  %3383 = vmatprep.mubr.msk.bf16.mxu1 %vm252_vm0, %v4020_v12  ;;  %v4066_v29 = vpack.c.bf16 %v2979_v27, %v2978_v26  ;;  %v3017_v32 = vld [vmem:[%s4012_s22 + $0x1a] sm:$0xff]  ;;  %v3018_v33 = vld [vmem:[%s4012_s22 + $0x22] sm:$0xff]  ;;  %v4080_v34 = vpack.c.bf16 %v2981_v31, %v2980_v30  ;;  %v3019_v38 = vld [vmem:[%s4012_s22 + $0x32] sm:$0xff] }
  0x18   : > { %3519 = vmatprep.mubr.msk.bf16.mxu0 %vm252_vm0, %v4025_v15  ;;  %3581 = vmatprep.subr.bf16.mxu0 %v3954_v16  ;;  %v4082_v35 = vpack.c.bf16 %v3018_v33, %v3017_v32  ;;  %v213_v36 = vld [vmem:[%s4012_s22 + $0xd9] sm:$0xff]  ;;  %v214_v37 = vld [vmem:[%s4012_s22 + $0xe1] sm:$0xff]  ;;  %v215_v40 = vld [vmem:[%s4012_s22 + $0xf1] sm:$0xff] }
  0x19   : > { %3445 = vmatprep.subr.bf16.mxu1 %v4035_v17  ;;  %v3020_v39 = vld [vmem:[%s4012_s22 + $0x3a] sm:$0xff]  ;;  %v3021_v42 = vld [vmem:[%s4012_s22 + $0x4a] sm:$0xff]  ;;  %v3022_v43 = vld [vmem:[%s4012_s22 + $0x52] sm:$0xff]  ;;  %v4100_v44 = vpack.c.bf16 %v214_v37, %v213_v36 }
  0x1a   : > { %v216_v41 = vld [vmem:[%s4012_s22 + $0xf9] sm:$0xff]  ;;  %v4102_v45 = vpack.c.bf16 %v3020_v39, %v3019_v38  ;;  %v4106_v47 = vpack.c.bf16 %v3022_v43, %v3021_v42  ;;  %v217_v49 = vld [vmem:[%s4012_s22 + $0x109] sm:$0xff]  ;;  %v218_v50 = vld [vmem:[%s4012_s22 + $0x111] sm:$0xff] }
  0x1b   : > { %v4104_v46 = vpack.c.bf16 %v216_v41, %v215_v40  ;;  %v3023_v51 = vld [vmem:[%s4012_s22 + $0x62] sm:$0xff]  ;;  %v3024_v52 = vld [vmem:[%s4012_s22 + $0x6a] sm:$0xff]  ;;  %v3025_v55 = vld [vmem:[%s4012_s22 + $0x7a] sm:$0xff]  ;;  %v4130_v57 = vpack.c.bf16 %v218_v50, %v217_v49 }
  0x1c   : > { %v219_v53 = vld [vmem:[%s4012_s22 + $0x121] sm:$0xff]  ;;  %v220_v54 = vld [vmem:[%s4012_s22 + $0x129] sm:$0xff]  ;;  %v4132_v58 = vpack.c.bf16 %v3024_v52, %v3023_v51  ;;  %v221_v61 = vld [vmem:[%s4012_s22 + $0x139] sm:$0xff] }
  0x1d   : > { %3384 = vmatmul.mubr.msk.bf16.gmra.mrb[4].mxu1 %vm252_vm0, %v4025_v15  ;;  %v3026_v56 = vld [vmem:[%s4012_s22 + $0x82] sm:$0xff]  ;;  %v4134_v59 = vpack.c.bf16 %v220_v54, %v219_v53  ;;  %v3027_v63 = vld [vmem:[%s4012_s22 + $0x92] sm:$0xff]  ;;  %v3028_v0 = vld [vmem:[%s4012_s22 + $0x9a] sm:$0xff] }
  0x1e   : > { %3520 = vmatmul.mubr.msk.bf16.gmra.mrb[4].mxu0 %vm252_vm0, %v4048_v22  ;;  %3387 = vmatprep.mubr.msk.bf16.mxu1 %vm252_vm0, %v4048_v22  ;;  %v4136_v60 = vpack.c.bf16 %v3026_v56, %v3025_v55  ;;  %v222_v62 = vld [vmem:[%s4012_s22 + $0x141] sm:$0xff]  ;;  %v223_v2 = vld [vmem:[%s4012_s22 + $0x151] sm:$0xff]  ;;  %v224_v3 = vld [vmem:[%s4012_s22 + $0x159] sm:$0xff]  ;;  %v4156_v7 = vpack.c.bf16 %v3028_v0, %v3027_v63 }
  0x1f   : > { %3523 = vmatprep.mubr.msk.bf16.mxu0 %vm252_vm0, %v4050_v23  ;;  %v3029_v4 = vld [vmem:[%s4012_s22 + $0xaa] sm:$0xff]  ;;  %v3030_v5 = vld [vmem:[%s4012_s22 + $0xb2] sm:$0xff]  ;;  %v4154_v6 = vpack.c.bf16 %v222_v62, %v221_v61  ;;  %v4158_v8 = vpack.c.bf16 %v224_v3, %v223_v2  ;;  %v3031_v13 = vld [vmem:[%s4012_s22 + $0xc2] sm:$0xff] }
  0x20   : > { %v4160_v9 = vpack.c.bf16 %v3030_v5, %v3029_v4  ;;  %v225_v10 = vld [vmem:[%s4012_s22 + $0x169] sm:$0xff]  ;;  %v226_v11 = vld [vmem:[%s4012_s22 + $0x171] sm:$0xff]  ;;  %v3033_v19 = vld [vmem:[%s4012_s22 + $0xda] sm:$0xff] }
  0x21   : > { %v3032_v14 = vld [vmem:[%s4012_s22 + $0xca] sm:$0xff]  ;;  %v3034_v20 = vld [vmem:[%s4012_s22 + $0xe2] sm:$0xff]  ;;  %v4178_v21 = vpack.c.bf16 %v226_v11, %v225_v10  ;;  %v147_v27 = vld [vmem:[%s4012_s22 + $0x18] sm:$0xff] }
  0x22   : > { %v146_v18 = vld [vmem:[%s4012_s22 + $0x8] sm:$0xff]  ;;  %v4180_v24 = vpack.c.bf16 %v3032_v14, %v3031_v13  ;;  %v4182_v26 = vpack.c.bf16 %v3034_v20, %v3033_v19  ;;  %v148_v30 = vld [vmem:[%s4012_s22 + $0x20] sm:$0xff]  ;;  %v3035_v31 = vld [vmem:[%s4012_s22 + $0xf2] sm:$0xff] }
  0x23   : > { %v3036_v32 = vld [vmem:[%s4012_s22 + $0xfa] sm:$0xff]  ;;  %v149_v33 = vld [vmem:[%s4012_s22 + $0x30] sm:$0xff]  ;;  %v4199_v39 = vpack.c.bf16 %v148_v30, %v147_v27  ;;  %v151_v49 = vld [vmem:[%s4012_s22 + $0x48] sm:$0xff] }
  0x24   : > { %v150_v36 = vld [vmem:[%s4012_s22 + $0x38] sm:$0xff]  ;;  %v3037_v37 = vld [vmem:[%s4012_s22 + $0x10a] sm:$0xff]  ;;  %v4201_v40 = vpack.c.bf16 %v3036_v32, %v3035_v31  ;;  %v3039_v51 = vld [vmem:[%s4012_s22 + $0x122] sm:$0xff] }
  0x25   : > { %3388 = vmatmul.mubr.msk.bf16.gmra.mrb[8].mxu1 %vm252_vm0, %v4050_v23  ;;  %v3038_v38 = vld [vmem:[%s4012_s22 + $0x112] sm:$0xff]  ;;  %v4203_v41 = vpack.c.bf16 %v150_v36, %v149_v33  ;;  %v3040_v52 = vld [vmem:[%s4012_s22 + $0x12a] sm:$0xff]  ;;  %v153_v53 = vld [vmem:[%s4012_s22 + $0x60] sm:$0xff] }
  0x26   : > { %3524 = vmatmul.mubr.msk.bf16.gmra.mrb[8].mxu0 %vm252_vm0, %v4064_v28  ;;  %3391 = vmatprep.mubr.msk.bf16.mxu1 %vm252_vm0, %v4064_v28  ;;  %v4205_v42 = vpack.c.bf16 %v3038_v38, %v3037_v37  ;;  %v4210_v43 = vld [vmem:[%s4599_s1 + $0x18] sm:$0xff]   ;;  %v152_v50 = vld [vmem:[%s4012_s22 + $0x50] sm:$0xff]  ;;  %v154_v54 = vld [vmem:[%s4012_s22 + $0x68] sm:$0xff]  ;;  %v4232_v61 = vpack.c.bf16 %v3040_v52, %v3039_v51 }
  0x27   : > { %3527 = vmatprep.mubr.msk.bf16.mxu0 %vm252_vm0, %v4066_v29  ;;  %v3042_v55 = vld [vmem:[%s4012_s22 + $0x142] sm:$0xff]  ;;  %v4230_v56 = vpack.c.bf16 %v152_v50, %v151_v49  ;;  %v4234_v62 = vpack.c.bf16 %v154_v54, %v153_v53  ;;  %v155_v0 = vld [vmem:[%s4012_s22 + $0x78] sm:$0xff]  ;;  %v157_v5 = vld [vmem:[%s4012_s22 + $0x90] sm:$0xff] }
  0x28   : > { %v156_v2 = vld [vmem:[%s4012_s22 + $0x80] sm:$0xff]  ;;  %v3043_v3 = vld [vmem:[%s4012_s22 + $0x152] sm:$0xff]  ;;  %v3045_v11 = vld [vmem:[%s4012_s22 + $0x16a] sm:$0xff] }
  0x29   : > { %v3044_v4 = vld [vmem:[%s4012_s22 + $0x15a] sm:$0xff]  ;;  %v3046_v13 = vld [vmem:[%s4012_s22 + $0x172] sm:$0xff]  ;;  %v4254_v14 = vpack.c.bf16 %v156_v2, %v155_v0  ;;  %v159_v20 = vld [vmem:[%s4012_s22 + $0xa8] sm:$0xff] }
  0x2a   : > { %v158_v10 = vld [vmem:[%s4012_s22 + $0x98] sm:$0xff]  ;;  %v4260_v19 = vpack.c.bf16 %v3046_v13, %v3045_v11  ;;  %v3047_v27 = vld [vmem:[%s4012_s22 + $0x182] sm:$0xff]  ;;  %v3048_v30 = vld [vmem:[%s4012_s22 + $0x18a] sm:$0xff] }
  0x2b   : > { %v161_v31 = vld [vmem:[%s4012_s22 + $0xc0] sm:$0xff]  ;;  %v162_v32 = vld [vmem:[%s4012_s22 + $0xc8] sm:$0xff]  ;;  %v4278_v36 = vpack.c.bf16 %v3048_v30, %v3047_v27  ;;  %v163_v38 = vld [vmem:[%s4012_s22 + $0xd8] sm:$0xff] }
  0x2c   : > { %v4280_v37 = vpack.c.bf16 %v162_v32, %v161_v31  ;;  %v164_v49 = vld [vmem:[%s4012_s22 + $0xe0] sm:$0xff]  ;;  %v165_v50 = vld [vmem:[%s4012_s22 + $0xf0] sm:$0xff]  ;;  %v166_v51 = vld [vmem:[%s4012_s22 + $0xf8] sm:$0xff] }
  0x2d   : > { %3392 = vmatmul.mubr.msk.bf16.gmra.mrb[12].mxu1 %vm252_vm0, %v4066_v29  ;;  %v4294_v52 = vpack.c.bf16 %v164_v49, %v163_v38  ;;  %v4296_v53 = vpack.c.bf16 %v166_v51, %v165_v50  ;;  %v4301_v54 = vld [vmem:[%s4599_s1 + $0x40] sm:$0xff]   ;;  %v170_v2 = vld [vmem:[%s4012_s22 + $0x128] sm:$0xff]  ;;  %v174_v11 = vld [vmem:[%s4012_s22 + $0x158] sm:$0xff] }
  0x2e   : > { %3528 = vmatmul.mubr.msk.bf16.gmra.mrb[12].mxu0 %vm252_vm0, %v4080_v34  ;;  %3395 = vmatprep.mubr.msk.bf16.mxu1 %vm252_vm0, %v4080_v34  ;;  %v169_v0 = vld [vmem:[%s4012_s22 + $0x120] sm:$0xff]  ;;  %v176_v27 = vld [vmem:[%s4012_s22 + $0x170] sm:$0xff]  ;;  %v3098_v50 = vld [vmem:[%s4012_s22 + $0x198] sm:$0xff] }
  0x2f   : > { %3549 = vmatprep.mubr.msk.bf16.mxu0 %vm252_vm0, %v4082_v35  ;;  %v677_v30 = vld [vmem:[%s4012_s22 + $0x2] sm:$0xff]  ;;  %v678_v31 = vld [vmem:[%s4012_s22 + $0xa] sm:$0xff] }
  0x30   : > { %v709_v38 = vpack.c.bf16 %v678_v31, %v677_v30  ;;  %v3099_v51 = vld [vmem:[%s4012_s22 + $0x1a0] sm:$0xff] }
  0x35   : > { %3396 = vmatmul.mubr.msk.bf16.gmra.mrb[16].mxu1 %vm252_vm0, %v4100_v44 }
  0x36   : > { %3550 = vmatmul.mubr.msk.bf16.vlgmr.msra.gmra.mrb[0].mxu0 %vm252_vm0, %v4102_v45  ;;  %3399 = vmatprep.mubr.msk.bf16.mxu1 %vm252_vm0, %v4104_v46 }
  0x37   : > { %3582 = vmatpush3.bf16.msra.mxu0 %v3954_v16  ;;  %3553 = vmatprep.mubr.msk.bf16.mxu0 %vm252_vm0, %v4106_v47  ;;  %v145_v16 = vld [vmem:[%s4012_s22] sm:$0xff] }
  0x38   : > { %3615 = vmatprep.subr.bf16.mxu0 %v4111_v48  ;;  %v177_v25 = vpack.c.bf16 %v146_v18, %v145_v16  ;;  %v4256_v16 = vpack.c.bf16 %v3044_v4, %v3043_v3  ;;  %v4258_v18 = vpack.c.bf16 %v158_v10, %v157_v5  ;;  %v4319_v4 = vpack.c.bf16 %v170_v2, %v169_v0  ;;  %v172_v5 = vld [vmem:[%s4012_s22 + $0x140] sm:$0xff]  ;;  %v173_v10 = vld [vmem:[%s4012_s22 + $0x150] sm:$0xff] }
  0x3d   : > { %3400 = vmatmul.mubr.msk.bf16.gmra.mrb[20].mxu1 %vm252_vm0, %v4130_v57 }
  0x3e   : > { %3554 = vmatmul.mubr.msk.bf16.gmra.mrb[4].mxu0 %vm252_vm0, %v4132_v58  ;;  %3403 = vmatprep.mubr.msk.bf16.mxu1 %vm252_vm0, %v4134_v59 }
  0x3f   : > { %3557 = vmatprep.mubr.msk.bf16.mxu0 %vm252_vm0, %v4136_v60 }
  0x45   : > { %3404 = vmatmul.mubr.msk.bf16.gmra.mrb[24].mxu1 %vm252_vm0, %v4154_v6 }
  0x46   : > { %3558 = vmatmul.mubr.msk.bf16.gmra.mrb[8].mxu0 %vm252_vm0, %v4156_v7  ;;  %3407 = vmatprep.mubr.msk.bf16.mxu1 %vm252_vm0, %v4158_v8 }
  0x47   : > { %3561 = vmatprep.mubr.msk.bf16.mxu0 %vm252_vm0, %v4160_v9 }
  0x4d   : > { %3408 = vmatmul.mubr.msk.bf16.gmra.mrb[28].mxu1 %vm252_vm0, %v4178_v21 }
  0x4e   : > { %3562 = vmatmul.mubr.msk.bf16.gmra.mrb[12].mxu0 %vm252_vm0, %v4180_v24  ;;  %3413 = vmatprep.mubr.msk.bf16.mxu1 %vm252_vm0, %v177_v25  ;;  %v160_v25 = vld [vmem:[%s4012_s22 + $0xb0] sm:$0xff] }
  0x4f   : > { %3565 = vmatprep.mubr.msk.bf16.mxu0 %vm252_vm0, %v4182_v26  ;;  %v4276_v33 = vpack.c.bf16 %v160_v25, %v159_v20  ;;  %v4335_v20 = vpack.c.bf16 %v174_v11, %v173_v10  ;;  %v175_v25 = vld [vmem:[%s4012_s22 + $0x168] sm:$0xff] }
  0x50   : > { %v4349_v32 = vpack.c.bf16 %v176_v27, %v175_v25 }
  0x55   : > { %3414 = vmatmul.mubr.msk.bf16.vlgmr.msra.gmra.mrb[0].mxu1 %vm252_vm0, %v4199_v39 }
  0x56   : > { %3446 = vmatpush3.bf16.msra.mxu1 %v4035_v17  ;;  %3566 = vmatmul.mubr.msk.bf16.gmra.mrb[16].mxu0 %vm252_vm0, %v4201_v40  ;;  %v3041_v17 = vld [vmem:[%s4012_s22 + $0x13a] sm:$0xff] }
  0x57   : > { %3417 = vmatprep.mubr.msk.bf16.mxu1 %vm252_vm0, %v4203_v41  ;;  %3569 = vmatprep.mubr.msk.bf16.mxu0 %vm252_vm0, %v4205_v42  ;;  %v4236_v63 = vpack.c.bf16 %v3042_v55, %v3041_v17  ;;  %v167_v17 = vld [vmem:[%s4012_s22 + $0x108] sm:$0xff]  ;;  %v168_v55 = vld [vmem:[%s4012_s22 + $0x110] sm:$0xff] }
  0x58   : > { %3479 = vmatprep.subr.bf16.mxu1 %v4210_v43  ;;  %v4317_v3 = vpack.c.bf16 %v168_v55, %v167_v17  ;;  %v1918_v17 = vpack.c.bf16 %v3099_v51, %v3098_v50 }
  0x5d   : > { %3418 = vmatmul.mubr.msk.bf16.gmra.mrb[4].mxu1 %vm252_vm0, %v4230_v56 }
  0x5e   : > { %3570 = vmatmul.mubr.msk.bf16.gmra.mrb[20].mxu0 %vm252_vm0, %v4232_v61  ;;  %3421 = vmatprep.mubr.msk.bf16.mxu1 %vm252_vm0, %v4234_v62 }
  0x5f   : > { %3573 = vmatprep.mubr.msk.bf16.mxu0 %vm252_vm0, %v4236_v63 }
  0x65   : > { %3422 = vmatmul.mubr.msk.bf16.gmra.mrb[8].mxu1 %vm252_vm0, %v4254_v14 }
  0x66   : > { %3574 = vmatmul.mubr.msk.bf16.gmra.mrb[24].mxu0 %vm252_vm0, %v4256_v16  ;;  %3425 = vmatprep.mubr.msk.bf16.mxu1 %vm252_vm0, %v4258_v18 }
  0x67   : > { %3577 = vmatprep.mubr.msk.bf16.mxu0 %vm252_vm0, %v4260_v19 }
  0x6d   : > { %3426 = vmatmul.mubr.msk.bf16.gmra.mrb[12].mxu1 %vm252_vm0, %v4276_v33 }
  0x6e   : > { %3578 = vmatmul.mubr.msk.bf16.gmra.mrb[28].mxu0 %vm252_vm0, %v4278_v36  ;;  %3429 = vmatprep.mubr.msk.bf16.mxu1 %vm252_vm0, %v4280_v37 }
  0x6f   : > { %3583 = vmatprep.mubr.msk.bf16.mxu0 %vm252_vm0, %v4203_v41 }
  0x75   : > { %3430 = vmatmul.mubr.msk.bf16.gmra.mrb[16].mxu1 %vm252_vm0, %v4294_v52 }
  0x76   : > { %3584 = vmatmul.mubr.msk.bf16.vlgmr.msra.gmra.mrb[0].mxu0 %vm252_vm0, %v4230_v56  ;;  %3433 = vmatprep.mubr.msk.bf16.mxu1 %vm252_vm0, %v4296_v53 }
  0x77   : > { %3616 = vmatpush3.bf16.msra.mxu0 %v4111_v48  ;;  %3587 = vmatprep.mubr.msk.bf16.mxu0 %vm252_vm0, %v4234_v62  ;;  %v171_v48 = vld [vmem:[%s4012_s22 + $0x138] sm:$0xff] }
  0x78   : > { %3649 = vmatprep.subr.bf16.mxu0 %v4301_v54  ;;  %v4333_v13 = vpack.c.bf16 %v172_v5, %v171_v48 }
  0x7d   : > { %3434 = vmatmul.mubr.msk.bf16.gmra.mrb[20].mxu1 %vm252_vm0, %v4317_v3 }
  0x7e   : > { %3588 = vmatmul.mubr.msk.bf16.gmra.mrb[4].mxu0 %vm252_vm0, %v4254_v14  ;;  %3437 = vmatprep.mubr.msk.bf16.mxu1 %vm252_vm0, %v4319_v4 }
  0x7f   : > { %3591 = vmatprep.mubr.msk.bf16.mxu0 %vm252_vm0, %v4258_v18 }
  0x85   : > { %3438 = vmatmul.mubr.msk.bf16.gmra.mrb[24].mxu1 %vm252_vm0, %v4333_v13 }
  0x86   : > { %3592 = vmatmul.mubr.msk.bf16.gmra.mrb[8].mxu0 %vm252_vm0, %v4276_v33  ;;  %3441 = vmatprep.mubr.msk.bf16.mxu1 %vm252_vm0, %v4335_v20 }
  0x87   : > { %3595 = vmatprep.mubr.msk.bf16.mxu0 %vm252_vm0, %v4280_v37 }
  0x8d   : > { %3442 = vmatmul.mubr.msk.bf16.gmra.mrb[28].mxu1 %vm252_vm0, %v4349_v32 }
  0x8e   : > { %3596 = vmatmul.mubr.msk.bf16.gmra.mrb[12].mxu0 %vm252_vm0, %v4294_v52  ;;  %3447 = vmatprep.mubr.msk.bf16.mxu1 %vm252_vm0, %v709_v38 }
  0x8f   : > { %3599 = vmatprep.mubr.msk.bf16.mxu0 %vm252_vm0, %v4296_v53 }
  0x95   : > { %3448 = vmatmul.mubr.msk.bf16.vlgmr.msra.gmra.mrb[0].mxu1 %vm252_vm0, %v4082_v35  ;;  %v3096_v35 = vld [vmem:[%s4012_s22 + $0x180] sm:$0xff] }
  0x96   : > { %3480 = vmatpush3.bf16.msra.mxu1 %v4210_v43  ;;  %3600 = vmatmul.mubr.msk.bf16.gmra.mrb[16].mxu0 %vm252_vm0, %v4317_v3  ;;  %v3097_v43 = vld [vmem:[%s4012_s22 + $0x188] sm:$0xff] }
  0x97   : > { %3451 = vmatprep.mubr.msk.bf16.mxu1 %vm252_vm0, %v4102_v45  ;;  %3603 = vmatprep.mubr.msk.bf16.mxu0 %vm252_vm0, %v4319_v4  ;;  %v4378_v49 = vpack.c.bf16 %v3097_v43, %v3096_v35 }
  0x98   : > { %3683 = vmatprep.subr.bf16.mxu1 %v3996_v1 }
  0x9d   : > { %3452 = vmatmul.mubr.msk.bf16.gmra.mrb[4].mxu1 %vm252_vm0, %v4106_v47 }
  0x9e   : > { %3604 = vmatmul.mubr.msk.bf16.gmra.mrb[20].mxu0 %vm252_vm0, %v4333_v13  ;;  %3455 = vmatprep.mubr.msk.bf16.mxu1 %vm252_vm0, %v4132_v58 }
  0x9f   : > { %3607 = vmatprep.mubr.msk.bf16.mxu0 %vm252_vm0, %v4335_v20 }
  0xa5   : > { %3456 = vmatmul.mubr.msk.bf16.gmra.mrb[8].mxu1 %vm252_vm0, %v4136_v60 }
  0xa6   : > { %3608 = vmatmul.mubr.msk.bf16.gmra.mrb[24].mxu0 %vm252_vm0, %v4349_v32  ;;  %3459 = vmatprep.mubr.msk.bf16.mxu1 %vm252_vm0, %v4156_v7 }
  0xa7   : > { %3611 = vmatprep.mubr.msk.bf16.mxu0 %vm252_vm0, %v4378_v49 }
  0xad   : > { %3460 = vmatmul.mubr.msk.bf16.gmra.mrb[12].mxu1 %vm252_vm0, %v4160_v9 }
  0xae   : > { %3612 = vmatmul.mubr.msk.bf16.gmra.mrb[28].mxu0 %vm252_vm0, %v1918_v17  ;;  %3463 = vmatprep.mubr.msk.bf16.mxu1 %vm252_vm0, %v4180_v24 }
  0xaf   : > { %3617 = vmatprep.mubr.msk.bf16.mxu0 %vm252_vm0, %v4020_v12  ;;  %v3148_v12 = vld [vmem:[%s4012_s22 + $0x189] sm:$0xff] }
  0xb5   : > { %3464 = vmatmul.mubr.msk.bf16.gmra.mrb[16].mxu1 %vm252_vm0, %v4182_v26 }
  0xb6   : > { %3618 = vmatmul.mubr.msk.bf16.vlgmr.msra.gmra.mrb[0].mxu0 %vm252_vm0, %v4025_v15  ;;  %3467 = vmatprep.mubr.msk.bf16.mxu1 %vm252_vm0, %v4201_v40 }
  0xb7   : > { %3650 = vmatpush3.bf16.msra.mxu0 %v4301_v54  ;;  %3621 = vmatprep.mubr.msk.bf16.mxu0 %vm252_vm0, %v4048_v22  ;;  %v3149_v22 = vld [vmem:[%s4012_s22 + $0x199] sm:$0xff] }
  0xbd   : > { %3468 = vmatmul.mubr.msk.bf16.gmra.mrb[20].mxu1 %vm252_vm0, %v4205_v42 }
  0xbe   : > { %3622 = vmatmul.mubr.msk.bf16.gmra.mrb[4].mxu0 %vm252_vm0, %v4050_v23  ;;  %3471 = vmatprep.mubr.msk.bf16.mxu1 %vm252_vm0, %v4232_v61  ;;  %v3150_v23 = vld [vmem:[%s4012_s22 + $0x1a1] sm:$0xff] }
  0xbf   : > { %3625 = vmatprep.mubr.msk.bf16.mxu0 %vm252_vm0, %v4064_v28  ;;  %v2216_v28 = vpack.c.bf16 %v3150_v23, %v3149_v22 }
  0xc5   : > { %3472 = vmatmul.mubr.msk.bf16.gmra.mrb[24].mxu1 %vm252_vm0, %v4236_v63 }
  0xc6   : > { %3626 = vmatmul.mubr.msk.bf16.gmra.mrb[8].mxu0 %vm252_vm0, %v4066_v29  ;;  %3475 = vmatprep.mubr.msk.bf16.mxu1 %vm252_vm0, %v4256_v16  ;;  %v3200_v29 = vld [vmem:[%s4012_s22 + $0x19a] sm:$0xff] }
  0xc7   : > { %3629 = vmatprep.mubr.msk.bf16.mxu0 %vm252_vm0, %v4080_v34  ;;  %v3201_v34 = vld [vmem:[%s4012_s22 + $0x1a2] sm:$0xff] }
  0xcd   : > { %3476 = vmatmul.mubr.msk.bf16.gmra.mrb[28].mxu1 %vm252_vm0, %v4260_v19 }
  0xce   : > { %3630 = vmatmul.mubr.msk.bf16.gmra.mrb[12].mxu0 %vm252_vm0, %v4100_v44  ;;  %3481 = vmatprep.mubr.msk.bf16.mxu1 %vm252_vm0, %v4199_v39 }
  0xcf   : > { %3633 = vmatprep.mubr.msk.bf16.mxu0 %vm252_vm0, %v4104_v46 }
  0xd5   : > { %3482 = vmatmul.mubr.msk.bf16.vlgmr.msra.gmra.mrb[0].mxu1 %vm252_vm0, %v4203_v41 }
  0xd6   : > { %3684 = vmatpush3.bf16.msra.mxu1 %v3996_v1  ;;  %3634 = vmatmul.mubr.msk.bf16.gmra.mrb[16].mxu0 %vm252_vm0, %v4130_v57  ;;  %v3147_v1 = vld [vmem:[%s4012_s22 + $0x181] sm:$0xff] }
  0xd7   : > { %3485 = vmatprep.mubr.msk.bf16.mxu1 %vm252_vm0, %v4230_v56  ;;  %3637 = vmatprep.mubr.msk.bf16.mxu0 %vm252_vm0, %v4134_v59  ;;  %v2215_v15 = vpack.c.bf16 %v3148_v12, %v3147_v1 }
  0xdd   : > { %3486 = vmatmul.mubr.msk.bf16.gmra.mrb[4].mxu1 %vm252_vm0, %v4234_v62 }
  0xde   : > { %3638 = vmatmul.mubr.msk.bf16.gmra.mrb[20].mxu0 %vm252_vm0, %v4154_v6  ;;  %3489 = vmatprep.mubr.msk.bf16.mxu1 %vm252_vm0, %v4254_v14 }
  0xdf   : > { %3641 = vmatprep.mubr.msk.bf16.mxu0 %vm252_vm0, %v4158_v8 }
  0xe5   : > { %3490 = vmatmul.mubr.msk.bf16.gmra.mrb[8].mxu1 %vm252_vm0, %v4258_v18 }
  0xe6   : > { %3642 = vmatmul.mubr.msk.bf16.gmra.mrb[24].mxu0 %vm252_vm0, %v4178_v21  ;;  %3493 = vmatprep.mubr.msk.bf16.mxu1 %vm252_vm0, %v4276_v33 }
  0xe7   : > { %3645 = vmatprep.mubr.msk.bf16.mxu0 %vm252_vm0, %v2215_v15 }
  0xed   : > { %3494 = vmatmul.mubr.msk.bf16.gmra.mrb[12].mxu1 %vm252_vm0, %v4280_v37 }
  0xee   : > { %3646 = vmatmul.mubr.msk.bf16.gmra.mrb[28].mxu0 %vm252_vm0, %v2216_v28  ;;  %3497 = vmatprep.mubr.msk.bf16.mxu1 %vm252_vm0, %v4294_v52 }
  0xef   : > { %3651 = vmatprep.mubr.msk.bf16.mxu0 %vm252_vm0, %v4102_v45 }
  0xf5   : > { %3498 = vmatmul.mubr.msk.bf16.gmra.mrb[16].mxu1 %vm252_vm0, %v4296_v53 }
  0xf6   : > { %3652 = vmatmul.mubr.msk.bf16.vlgmr.msra.gmra.mrb[0].mxu0 %vm252_vm0, %v4106_v47  ;;  %3501 = vmatprep.mubr.msk.bf16.mxu1 %vm252_vm0, %v4317_v3 }
  0xf7   : > { %3655 = vmatprep.mubr.msk.bf16.mxu0 %vm252_vm0, %v4132_v58 }
  0xfd   : > { %3502 = vmatmul.mubr.msk.bf16.gmra.mrb[20].mxu1 %vm252_vm0, %v4319_v4 }
  0xfe   : > { %3656 = vmatmul.mubr.msk.bf16.gmra.mrb[4].mxu0 %vm252_vm0, %v4136_v60  ;;  %3505 = vmatprep.mubr.msk.bf16.mxu1 %vm252_vm0, %v4333_v13 }
  0xff   : > { %3659 = vmatprep.mubr.msk.bf16.mxu0 %vm252_vm0, %v4156_v7 }
 0x105   : > { %3506 = vmatmul.mubr.msk.bf16.gmra.mrb[24].mxu1 %vm252_vm0, %v4335_v20 }
 0x106   : > { %3660 = vmatmul.mubr.msk.bf16.gmra.mrb[8].mxu0 %vm252_vm0, %v4160_v9  ;;  %3509 = vmatprep.mubr.msk.bf16.mxu1 %vm252_vm0, %v4349_v32 }
 0x107   : > { %3663 = vmatprep.mubr.msk.bf16.mxu0 %vm252_vm0, %v4180_v24 }
 0x10d   : > { %3510 = vmatmul.mubr.msk.bf16.gmra.mrb[28].mxu1 %vm252_vm0, %v4378_v49 }
 0x10e   : > { %3664 = vmatmul.mubr.msk.bf16.gmra.mrb[12].mxu0 %vm252_vm0, %v4182_v26  ;;  %3531 = vmatprep.mubr.msk.bf16.mxu1 %vm252_vm0, %v4100_v44  ;;  %v2514_v44 = vpack.c.bf16 %v3201_v34, %v3200_v29 }
 0x10f   : > { %3667 = vmatprep.mubr.msk.bf16.mxu0 %vm252_vm0, %v4201_v40 }
 0x115   : > { %3532 = vmatmul.mubr.msk.bf16.vlgmr.msra.gmra.mrb[16].mxu1 %vm252_vm0, %v4104_v46 }
 0x116   : > { %3668 = vmatmul.mubr.msk.bf16.gmra.mrb[16].mxu0 %vm252_vm0, %v4205_v42  ;;  %3535 = vmatprep.mubr.msk.bf16.mxu1 %vm252_vm0, %v4130_v57 }
 0x117   : > { %3671 = vmatprep.mubr.msk.bf16.mxu0 %vm252_vm0, %v4232_v61 }
 0x11d   : > { %3536 = vmatmul.mubr.msk.bf16.gmra.mrb[20].mxu1 %vm252_vm0, %v4134_v59 }
 0x11e   : > { %3672 = vmatmul.mubr.msk.bf16.gmra.mrb[20].mxu0 %vm252_vm0, %v4236_v63  ;;  %3539 = vmatprep.mubr.msk.bf16.mxu1 %vm252_vm0, %v4154_v6 }
 0x11f   : > { %3675 = vmatprep.mubr.msk.bf16.mxu0 %vm252_vm0, %v4256_v16 }
 0x125   : > { %3540 = vmatmul.mubr.msk.bf16.gmra.mrb[24].mxu1 %vm252_vm0, %v4158_v8 }
 0x126   : > { %3676 = vmatmul.mubr.msk.bf16.gmra.mrb[24].mxu0 %vm252_vm0, %v4260_v19  ;;  %3543 = vmatprep.mubr.msk.bf16.mxu1 %vm252_vm0, %v4178_v21 }
 0x127   : > { %3679 = vmatprep.mubr.msk.bf16.mxu0 %vm252_vm0, %v4278_v36 }
 0x12d   : > { %3544 = vmatmul.mubr.msk.bf16.gmra.mrb[28].mxu1 %vm252_vm0, %v2215_v15 }
 0x12e   : > { %3680 = vmatmul.mubr.msk.bf16.gmra.mrb[28].mxu0 %vm252_vm0, %v2514_v44 }
 0x1a8   : > { %v3483_v45 = vpop.f32.mrb[0].mxu1 }
 0x1a9   : > { %v1115_v46 = vpop.f32.mrb[1].mxu1 }
 0x1aa   : > { %v3484_v47 = vpop.f32.mrb[2].mxu1 }
 0x1ab   : > { %v1118_v57 = vpop.f32.mrb[3].mxu1 }
 0x1b0   : > { %v3487_v58 = vpop.f32.mrb[4].mxu1 }
 0x1b1   : > { %v1131_v59 = vpop.f32.mrb[5].mxu1 }
 0x1b2   : > { %v3488_v60 = vpop.f32.mrb[6].mxu1 }
 0x1b3   : > { %v1134_v6 = vpop.f32.mrb[7].mxu1 }
 0x1b8   : > { %v3491_v7 = vpop.f32.mrb[8].mxu1 }
 0x1b9   : > { %v1147_v8 = vpop.f32.mrb[9].mxu1 }
 0x1ba   : > { %v3492_v9 = vpop.f32.mrb[10].mxu1 }
 0x1bb   : > { %v1150_v21 = vpop.f32.mrb[11].mxu1 }
 0x1c0   : > { %v3495_v24 = vpop.f32.mrb[12].mxu1 }
 0x1c1   : > { %v1163_v26 = vpop.f32.mrb[13].mxu1 }
 0x1c2   : > { %v3496_v39 = vpop.f32.mrb[14].mxu1 }
 0x1c3   : > { %v1166_v40 = vpop.f32.mrb[15].mxu1 }
 0x1c9   : > { %v3653_v41 = vpop.f32.mrb[0].mxu0 }
 0x1ca   : > { %v3685_v42 = vadd.f32 %v3653_v41, %v3483_v45  ;;  %v2606_v56 = vpop.f32.mrb[1].mxu0 }
 0x1cb   : > { %v3686_v61 = vadd.f32 %v2606_v56, %v1115_v46  ;;  %v3654_v62 = vpop.f32.mrb[2].mxu0 }
 0x1cc   : > { %2767 = vst.msk [vmem:[%s4529_s8 + $0x10] sm:$0xff] %vm252_vm0, %v3685_v42  ;;  %v3687_v63 = vadd.f32 %v3654_v62, %v3484_v47  ;;  %v2609_v14 = vpop.f32.mrb[3].mxu0 }
 0x1cd   : > { %2765 = vst.msk [vmem:[%s4529_s8] sm:$0xff] %vm252_vm0, %v3686_v61  ;;  %v3688_v16 = vadd.f32 %v2609_v14, %v1118_v57 }
 0x1ce   : > { %2768 = vst.msk [vmem:[%s4529_s8 + $0x18] sm:$0xff] %vm252_vm0, %v3687_v63 }
 0x1cf   : > { %2766 = vst.msk [vmem:[%s4529_s8 + $0x8] sm:$0xff] %vm252_vm0, %v3688_v16 }
 0x1d1   : > { %v3657_v18 = vpop.f32.mrb[4].mxu0 }
 0x1d2   : > { %v3689_v19 = vadd.f32 %v3657_v18, %v3487_v58  ;;  %v2622_v33 = vpop.f32.mrb[5].mxu0 }
 0x1d3   : > { %v3690_v36 = vadd.f32 %v2622_v33, %v1131_v59  ;;  %v3658_v37 = vpop.f32.mrb[6].mxu0 }
 0x1d4   : > { %2771 = vst.msk [vmem:[%s4529_s8 + $0x30] sm:$0xff] %vm252_vm0, %v3689_v19  ;;  %v3691_v52 = vadd.f32 %v3658_v37, %v3488_v60  ;;  %v2625_v53 = vpop.f32.mrb[7].mxu0 }
 0x1d5   : > { %2769 = vst.msk [vmem:[%s4529_s8 + $0x20] sm:$0xff] %vm252_vm0, %v3690_v36  ;;  %v3692_v54 = vadd.f32 %v2625_v53, %v1134_v6 }
 0x1d6   : > { %2772 = vst.msk [vmem:[%s4529_s8 + $0x38] sm:$0xff] %vm252_vm0, %v3691_v52 }
 0x1d7   : > { %2770 = vst.msk [vmem:[%s4529_s8 + $0x28] sm:$0xff] %vm252_vm0, %v3692_v54 }
 0x1d9   : > { %v3661_v55 = vpop.f32.mrb[8].mxu0 }
 0x1da   : > { %v3693_v0 = vadd.f32 %v3661_v55, %v3491_v7  ;;  %v2638_v2 = vpop.f32.mrb[9].mxu0 }
 0x1db   : > { %v3694_v3 = vadd.f32 %v2638_v2, %v1147_v8  ;;  %v3662_v4 = vpop.f32.mrb[10].mxu0 }
 0x1dc   : > { %2775 = vst.msk [vmem:[%s4529_s8 + $0x50] sm:$0xff] %vm252_vm0, %v3693_v0  ;;  %v3695_v48 = vadd.f32 %v3662_v4, %v3492_v9  ;;  %v2641_v5 = vpop.f32.mrb[11].mxu0 }
 0x1dd   : > { %2773 = vst.msk [vmem:[%s4529_s8 + $0x40] sm:$0xff] %vm252_vm0, %v3694_v3  ;;  %v3696_v10 = vadd.f32 %v2641_v5, %v1150_v21 }
 0x1de   : > { %2776 = vst.msk [vmem:[%s4529_s8 + $0x58] sm:$0xff] %vm252_vm0, %v3695_v48 }
 0x1df   : > { %2774 = vst.msk [vmem:[%s4529_s8 + $0x48] sm:$0xff] %vm252_vm0, %v3696_v10 }
 0x1e1   : > { %v3665_v11 = vpop.f32.mrb[12].mxu0 }
 0x1e2   : > { %v3697_v13 = vadd.f32 %v3665_v11, %v3495_v24  ;;  %v2654_v20 = vpop.f32.mrb[13].mxu0 }
 0x1e3   : > { %v3698_v25 = vadd.f32 %v2654_v20, %v1163_v26  ;;  %v3666_v27 = vpop.f32.mrb[14].mxu0 }
 0x1e4   : > { %2779 = vst.msk [vmem:[%s4529_s8 + $0x70] sm:$0xff] %vm252_vm0, %v3697_v13  ;;  %v3699_v30 = vadd.f32 %v3666_v27, %v3496_v39  ;;  %v2657_v31 = vpop.f32.mrb[15].mxu0 }
 0x1e5   : > { %2777 = vst.msk [vmem:[%s4529_s8 + $0x60] sm:$0xff] %vm252_vm0, %v3698_v25  ;;  %v3700_v32 = vadd.f32 %v2657_v31, %v1166_v40 }
 0x1e6   : > { %2780 = vst.msk [vmem:[%s4529_s8 + $0x78] sm:$0xff] %vm252_vm0, %v3699_v30 }
 0x1e7   : > { %2778 = vst.msk [vmem:[%s4529_s8 + $0x68] sm:$0xff] %vm252_vm0, %v3700_v32 }
 0x1e8   : > { %v3533_v38 = vpop.f32.mrb[16].mxu1 }
 0x1e9   : > { %v3669_v35 = vpop.f32.mrb[16].mxu0  ;;  %v1477_v43 = vpop.f32.mrb[17].mxu1 }
 0x1ea   : > { %v3701_v49 = vadd.f32 %v3669_v35, %v3533_v38  ;;  %v2670_v50 = vpop.f32.mrb[17].mxu0  ;;  %v3534_v51 = vpop.f32.mrb[18].mxu1 }
 0x1eb   : > { %v3702_v17 = vadd.f32 %v2670_v50, %v1477_v43  ;;  %v3670_v1 = vpop.f32.mrb[18].mxu0  ;;  %v1480_v12 = vpop.f32.mrb[19].mxu1 }
 0x1ec   : > { %2783 = vst.msk [vmem:[%s4529_s8 + $0x90] sm:$0xff] %vm252_vm0, %v3701_v49  ;;  %v3703_v15 = vadd.f32 %v3670_v1, %v3534_v51  ;;  %v2673_v22 = vpop.f32.mrb[19].mxu0 }
 0x1ed   : > { %2781 = vst.msk [vmem:[%s4529_s8 + $0x80] sm:$0xff] %vm252_vm0, %v3702_v17  ;;  %v3704_v23 = vadd.f32 %v2673_v22, %v1480_v12 }
 0x1ee   : > { %2784 = vst.msk [vmem:[%s4529_s8 + $0x98] sm:$0xff] %vm252_vm0, %v3703_v15 }
 0x1ef   : > { %2782 = vst.msk [vmem:[%s4529_s8 + $0x88] sm:$0xff] %vm252_vm0, %v3704_v23 }
 0x1f0   : > { %v3537_v28 = vpop.f32.mrb[20].mxu1 }
 0x1f1   : > { %v3673_v29 = vpop.f32.mrb[20].mxu0  ;;  %v1493_v34 = vpop.f32.mrb[21].mxu1 }
 0x1f2   : > { %v3705_v44 = vadd.f32 %v3673_v29, %v3537_v28  ;;  %v2686_v45 = vpop.f32.mrb[21].mxu0  ;;  %v3538_v46 = vpop.f32.mrb[22].mxu1 }
 0x1f3   : > { %v3706_v47 = vadd.f32 %v2686_v45, %v1493_v34  ;;  %v3674_v57 = vpop.f32.mrb[22].mxu0  ;;  %v1496_v58 = vpop.f32.mrb[23].mxu1 }
 0x1f4   : > { %2787 = vst.msk [vmem:[%s4529_s8 + $0xb0] sm:$0xff] %vm252_vm0, %v3705_v44  ;;  %v3707_v59 = vadd.f32 %v3674_v57, %v3538_v46  ;;  %v2689_v60 = vpop.f32.mrb[23].mxu0 }
 0x1f5   : > { %2785 = vst.msk [vmem:[%s4529_s8 + $0xa0] sm:$0xff] %vm252_vm0, %v3706_v47  ;;  %v3708_v6 = vadd.f32 %v2689_v60, %v1496_v58 }
 0x1f6   : > { %2788 = vst.msk [vmem:[%s4529_s8 + $0xb8] sm:$0xff] %vm252_vm0, %v3707_v59 }
 0x1f7   : > { %2786 = vst.msk [vmem:[%s4529_s8 + $0xa8] sm:$0xff] %vm252_vm0, %v3708_v6 }
 0x1f8   : > { %v3541_v7 = vpop.f32.mrb[24].mxu1 }
 0x1f9   : > { %v3677_v8 = vpop.f32.mrb[24].mxu0  ;;  %v1509_v9 = vpop.f32.mrb[25].mxu1 }
 0x1fa   : > { %v3709_v21 = vadd.f32 %v3677_v8, %v3541_v7  ;;  %v2702_v24 = vpop.f32.mrb[25].mxu0  ;;  %v3542_v26 = vpop.f32.mrb[26].mxu1 }
 0x1fb   : > { %v3710_v39 = vadd.f32 %v2702_v24, %v1509_v9  ;;  %v3678_v40 = vpop.f32.mrb[26].mxu0  ;;  %v1512_v41 = vpop.f32.mrb[27].mxu1 }
 0x1fc   : > { %2791 = vst.msk [vmem:[%s4529_s8 + $0xd0] sm:$0xff] %vm252_vm0, %v3709_v21  ;;  %v3711_v42 = vadd.f32 %v3678_v40, %v3542_v26  ;;  %v2705_v56 = vpop.f32.mrb[27].mxu0 }
 0x1fd   : > { %2789 = vst.msk [vmem:[%s4529_s8 + $0xc0] sm:$0xff] %vm252_vm0, %v3710_v39  ;;  %v3712_v61 = vadd.f32 %v2705_v56, %v1512_v41 }
 0x1fe   : > { %2792 = vst.msk [vmem:[%s4529_s8 + $0xd8] sm:$0xff] %vm252_vm0, %v3711_v42 }
 0x1ff   : > { %2790 = vst.msk [vmem:[%s4529_s8 + $0xc8] sm:$0xff] %vm252_vm0, %v3712_v61 }
 0x200   : > { %v3545_v62 = vpop.f32.mrb[28].mxu1 }
 0x201   : > { %v3681_v63 = vpop.f32.mrb[28].mxu0  ;;  %v1525_v14 = vpop.f32.mrb[29].mxu1 }
 0x202   : > { %v3713_v16 = vadd.f32 %v3681_v63, %v3545_v62  ;;  %v2718_v18 = vpop.f32.mrb[29].mxu0  ;;  %v3546_v19 = vpop.f32.mrb[30].mxu1 }
 0x203   : > { %v3714_v33 = vadd.f32 %v2718_v18, %v1525_v14  ;;  %v3682_v36 = vpop.f32.mrb[30].mxu0  ;;  %v1528_v37 = vpop.f32.mrb[31].mxu1 }
 0x204   : > { %2795 = vst.msk [vmem:[%s4529_s8 + $0xf0] sm:$0xff] %vm252_vm0, %v3713_v16  ;;  %v3715_v52 = vadd.f32 %v3682_v36, %v3546_v19  ;;  %v2721_v53 = vpop.f32.mrb[31].mxu0 }
 0x205   : > { %2793 = vst.msk [vmem:[%s4529_s8 + $0xe0] sm:$0xff] %vm252_vm0, %v3714_v33  ;;  %v3716_v54 = vadd.f32 %v2721_v53, %v1528_v37 }
 0x206   : > { %2796 = vst.msk [vmem:[%s4529_s8 + $0xf8] sm:$0xff] %vm252_vm0, %v3715_v52 }
 0x207   : > { %2794 = vst.msk [vmem:[%s4529_s8 + $0xe8] sm:$0xff] %vm252_vm0, %v3716_v54 }
 0x208 PF: > { %s12_s9 = sadd.s32 1, %s3965_s9  }
 0x209   : > { %p9_p4 = scmp.ge.s32.totalorder %s12_s9, 4  }
 0x20b   :  { %11 = sbr.rel (!%p9_p4) target bundleno = 1 (0x1), region = 68 }

// kernel: basic_block_forward.11
= control target key start
LH: loop header
LB: loop body
LE: loop exit
PB: predicated region body
PF: predicated region fallthrough
CT: control target
= control target key end

     0   :  { %s1935_s18 = smov 0   ;;  %s2593_s0 = inlined_call_operand.vmem [shape: f32[2,256,16], index: 0, kind: input, shape index: {}]   ;;  %s2594_s1 = inlined_call_operand.vmem [shape: f32[16,16], index: 1, kind: input, shape index: {}]   ;;  %s2595_s2 = inlined_call_operand.vmem [shape: f32[1,16], index: 2, kind: input, shape index: {}]   ;;  %s2596_s3 = inlined_call_operand.vmem [shape: f32[1,16], index: 3, kind: input, shape index: {}]   ;;  %s2597_s4 = inlined_call_operand.vmem [shape: f32[2,256,16], index: 4, kind: input, shape index: {}]   ;;  %s2598_s5 = inlined_call_operand.vmem [shape: f32[2,256,16], index: 5, kind: output, shape index: {}]  }
   0x1 LB: > { %s1688_s19 = sadd.s32 4294967295, %s1900_s18   ;;  %p1692_p0 = scmp.ge.s32.totalorder %s1900_s18, 1  ;;  %s1900_s18 = sphi %s1935_s18, %s15_s18  }
   0x2   : > { %p197_p1 = scmp.lt.s32.totalorder %s1900_s18, 3 }
   0x4   : > { %p198_p2 = pnand %p1692_p0, %p197_p1 }
   0x5   : > { %v277_v0 = vld [vmem:[%s2594_s1] sm:$0xff] (!%p198_p2)  ;;  %v278_v1 = vld [vmem:[%s2594_s1 + $0x8] sm:$0xff] (!%p198_p2)  ;;  %p230_p3 = scmp.lt.s32.totalorder (!%p198_p2), %s1688_s19, 1  ;;  %v1902_v2 = vmov (!%p198_p2), 0.0|0.0   ;;  %vm1903_vm0 = vmmov (!%p198_p2), 0   ;;  %v1904_v5 = vmov (!%p198_p2), 0.0  }
   0x6   : > { %201 = sbr.rel (%p198_p2) target bundleno = 762 (0x2fa), region = 40  ;;  %1825 = vmatprep.subr.bf16.mxu0 (!%p198_p2), %v1902_v2  ;;  %v353_v3 = vand.u32 (!%p198_p2), 4294901760, %v277_v0  ;;  %v356_v4 = vand.u32 (!%p198_p2), 4294901760, %v278_v1  ;;  %1745 = vmatprep.mubr.msk.f32.mxu0 (!%p198_p2), %vm1903_vm0, %v1904_v5  ;;  %vm279_vm1 = vcmask (!%p198_p2), 130048  }
   0x7   : > { %1843 = vmatprep.subr.bf16.mxu1 (!%p198_p2), %v1902_v2  ;;  %1787 = vmatprep.mubr.msk.f32.mxu1 (!%p198_p2), %vm1903_vm0, %v1904_v5 }
   0x8   : > { %v1955_v6 = vpack.c.bf16 (!%p198_p2), %v356_v4, %v353_v3  ;;  %v431_v7 = vsub.f32 (!%p198_p2), %v277_v0, %v353_v3  ;;  %v438_v8 = vsub.f32 (!%p198_p2), %v278_v1, %v356_v4 }
   0xa   : > { %1827 = vmatpush3.bf16.msra.mxu0 (!%p198_p2), %v1955_v6  ;;  %v1966_v9 = vpack.c.bf16 (!%p198_p2), %v438_v8, %v431_v7  ;;  %1845 = vmatpush3.bf16.msra.mxu1 (!%p198_p2), %v1955_v6  ;;  %v432_v20 = vand.u32 (!%p198_p2), 4294901760, %v431_v7  ;;  %v439_v21 = vand.u32 (!%p198_p2), 4294901760, %v438_v8 }
   0xb   : > { %1828 = vmatprep.subr.bf16.mxu0 (!%p198_p2), %v1902_v2  ;;  %1846 = vmatprep.subr.bf16.mxu1 (!%p198_p2), %v1902_v2 }
   0xc   : > { %v1999_v25 = vpack.c.bf16 (!%p198_p2), %v439_v21, %v432_v20  ;;  %v433_v29 = vsub.f32 (!%p198_p2), %v431_v7, %v432_v20  ;;  %v440_v30 = vsub.f32 (!%p198_p2), %v438_v8, %v439_v21 }
   0xd   : > { %s2600_s19 = smov (!%p230_p3, %s1688_s19), 1 }
   0xe   : > { %s1957_s24 = sshll.u32 %s2600_s19, 8  ;;  %v434_v37 = vand.u32 4294901760, %v433_v29  ;;  %v441_v38 = vand.u32 4294901760, %v440_v30 }
   0xf   : > { %s1964_s27 = scalar_lea.vmem %s2593_s0, %s1957_s24  ;;  %s2450_s9 = scalar_lea.vmem %s2597_s4, %s1957_s24 }
  0x10   : > { %v1971_v10 = vld [vmem:[%s1964_s27] sm:$0xff]  ;;  %v1974_v11 = vld [vmem:[%s1964_s27 + $0x8] sm:$0xff]  ;;  %v1977_v12 = vld [vmem:[%s1964_s27 + $0x10] sm:$0xff]  ;;  %v2021_v42 = vpack.c.bf16 %v441_v38, %v434_v37  ;;  %s2504_s12 = scalar_lea.vmem %s2598_s5, %s1957_s24 }
  0x11   : > { %v1981_v13 = vld [vmem:[%s1964_s27 + $0x18] sm:$0xff]  ;;  %v280_v14 = vsel %vm279_vm1, %v1971_v10, 0.0  ;;  %v281_v15 = vsel %vm279_vm1, %v1974_v11, 0.0  ;;  %v283_v16 = vsel %vm279_vm1, %v1977_v12, 0.0  ;;  %v1990_v17 = vld [vmem:[%s1964_s27 + $0x20] sm:$0xff]  ;;  %v1995_v22 = vld [vmem:[%s1964_s27 + $0x28] sm:$0xff] }
  0x12   : > { %v282_v18 = vadd.f32 %v281_v15, %v280_v14  ;;  %v285_v19 = vsel %vm279_vm1, %v1981_v13, 0.0  ;;  %v287_v24 = vsel %vm279_vm1, %v1990_v17, 0.0  ;;  %v2002_v26 = vld [vmem:[%s1964_s27 + $0x30] sm:$0xff]  ;;  %v289_v28 = vsel %vm279_vm1, %v1995_v22, 0.0  ;;  %v2007_v31 = vld [vmem:[%s1964_s27 + $0x38] sm:$0xff]  ;;  %v2012_v34 = vld [vmem:[%s1964_s27 + $0x40] sm:$0xff] }
  0x13   : > { %v291_v33 = vsel %vm279_vm1, %v2002_v26, 0.0  ;;  %v293_v36 = vsel %vm279_vm1, %v2007_v31, 0.0  ;;  %v2017_v39 = vld [vmem:[%s1964_s27 + $0x48] sm:$0xff]  ;;  %v295_v41 = vsel %vm279_vm1, %v2012_v34, 0.0  ;;  %v2024_v43 = vld [vmem:[%s1964_s27 + $0x50] sm:$0xff]  ;;  %v2029_v46 = vld [vmem:[%s1964_s27 + $0x58] sm:$0xff] }
  0x14   : > { %v284_v23 = vadd.f32 %v283_v16, %v282_v18  ;;  %v297_v45 = vsel %vm279_vm1, %v2017_v39, 0.0  ;;  %v299_v48 = vsel %vm279_vm1, %v2024_v43, 0.0  ;;  %v2034_v49 = vld [vmem:[%s1964_s27 + $0x60] sm:$0xff]  ;;  %v301_v51 = vsel %vm279_vm1, %v2029_v46, 0.0  ;;  %v2039_v52 = vld [vmem:[%s1964_s27 + $0x68] sm:$0xff]  ;;  %v2044_v55 = vld [vmem:[%s1964_s27 + $0x70] sm:$0xff] }
  0x15   : > { %v303_v54 = vsel %vm279_vm1, %v2034_v49, 0.0  ;;  %v305_v57 = vsel %vm279_vm1, %v2039_v52, 0.0  ;;  %v2049_v58 = vld [vmem:[%s1964_s27 + $0x78] sm:$0xff]  ;;  %v307_v60 = vsel %vm279_vm1, %v2044_v55, 0.0  ;;  %v2054_v61 = vld [vmem:[%s1964_s27 + $0x80] sm:$0xff]  ;;  %v2059_v0 = vld [vmem:[%s1964_s27 + $0x88] sm:$0xff] }
  0x16   : > { %v286_v27 = vadd.f32 %v285_v19, %v284_v23  ;;  %v309_v63 = vsel %vm279_vm1, %v2049_v58, 0.0  ;;  %v311_v3 = vsel %vm279_vm1, %v2054_v61, 0.0  ;;  %v2064_v4 = vld [vmem:[%s1964_s27 + $0x90] sm:$0xff]  ;;  %v313_v8 = vsel %vm279_vm1, %v2059_v0, 0.0  ;;  %v2069_v14 = vld [vmem:[%s1964_s27 + $0x98] sm:$0xff]  ;;  %v2074_v18 = vld [vmem:[%s1964_s27 + $0xa0] sm:$0xff] }
  0x17   : > { %v315_v16 = vsel %vm279_vm1, %v2064_v4, 0.0  ;;  %v317_v20 = vsel %vm279_vm1, %v2069_v14, 0.0  ;;  %v2079_v21 = vld [vmem:[%s1964_s27 + $0xa8] sm:$0xff]  ;;  %v2089_v30 = vld [vmem:[%s1964_s27 + $0xb8] sm:$0xff] }
  0x18   : > { %v288_v32 = vadd.f32 %v287_v24, %v286_v27  ;;  %v319_v24 = vsel %vm279_vm1, %v2074_v18, 0.0  ;;  %v2084_v27 = vld [vmem:[%s1964_s27 + $0xb0] sm:$0xff]  ;;  %v321_v29 = vsel %vm279_vm1, %v2079_v21, 0.0  ;;  %v325_v37 = vsel %vm279_vm1, %v2089_v30, 0.0  ;;  %v2099_v38 = vld [vmem:[%s1964_s27 + $0xc8] sm:$0xff] }
  0x1a   : > { %v290_v35 = vadd.f32 %v289_v28, %v288_v32 }
  0x1c   : > { %v292_v40 = vadd.f32 %v291_v33, %v290_v35  ;;  %v323_v33 = vsel %vm279_vm1, %v2084_v27, 0.0  ;;  %v2094_v35 = vld [vmem:[%s1964_s27 + $0xc0] sm:$0xff] }
  0x1e   : > { %v294_v44 = vadd.f32 %v293_v36, %v292_v40 }
  0x20   : > { %v296_v47 = vadd.f32 %v295_v41, %v294_v44  ;;  %v327_v41 = vsel %vm279_vm1, %v2094_v35, 0.0  ;;  %v2104_v44 = vld [vmem:[%s1964_s27 + $0xd0] sm:$0xff] }
  0x22   : > { %v298_v50 = vadd.f32 %v297_v45, %v296_v47  ;;  %v329_v47 = vsel %vm279_vm1, %v2099_v38, 0.0 }
  0x24   : > { %v300_v53 = vadd.f32 %v299_v48, %v298_v50  ;;  %v2109_v48 = vld [vmem:[%s1964_s27 + $0xd8] sm:$0xff] }
  0x26   : > { %v302_v56 = vadd.f32 %v301_v51, %v300_v53  ;;  %v331_v51 = vsel %vm279_vm1, %v2104_v44, 0.0  ;;  %v2114_v53 = vld [vmem:[%s1964_s27 + $0xe0] sm:$0xff] }
  0x28   : > { %v304_v59 = vadd.f32 %v303_v54, %v302_v56  ;;  %v333_v56 = vsel %vm279_vm1, %v2109_v48, 0.0 }
  0x2a   : > { %v306_v62 = vadd.f32 %v305_v57, %v304_v59  ;;  %v2119_v57 = vld [vmem:[%s1964_s27 + $0xe8] sm:$0xff] }
  0x2c   : > { %v308_v1 = vadd.f32 %v307_v60, %v306_v62  ;;  %v335_v60 = vsel %vm279_vm1, %v2114_v53, 0.0  ;;  %v2124_v62 = vld [vmem:[%s1964_s27 + $0xf0] sm:$0xff] }
  0x2e   : > { %v310_v7 = vadd.f32 %v309_v63, %v308_v1  ;;  %v337_v1 = vsel %vm279_vm1, %v2119_v57, 0.0 }
  0x30   : > { %v312_v15 = vadd.f32 %v311_v3, %v310_v7  ;;  %v2129_v3 = vld [vmem:[%s1964_s27 + $0xf8] sm:$0xff] }
  0x32   : > { %v314_v19 = vadd.f32 %v313_v8, %v312_v15  ;;  %v339_v8 = vsel %vm279_vm1, %v2124_v62, 0.0 }
  0x34   : > { %v316_v23 = vadd.f32 %v315_v16, %v314_v19  ;;  %v341_v16 = vsel %vm279_vm1, %v2129_v3, 0.0 }
  0x36   : > { %v318_v28 = vadd.f32 %v317_v20, %v316_v23 }
  0x38   : > { %v320_v32 = vadd.f32 %v319_v24, %v318_v28 }
  0x3a   : > { %v322_v36 = vadd.f32 %v321_v29, %v320_v32 }
  0x3c   : > { %v324_v40 = vadd.f32 %v323_v33, %v322_v36 }
  0x3e   : > { %v326_v45 = vadd.f32 %v325_v37, %v324_v40 }
  0x40   : > { %v328_v50 = vadd.f32 %v327_v41, %v326_v45 }
  0x42   : > { %v330_v54 = vadd.f32 %v329_v47, %v328_v50  ;;  %v812_v50 = vlaneseq }
  0x44   : > { %v332_v59 = vadd.f32 %v331_v51, %v330_v54  ;;  %v2155_v54 = vshrl.u32 %v812_v50, 7 }
  0x46   : > { %v334_v63 = vadd.f32 %v333_v56, %v332_v59 }
  0x48   : > { %v336_v7 = vadd.f32 %v335_v60, %v334_v63  ;;  %v814_v60 = vsub.s32 0, %v2155_v54 }
  0x4a   : > { %v338_v15 = vadd.f32 %v337_v1, %v336_v7 }
  0x4c   : > { %v340_v19 = vadd.f32 %v339_v8, %v338_v15 }
  0x4e   : > { %v342_v20 = vadd.f32 %v341_v16, %v340_v19 }
  0x50   : > { %v343_v23 = vrot.slane %v342_v20, 4 }
  0x52   : > { %v344_v24 = vadd.f32 %v343_v23, %v342_v20 }
  0x54   : > { %v345_v28 = vrot.slane %v344_v24, 2 }
  0x56   : > { %v346_v29 = vadd.f32 %v345_v28, %v344_v24 }
  0x58   : > { %v347_v32 = vrot.slane %v346_v29, 1 }
  0x5a   : > { %v348_v33 = vadd.f32 %v347_v32, %v346_v29 }
  0x5c   : > { %v350_v36 = vsel %vm279_vm1, %v348_v33, 0 }
  0x5d   : > { %v419_v37 = vand.u32 4294901760, %v350_v36 }
  0x5f   : > { %v420_v40 = vsub.f32 %v350_v36, %v419_v37 }
  0x61   : > { %v421_v41 = vand.u32 4294901760, %v420_v40 }
  0x63   : > { %v422_v45 = vsub.f32 %v420_v40, %v421_v41 }
  0x65   : > { %v423_v47 = vand.u32 4294901760, %v422_v45 }
  0x67   : > { %1746 = vmatmul.mubr.f32.vlgmr.msra.gmra.mrb[0].mxu0 %v423_v47 }
  0x68   : > { %1830 = vmatpush3.bf16.msra.mxu0 %v2021_v42  ;;  %1752 = vmatprep.mubr.msk.f32.mxu0 %vm1903_vm0, %v1904_v5 }
  0x69   : > { %1831 = vmatprep.subr.bf16.mxu0 %v1902_v2 }
  0x6f   : > { %1753 = vmatmul.mubr.f32.vlgmr.msra.gmra.mrb[0].mxu0 %v419_v37 }
  0x70   : > { %1833 = vmatpush3.bf16.msra.mxu0 %v1966_v9  ;;  %1759 = vmatprep.mubr.msk.f32.mxu0 %vm1903_vm0, %v1904_v5 }
  0x71   : > { %1834 = vmatprep.subr.bf16.mxu0 %v1902_v2 }
  0x77   : > { %1760 = vmatmul.mubr.f32.vlgmr.msra.gmra.mrb[0].mxu0 %v420_v40 }
  0x78   : > { %1836 = vmatpush3.bf16.msra.mxu0 %v1955_v6  ;;  %1766 = vmatprep.mubr.msk.f32.mxu0 %vm1903_vm0, %v1904_v5 }
  0x79   : > { %1837 = vmatprep.subr.bf16.mxu0 %v1902_v2 }
  0x7f   : > { %1767 = vmatmul.mubr.f32.vlgmr.msra.gmra.mrb[0].mxu0 %v421_v41 }
  0x80   : > { %1839 = vmatpush3.bf16.msra.mxu0 %v1999_v25  ;;  %1773 = vmatprep.mubr.msk.f32.mxu0 %vm1903_vm0, %v1904_v5 }
  0x81   : > { %1840 = vmatprep.subr.bf16.mxu0 %v1902_v2 }
  0x87   : > { %1774 = vmatmul.mubr.f32.vlgmr.msra.gmra.mrb[0].mxu0 %v419_v37 }
  0x88   : > { %1842 = vmatpush3.bf16.msra.mxu0 %v1955_v6  ;;  %1780 = vmatprep.mubr.msk.f32.mxu0 %vm1903_vm0, %v1904_v5 }
  0x8f   : > { %1781 = vmatmul.mubr.f32.vlgmr.msra.gmra.mrb[0].mxu0 %v419_v37 }
 0x162   : > { %v807_v51 = vpop.f32.mrb[0].mxu0 }
 0x163   : > { %v1782_v56 = vpop.f32.mrb[1].mxu0  ;;  %v811_v59 = vmul.f32 0.001953125, %v807_v51 }
 0x165   : > { %v2160_v63 = vrot.slane %v811_v59, %v814_v60 }
 0x167   : > { %v2164_v1 = vsub.f32 %v1971_v10, %v2160_v63  ;;  %v2168_v7 = vsub.f32 %v1974_v11, %v2160_v63  ;;  %v2172_v8 = vsub.f32 %v1977_v12, %v2160_v63  ;;  %v2176_v15 = vsub.f32 %v1981_v13, %v2160_v63 }
 0x168   : > { %v2184_v10 = vsub.f32 %v1990_v17, %v2160_v63  ;;  %v2190_v12 = vsub.f32 %v1995_v22, %v2160_v63  ;;  %v2198_v28 = vsub.f32 %v2002_v26, %v2160_v63  ;;  %v2205_v22 = vsub.f32 %v2007_v31, %v2160_v63 }
 0x169   : > { %v848_v16 = vmul.f32 %v2164_v1, %v2164_v1  ;;  %v849_v19 = vmul.f32 %v2168_v7, %v2168_v7  ;;  %v850_v11 = vmul.f32 %v2172_v8, %v2172_v8  ;;  %v851_v13 = vmul.f32 %v2176_v15, %v2176_v15 }
 0x16a   : > { %v852_v17 = vmul.f32 %v2184_v10, %v2184_v10  ;;  %v853_v33 = vmul.f32 %v2190_v12, %v2190_v12  ;;  %v2212_v26 = vsub.f32 %v2012_v34, %v2160_v63  ;;  %v854_v40 = vmul.f32 %v2198_v28, %v2198_v28 }
 0x16b   : > { %v880_v20 = vsel %vm279_vm1, %v848_v16, 0.0  ;;  %v881_v23 = vsel %vm279_vm1, %v849_v19, 0.0  ;;  %v883_v29 = vsel %vm279_vm1, %v850_v11, 0.0  ;;  %v885_v36 = vsel %vm279_vm1, %v851_v13, 0.0 }
 0x16c   : > { %v882_v24 = vadd.f32 %v881_v23, %v880_v20  ;;  %v887_v41 = vsel %vm279_vm1, %v852_v17, 0.0  ;;  %v2219_v31 = vsub.f32 %v2017_v39, %v2160_v63  ;;  %v855_v47 = vmul.f32 %v2205_v22, %v2205_v22 }
 0x16d   : > { %v889_v50 = vsel %vm279_vm1, %v853_v33, 0.0  ;;  %v2226_v34 = vsub.f32 %v2024_v43, %v2160_v63  ;;  %v856_v56 = vmul.f32 %v2212_v26, %v2212_v26  ;;  %v891_v59 = vsel %vm279_vm1, %v854_v40, 0.0 }
 0x16e   : > { %v884_v32 = vadd.f32 %v883_v29, %v882_v24  ;;  %v2233_v39 = vsub.f32 %v2029_v46, %v2160_v63  ;;  %v857_v19 = vmul.f32 %v2219_v31, %v2219_v31  ;;  %v893_v11 = vsel %vm279_vm1, %v855_v47, 0.0 }
 0x16f   : > { %v2240_v43 = vsub.f32 %v2034_v49, %v2160_v63  ;;  %v858_v20 = vmul.f32 %v2226_v34, %v2226_v34  ;;  %v895_v23 = vsel %vm279_vm1, %v856_v56, 0.0  ;;  %v2247_v46 = vsub.f32 %v2039_v52, %v2160_v63 }
 0x170   : > { %v886_v37 = vadd.f32 %v885_v36, %v884_v32  ;;  %v859_v17 = vmul.f32 %v2233_v39, %v2233_v39  ;;  %v897_v29 = vsel %vm279_vm1, %v857_v19, 0.0  ;;  %v2254_v49 = vsub.f32 %v2044_v55, %v2160_v63 }
 0x171   : > { %v860_v33 = vmul.f32 %v2240_v43, %v2240_v43  ;;  %v899_v36 = vsel %vm279_vm1, %v858_v20, 0.0  ;;  %v2261_v52 = vsub.f32 %v2049_v58, %v2160_v63  ;;  %v861_v40 = vmul.f32 %v2247_v46, %v2247_v46 }
 0x172   : > { %v888_v45 = vadd.f32 %v887_v41, %v886_v37  ;;  %v901_v41 = vsel %vm279_vm1, %v859_v17, 0.0  ;;  %v2268_v55 = vsub.f32 %v2054_v61, %v2160_v63  ;;  %v862_v47 = vmul.f32 %v2254_v49, %v2254_v49 }
 0x173   : > { %v2275_v58 = vsub.f32 %v2059_v0, %v2160_v63  ;;  %v863_v56 = vmul.f32 %v2261_v52, %v2261_v52  ;;  %v2282_v61 = vsub.f32 %v2064_v4, %v2160_v63  ;;  %v2289_v0 = vsub.f32 %v2069_v14, %v2160_v63 }
 0x174   : > { %v890_v51 = vadd.f32 %v889_v50, %v888_v45  ;;  %v903_v50 = vsel %vm279_vm1, %v860_v33, 0.0  ;;  %v864_v19 = vmul.f32 %v2268_v55, %v2268_v55  ;;  %v2296_v4 = vsub.f32 %v2074_v18, %v2160_v63 }
 0x175   : > { %v865_v20 = vmul.f32 %v2275_v58, %v2275_v58  ;;  %v866_v17 = vmul.f32 %v2282_v61, %v2282_v61  ;;  %v2303_v14 = vsub.f32 %v2079_v21, %v2160_v63  ;;  %v867_v33 = vmul.f32 %v2289_v0, %v2289_v0 }
 0x176   : > { %v892_v16 = vadd.f32 %v891_v59, %v890_v51  ;;  %v905_v59 = vsel %vm279_vm1, %v861_v40, 0.0  ;;  %v2310_v18 = vsub.f32 %v2084_v27, %v2160_v63  ;;  %v868_v40 = vmul.f32 %v2296_v4, %v2296_v4 }
 0x177   : > { %v2317_v21 = vsub.f32 %v2089_v30, %v2160_v63  ;;  %v2324_v27 = vsub.f32 %v2094_v35, %v2160_v63  ;;  %v2331_v30 = vsub.f32 %v2099_v38, %v2160_v63  ;;  %v2338_v35 = vsub.f32 %v2104_v44, %v2160_v63 }
 0x178   : > { %v894_v13 = vadd.f32 %v893_v11, %v892_v16  ;;  %v907_v11 = vsel %vm279_vm1, %v862_v47, 0.0  ;;  %v869_v47 = vmul.f32 %v2303_v14, %v2303_v14  ;;  %v2345_v38 = vsub.f32 %v2109_v48, %v2160_v63 }
 0x179   : > { %v2352_v44 = vsub.f32 %v2114_v53, %v2160_v63  ;;  %v2359_v48 = vsub.f32 %v2119_v57, %v2160_v63  ;;  %v2366_v53 = vsub.f32 %v2124_v62, %v2160_v63  ;;  %v2373_v57 = vsub.f32 %v2129_v3, %v2160_v63 }
 0x17a   : > { %v896_v24 = vadd.f32 %v895_v23, %v894_v13  ;;  %v909_v23 = vsel %vm279_vm1, %v863_v56, 0.0  ;;  %v870_v56 = vmul.f32 %v2310_v18, %v2310_v18 }
 0x17b   : > { %v878_v62 = vmul.f32 %v2366_v53, %v2366_v53 }
 0x17c   : > { %v898_v32 = vadd.f32 %v897_v29, %v896_v24  ;;  %v911_v29 = vsel %vm279_vm1, %v864_v19, 0.0  ;;  %v871_v19 = vmul.f32 %v2317_v21, %v2317_v21 }
 0x17d   : > { %v939_v3 = vsel %vm279_vm1, %v878_v62, 0.0 }
 0x17e   : > { %v900_v37 = vadd.f32 %v899_v36, %v898_v32  ;;  %v913_v36 = vsel %vm279_vm1, %v865_v20, 0.0  ;;  %v872_v20 = vmul.f32 %v2324_v27, %v2324_v27 }
 0x180   : > { %v902_v45 = vadd.f32 %v901_v41, %v900_v37  ;;  %v915_v41 = vsel %vm279_vm1, %v866_v17, 0.0  ;;  %v873_v17 = vmul.f32 %v2331_v30, %v2331_v30 }
 0x182   : > { %v904_v51 = vadd.f32 %v903_v50, %v902_v45  ;;  %v917_v50 = vsel %vm279_vm1, %v867_v33, 0.0  ;;  %v874_v33 = vmul.f32 %v2338_v35, %v2338_v35 }
 0x184   : > { %v906_v16 = vadd.f32 %v905_v59, %v904_v51  ;;  %v919_v59 = vsel %vm279_vm1, %v868_v40, 0.0  ;;  %v875_v40 = vmul.f32 %v2345_v38, %v2345_v38 }
 0x186   : > { %v908_v13 = vadd.f32 %v907_v11, %v906_v16  ;;  %v921_v11 = vsel %vm279_vm1, %v869_v47, 0.0  ;;  %v876_v47 = vmul.f32 %v2352_v44, %v2352_v44 }
 0x188   : > { %v910_v24 = vadd.f32 %v909_v23, %v908_v13  ;;  %v923_v23 = vsel %vm279_vm1, %v870_v56, 0.0  ;;  %v877_v56 = vmul.f32 %v2359_v48, %v2359_v48 }
 0x18a   : > { %v912_v32 = vadd.f32 %v911_v29, %v910_v24  ;;  %v925_v29 = vsel %vm279_vm1, %v871_v19, 0.0  ;;  %v935_v19 = vsel %vm279_vm1, %v876_v47, 0.0 }
 0x18c   : > { %v914_v37 = vadd.f32 %v913_v36, %v912_v32  ;;  %v927_v36 = vsel %vm279_vm1, %v872_v20, 0.0  ;;  %v937_v20 = vsel %vm279_vm1, %v877_v56, 0.0 }
 0x18e   : > { %v916_v45 = vadd.f32 %v915_v41, %v914_v37  ;;  %v929_v41 = vsel %vm279_vm1, %v873_v17, 0.0 }
 0x190   : > { %v918_v51 = vadd.f32 %v917_v50, %v916_v45  ;;  %v931_v50 = vsel %vm279_vm1, %v874_v33, 0.0 }
 0x192   : > { %v920_v16 = vadd.f32 %v919_v59, %v918_v51  ;;  %v933_v59 = vsel %vm279_vm1, %v875_v40, 0.0 }
 0x194   : > { %v922_v13 = vadd.f32 %v921_v11, %v920_v16 }
 0x196   : > { %v924_v24 = vadd.f32 %v923_v23, %v922_v13  ;;  %v879_v13 = vmul.f32 %v2373_v57, %v2373_v57 }
 0x198   : > { %v926_v32 = vadd.f32 %v925_v29, %v924_v24  ;;  %v941_v24 = vsel %vm279_vm1, %v879_v13, 0.0 }
 0x19a   : > { %v928_v37 = vadd.f32 %v927_v36, %v926_v32 }
 0x19c   : > { %v930_v45 = vadd.f32 %v929_v41, %v928_v37 }
 0x19e   : > { %v932_v51 = vadd.f32 %v931_v50, %v930_v45 }
 0x1a0   : > { %v934_v16 = vadd.f32 %v933_v59, %v932_v51 }
 0x1a2   : > { %v936_v11 = vadd.f32 %v935_v19, %v934_v16 }
 0x1a4   : > { %v938_v23 = vadd.f32 %v937_v20, %v936_v11 }
 0x1a6   : > { %v940_v63 = vadd.f32 %v939_v3, %v938_v23 }
 0x1a8   : > { %v942_v17 = vadd.f32 %v941_v24, %v940_v63 }
 0x1aa   : > { %v943_v29 = vrot.slane %v942_v17, 4 }
 0x1ac   : > { %v944_v32 = vadd.f32 %v943_v29, %v942_v17 }
 0x1ae   : > { %v945_v33 = vrot.slane %v944_v32, 2 }
 0x1b0   : > { %v946_v36 = vadd.f32 %v945_v33, %v944_v32 }
 0x1b2   : > { %v947_v37 = vrot.slane %v946_v36, 1 }
 0x1b4   : > { %v948_v40 = vadd.f32 %v947_v37, %v946_v36 }
 0x1b6   : > { %v950_v41 = vsel %vm279_vm1, %v948_v40, 0  ;;  %v1493_v40 = vld [vmem:[%s2450_s9] sm:$0xff] }
 0x1b7   : > { %v1019_v45 = vand.u32 4294901760, %v950_v41 }
 0x1b9   : > { %v1020_v47 = vsub.f32 %v950_v41, %v1019_v45  ;;  %v1494_v41 = vld [vmem:[%s2450_s9 + $0x8] sm:$0xff] }
 0x1bb   : > { %v1021_v50 = vand.u32 4294901760, %v1020_v47 }
 0x1bd   : > { %v1022_v51 = vsub.f32 %v1020_v47, %v1021_v50 }
 0x1bf   : > { %v1023_v56 = vand.u32 4294901760, %v1022_v51 }
 0x1c1   : > { %1788 = vmatmul.mubr.f32.vlgmr.msra.gmra.mrb[0].mxu1 %v1023_v56 }
 0x1c2   : > { %1848 = vmatpush3.bf16.msra.mxu1 %v2021_v42  ;;  %1794 = vmatprep.mubr.msk.f32.mxu1 %vm1903_vm0, %v1904_v5 }
 0x1c3   : > { %1849 = vmatprep.subr.bf16.mxu1 %v1902_v2 }
 0x1c9   : > { %1795 = vmatmul.mubr.f32.vlgmr.msra.gmra.mrb[0].mxu1 %v1019_v45 }
 0x1ca   : > { %1851 = vmatpush3.bf16.msra.mxu1 %v1966_v9  ;;  %1801 = vmatprep.mubr.msk.f32.mxu1 %vm1903_vm0, %v1904_v5 }
 0x1cb   : > { %1852 = vmatprep.subr.bf16.mxu1 %v1902_v2 }
 0x1d1   : > { %1802 = vmatmul.mubr.f32.vlgmr.msra.gmra.mrb[0].mxu1 %v1020_v47  ;;  %v1496_v47 = vld [vmem:[%s2450_s9 + $0x18] sm:$0xff] }
 0x1d2   : > { %1854 = vmatpush3.bf16.msra.mxu1 %v1955_v6  ;;  %1808 = vmatprep.mubr.msk.f32.mxu1 %vm1903_vm0, %v1904_v5 }
 0x1d3   : > { %1855 = vmatprep.subr.bf16.mxu1 %v1902_v2 }
 0x1d9   : > { %1809 = vmatmul.mubr.f32.vlgmr.msra.gmra.mrb[0].mxu1 %v1021_v50 }
 0x1da   : > { %1857 = vmatpush3.bf16.msra.mxu1 %v1999_v25  ;;  %1815 = vmatprep.mubr.msk.f32.mxu1 %vm1903_vm0, %v1904_v5  ;;  %v1412_v25 = vld [vmem:[%s2595_s2] sm:$0x1] }
 0x1db   : > { %1858 = vmatprep.subr.bf16.mxu1 %v1902_v2 }
 0x1e1   : > { %1816 = vmatmul.mubr.f32.vlgmr.msra.gmra.mrb[0].mxu1 %v1019_v45 }
 0x1e2   : > { %1860 = vmatpush3.bf16.msra.mxu1 %v1955_v6  ;;  %1822 = vmatprep.mubr.msk.f32.mxu1 %vm1903_vm0, %v1904_v5 }
 0x1e9   : > { %1823 = vmatmul.mubr.f32.vlgmr.msra.gmra.mrb[0].mxu1 %v1019_v45  ;;  %v1495_v45 = vld [vmem:[%s2450_s9 + $0x10] sm:$0xff] }
 0x2bc   : > { %v1407_v9 = vpop.f32.mrb[0].mxu1 }
 0x2bd   : > { %v1411_v42 = vmul.f32 0.001953125, %v1407_v9  ;;  %v1824_v59 = vpop.f32.mrb[1].mxu1 }
 0x2be   : > { %v1498_v59 = vld [vmem:[%s2450_s9 + $0x28] sm:$0xff] }
 0x2bf   : > { %v1413_v16 = vadd.f32 1e-05, %v1411_v42  ;;  %v1497_v42 = vld [vmem:[%s2450_s9 + $0x20] sm:$0xff] }
 0x2c1   : > { %1892 = vrsqrt.f32 %v1413_v16  ;;  %v1499_v16 = vld [vmem:[%s2450_s9 + $0x30] sm:$0xff] }
 0x2cb   : > { %v1893_v62 = vpop.eup %1892 }
 0x2cc   : > { %v1415_v19 = vmul.f32 %v1893_v62, %v1412_v25  ;;  %v1500_v25 = vld [vmem:[%s2450_s9 + $0x38] sm:$0xff] }
 0x2ce   : > { %v1420_v2 = vrot.slane %v1415_v19, %v814_v60 }
 0x2d0   : > { %v1422_v6 = vmul.f32 %v1420_v2, %v2164_v1  ;;  %v1423_v11 = vmul.f32 %v1420_v2, %v2168_v7  ;;  %v1424_v5 = vmul.f32 %v1420_v2, %v2172_v8  ;;  %v1425_v13 = vmul.f32 %v1420_v2, %v2176_v15 }
 0x2d1   : > { %v1426_v20 = vmul.f32 %v1420_v2, %v2184_v10  ;;  %v1427_v23 = vmul.f32 %v1420_v2, %v2190_v12  ;;  %v1428_v3 = vmul.f32 %v1420_v2, %v2198_v28  ;;  %v1429_v63 = vmul.f32 %v1420_v2, %v2205_v22 }
 0x2d2   : > { %v1430_v24 = vmul.f32 %v1420_v2, %v2212_v26  ;;  %v1431_v54 = vmul.f32 %v1420_v2, %v2219_v31  ;;  %v1432_v60 = vmul.f32 %v1420_v2, %v2226_v34  ;;  %v1433_v1 = vmul.f32 %v1420_v2, %v2233_v39 }
 0x2d3   : > { %v1434_v7 = vmul.f32 %v1420_v2, %v2240_v43  ;;  %v1435_v8 = vmul.f32 %v1420_v2, %v2247_v46  ;;  %v1436_v15 = vmul.f32 %v1420_v2, %v2254_v49  ;;  %v1437_v10 = vmul.f32 %v1420_v2, %v2261_v52  ;;  %v1699_v46 = vld [vmem:[%s2596_s3] ss:$0 sm:$0xff] }
 0x2d4   : > { %v1438_v12 = vmul.f32 %v1420_v2, %v2268_v55  ;;  %v1439_v28 = vmul.f32 %v1420_v2, %v2275_v58  ;;  %v1440_v22 = vmul.f32 %v1420_v2, %v2282_v61  ;;  %v1441_v26 = vmul.f32 %v1420_v2, %v2289_v0 }
 0x2d5   : > { %v1442_v31 = vmul.f32 %v1420_v2, %v2296_v4  ;;  %v1443_v34 = vmul.f32 %v1420_v2, %v2303_v14  ;;  %v1444_v39 = vmul.f32 %v1420_v2, %v2310_v18  ;;  %v1445_v43 = vmul.f32 %v1420_v2, %v2317_v21 }
 0x2d6   : > { %v1446_v49 = vmul.f32 %v1420_v2, %v2324_v27  ;;  %v1447_v52 = vmul.f32 %v1420_v2, %v2331_v30  ;;  %v1448_v55 = vmul.f32 %v1420_v2, %v2338_v35  ;;  %v1449_v58 = vmul.f32 %v1420_v2, %v2345_v38 }
 0x2d7   : > { %v1450_v61 = vmul.f32 %v1420_v2, %v2352_v44  ;;  %v1451_v0 = vmul.f32 %v1420_v2, %v2359_v48  ;;  %v1452_v4 = vmul.f32 %v1420_v2, %v2366_v53  ;;  %v1453_v14 = vmul.f32 %v1420_v2, %v2373_v57 }
 0x2d8   : > { %v1461_v18 = vadd.f32 %v1699_v46, %v1422_v6  ;;  %v1462_v21 = vadd.f32 %v1699_v46, %v1423_v11  ;;  %v1463_v27 = vadd.f32 %v1699_v46, %v1424_v5  ;;  %v1464_v30 = vadd.f32 %v1699_v46, %v1425_v13  ;;  %v1501_v11 = vld [vmem:[%s2450_s9 + $0x40] sm:$0xff]  ;;  %v1502_v5 = vld [vmem:[%s2450_s9 + $0x48] sm:$0xff]  ;;  %v1503_v13 = vld [vmem:[%s2450_s9 + $0x50] sm:$0xff] }
 0x2d9   : > { %v1465_v35 = vadd.f32 %v1699_v46, %v1426_v20  ;;  %v1466_v38 = vadd.f32 %v1699_v46, %v1427_v23  ;;  %v1467_v44 = vadd.f32 %v1699_v46, %v1428_v3  ;;  %v1468_v48 = vadd.f32 %v1699_v46, %v1429_v63 }
 0x2da   : > { %v1469_v53 = vadd.f32 %v1699_v46, %v1430_v24  ;;  %v1470_v57 = vadd.f32 %v1699_v46, %v1431_v54  ;;  %v1471_v17 = vadd.f32 %v1699_v46, %v1432_v60  ;;  %v1472_v29 = vadd.f32 %v1699_v46, %v1433_v1  ;;  %v1504_v24 = vld [vmem:[%s2450_s9 + $0x58] sm:$0xff]  ;;  %v1505_v54 = vld [vmem:[%s2450_s9 + $0x60] sm:$0xff]  ;;  %v1506_v60 = vld [vmem:[%s2450_s9 + $0x68] sm:$0xff] }
 0x2db   : > { %v1473_v32 = vadd.f32 %v1699_v46, %v1434_v7  ;;  %v1474_v33 = vadd.f32 %v1699_v46, %v1435_v8  ;;  %v1475_v36 = vadd.f32 %v1699_v46, %v1436_v15  ;;  %v1476_v37 = vadd.f32 %v1699_v46, %v1437_v10  ;;  %v1507_v10 = vld [vmem:[%s2450_s9 + $0x70] sm:$0xff] }
 0x2dc   : > { %v1477_v50 = vadd.f32 %v1699_v46, %v1438_v12  ;;  %v1478_v51 = vadd.f32 %v1699_v46, %v1439_v28  ;;  %v1479_v56 = vadd.f32 %v1699_v46, %v1440_v22  ;;  %v1480_v9 = vadd.f32 %v1699_v46, %v1441_v26  ;;  %v1508_v12 = vld [vmem:[%s2450_s9 + $0x78] sm:$0xff]  ;;  %v1509_v28 = vld [vmem:[%s2450_s9 + $0x80] sm:$0xff]  ;;  %v1510_v22 = vld [vmem:[%s2450_s9 + $0x88] sm:$0xff] }
 0x2dd   : > { %v1481_v62 = vadd.f32 %v1699_v46, %v1442_v31  ;;  %v1482_v19 = vadd.f32 %v1699_v46, %v1443_v34  ;;  %v1483_v2 = vadd.f32 %v1699_v46, %v1444_v39  ;;  %v1484_v6 = vadd.f32 %v1699_v46, %v1445_v43  ;;  %v1511_v26 = vld [vmem:[%s2450_s9 + $0x90] sm:$0xff]  ;;  %v1512_v31 = vld [vmem:[%s2450_s9 + $0x98] sm:$0xff] }
 0x2de   : > { %v1485_v20 = vadd.f32 %v1699_v46, %v1446_v49  ;;  %v1486_v23 = vadd.f32 %v1699_v46, %v1447_v52  ;;  %v1487_v3 = vadd.f32 %v1699_v46, %v1448_v55  ;;  %v1488_v63 = vadd.f32 %v1699_v46, %v1449_v58  ;;  %v1513_v52 = vld [vmem:[%s2450_s9 + $0xa0] sm:$0xff]  ;;  %v1514_v55 = vld [vmem:[%s2450_s9 + $0xa8] sm:$0xff]  ;;  %v1515_v58 = vld [vmem:[%s2450_s9 + $0xb0] sm:$0xff] }
 0x2df   : > { %v1489_v1 = vadd.f32 %v1699_v46, %v1450_v61  ;;  %v1490_v7 = vadd.f32 %v1699_v46, %v1451_v0  ;;  %v1491_v8 = vadd.f32 %v1699_v46, %v1452_v4  ;;  %v1492_v15 = vadd.f32 %v1699_v46, %v1453_v14  ;;  %v1516_v14 = vld [vmem:[%s2450_s9 + $0xb8] sm:$0xff] }
 0x2e0   : > { %v1525_v34 = vadd.f32 %v1493_v40, %v1461_v18  ;;  %v1526_v39 = vadd.f32 %v1494_v41, %v1462_v21  ;;  %v1527_v43 = vadd.f32 %v1495_v45, %v1463_v27  ;;  %v1528_v49 = vadd.f32 %v1496_v47, %v1464_v30  ;;  %v1517_v18 = vld [vmem:[%s2450_s9 + $0xc0] sm:$0xff]  ;;  %v1518_v40 = vld [vmem:[%s2450_s9 + $0xc8] sm:$0xff]  ;;  %v1519_v30 = vld [vmem:[%s2450_s9 + $0xd0] sm:$0xff] }
 0x2e1   : > { %v1529_v46 = vadd.f32 %v1497_v42, %v1465_v35  ;;  %v1530_v61 = vadd.f32 %v1498_v59, %v1466_v38  ;;  %v1531_v0 = vadd.f32 %v1499_v16, %v1467_v44  ;;  %v1532_v4 = vadd.f32 %v1500_v25, %v1468_v48  ;;  %v1520_v47 = vld [vmem:[%s2450_s9 + $0xd8] sm:$0xff]  ;;  %v1521_v35 = vld [vmem:[%s2450_s9 + $0xe0] sm:$0xff]  ;;  %v1522_v44 = vld [vmem:[%s2450_s9 + $0xe8] sm:$0xff] }
 0x2e2   : > { %v1533_v21 = vadd.f32 %v1501_v11, %v1469_v53  ;;  %v1534_v41 = vadd.f32 %v1502_v5, %v1470_v57  ;;  %v1535_v27 = vadd.f32 %v1503_v13, %v1471_v17  ;;  %v1536_v45 = vadd.f32 %v1504_v24, %v1472_v29  ;;  %v1523_v25 = vld [vmem:[%s2450_s9 + $0xf0] sm:$0xff]  ;;  %v1524_v48 = vld [vmem:[%s2450_s9 + $0xf8] sm:$0xff] }
 0x2e3   : > { %v1537_v42 = vadd.f32 %v1505_v54, %v1473_v32  ;;  %v1538_v38 = vadd.f32 %v1506_v60, %v1474_v33  ;;  %v1539_v59 = vadd.f32 %v1507_v10, %v1475_v36  ;;  %v1540_v16 = vadd.f32 %v1508_v12, %v1476_v37 }
 0x2e4   : > { %v1541_v11 = vadd.f32 %v1509_v28, %v1477_v50  ;;  %v1542_v53 = vadd.f32 %v1510_v22, %v1478_v51  ;;  %v1543_v5 = vadd.f32 %v1511_v26, %v1479_v56  ;;  %v1544_v57 = vadd.f32 %v1512_v31, %v1480_v9 }
 0x2e5   : > { %v2484_v13 = vadd.f32 %v1513_v52, %v1481_v62  ;;  %v2486_v17 = vadd.f32 %v1514_v55, %v1482_v19  ;;  %v2488_v29 = vadd.f32 %v1515_v58, %v1483_v2  ;;  %v2490_v24 = vadd.f32 %v1516_v14, %v1484_v6 }
 0x2e6   : > { %v2492_v32 = vadd.f32 %v1517_v18, %v1485_v20  ;;  %v2494_v33 = vadd.f32 %v1518_v40, %v1486_v23  ;;  %v2496_v36 = vadd.f32 %v1519_v30, %v1487_v3  ;;  %v2498_v37 = vadd.f32 %v1520_v47, %v1488_v63 }
 0x2e7   : > { %v2506_v50 = vadd.f32 %v1521_v35, %v1489_v1  ;;  %v2508_v51 = vadd.f32 %v1522_v44, %v1490_v7  ;;  %v2510_v56 = vadd.f32 %v1523_v25, %v1491_v8  ;;  %v2512_v9 = vadd.f32 %v1524_v48, %v1492_v15 }
 0x2e8   : > { %v1557_v62 = vmax.f32 %v1525_v34, 0.0  ;;  %v1558_v19 = vmax.f32 %v1526_v39, 0.0  ;;  %v1559_v2 = vmax.f32 %v1527_v43, 0.0  ;;  %v1560_v6 = vmax.f32 %v1528_v49, 0.0 }
 0x2e9   : > { %v1561_v20 = vmax.f32 %v1529_v46, 0.0  ;;  %v1562_v23 = vmax.f32 %v1530_v61, 0.0  ;;  %v1563_v3 = vmax.f32 %v1531_v0, 0.0  ;;  %v1564_v63 = vmax.f32 %v1532_v4, 0.0 }
 0x2ea   : > { %v1565_v54 = vmax.f32 %v1533_v21, 0.0  ;;  %v1566_v60 = vmax.f32 %v1534_v41, 0.0  ;;  %v1567_v1 = vmax.f32 %v1535_v27, 0.0  ;;  %v1568_v7 = vmax.f32 %v1536_v45, 0.0  ;;  %1589 = vst.msk [vmem:[%s2504_s12] sm:$0xff] %vm279_vm1, %v1557_v62  ;;  %1590 = vst.msk [vmem:[%s2504_s12 + $0x8] sm:$0xff] %vm279_vm1, %v1558_v19 }
 0x2eb   : > { %1591 = vst.msk [vmem:[%s2504_s12 + $0x10] sm:$0xff] %vm279_vm1, %v1559_v2  ;;  %1592 = vst.msk [vmem:[%s2504_s12 + $0x18] sm:$0xff] %vm279_vm1, %v1560_v6  ;;  %v1569_v8 = vmax.f32 %v1537_v42, 0.0  ;;  %v1570_v15 = vmax.f32 %v1538_v38, 0.0  ;;  %v1571_v10 = vmax.f32 %v1539_v59, 0.0  ;;  %v1572_v12 = vmax.f32 %v1540_v16, 0.0 }
 0x2ec   : > { %1593 = vst.msk [vmem:[%s2504_s12 + $0x20] sm:$0xff] %vm279_vm1, %v1561_v20  ;;  %1594 = vst.msk [vmem:[%s2504_s12 + $0x28] sm:$0xff] %vm279_vm1, %v1562_v23  ;;  %v1573_v28 = vmax.f32 %v1541_v11, 0.0  ;;  %v1574_v22 = vmax.f32 %v1542_v53, 0.0  ;;  %v1575_v26 = vmax.f32 %v1543_v5, 0.0  ;;  %v1576_v31 = vmax.f32 %v1544_v57, 0.0 }
 0x2ed   : > { %1595 = vst.msk [vmem:[%s2504_s12 + $0x30] sm:$0xff] %vm279_vm1, %v1563_v3  ;;  %1596 = vst.msk [vmem:[%s2504_s12 + $0x38] sm:$0xff] %vm279_vm1, %v1564_v63  ;;  %v1577_v34 = vmax.f32 %v2484_v13, 0.0  ;;  %v1578_v39 = vmax.f32 %v2486_v17, 0.0  ;;  %v1579_v43 = vmax.f32 %v2488_v29, 0.0  ;;  %v1580_v49 = vmax.f32 %v2490_v24, 0.0 }
 0x2ee   : > { %1597 = vst.msk [vmem:[%s2504_s12 + $0x40] sm:$0xff] %vm279_vm1, %v1565_v54  ;;  %1598 = vst.msk [vmem:[%s2504_s12 + $0x48] sm:$0xff] %vm279_vm1, %v1566_v60  ;;  %v1581_v52 = vmax.f32 %v2492_v32, 0.0  ;;  %v1582_v55 = vmax.f32 %v2494_v33, 0.0  ;;  %v1583_v58 = vmax.f32 %v2496_v36, 0.0  ;;  %v1584_v46 = vmax.f32 %v2498_v37, 0.0 }
 0x2ef   : > { %1599 = vst.msk [vmem:[%s2504_s12 + $0x50] sm:$0xff] %vm279_vm1, %v1567_v1  ;;  %1600 = vst.msk [vmem:[%s2504_s12 + $0x58] sm:$0xff] %vm279_vm1, %v1568_v7  ;;  %v1585_v61 = vmax.f32 %v2506_v50, 0.0  ;;  %v1586_v0 = vmax.f32 %v2508_v51, 0.0  ;;  %v1587_v4 = vmax.f32 %v2510_v56, 0.0  ;;  %v1588_v14 = vmax.f32 %v2512_v9, 0.0 }
 0x2f0   : > { %1601 = vst.msk [vmem:[%s2504_s12 + $0x60] sm:$0xff] %vm279_vm1, %v1569_v8  ;;  %1602 = vst.msk [vmem:[%s2504_s12 + $0x68] sm:$0xff] %vm279_vm1, %v1570_v15 }
 0x2f1   : > { %1603 = vst.msk [vmem:[%s2504_s12 + $0x70] sm:$0xff] %vm279_vm1, %v1571_v10  ;;  %1604 = vst.msk [vmem:[%s2504_s12 + $0x78] sm:$0xff] %vm279_vm1, %v1572_v12 }
 0x2f2   : > { %1605 = vst.msk [vmem:[%s2504_s12 + $0x80] sm:$0xff] %vm279_vm1, %v1573_v28  ;;  %1606 = vst.msk [vmem:[%s2504_s12 + $0x88] sm:$0xff] %vm279_vm1, %v1574_v22 }
 0x2f3   : > { %1607 = vst.msk [vmem:[%s2504_s12 + $0x90] sm:$0xff] %vm279_vm1, %v1575_v26  ;;  %1608 = vst.msk [vmem:[%s2504_s12 + $0x98] sm:$0xff] %vm279_vm1, %v1576_v31 }
 0x2f4   : > { %1609 = vst.msk [vmem:[%s2504_s12 + $0xa0] sm:$0xff] %vm279_vm1, %v1577_v34  ;;  %1610 = vst.msk [vmem:[%s2504_s12 + $0xa8] sm:$0xff] %vm279_vm1, %v1578_v39 }
 0x2f5   : > { %1611 = vst.msk [vmem:[%s2504_s12 + $0xb0] sm:$0xff] %vm279_vm1, %v1579_v43  ;;  %1612 = vst.msk [vmem:[%s2504_s12 + $0xb8] sm:$0xff] %vm279_vm1, %v1580_v49 }
 0x2f6   : > { %1613 = vst.msk [vmem:[%s2504_s12 + $0xc0] sm:$0xff] %vm279_vm1, %v1581_v52  ;;  %1614 = vst.msk [vmem:[%s2504_s12 + $0xc8] sm:$0xff] %vm279_vm1, %v1582_v55 }
 0x2f7   : > { %1615 = vst.msk [vmem:[%s2504_s12 + $0xd0] sm:$0xff] %vm279_vm1, %v1583_v58  ;;  %1616 = vst.msk [vmem:[%s2504_s12 + $0xd8] sm:$0xff] %vm279_vm1, %v1584_v46 }
 0x2f8   : > { %1617 = vst.msk [vmem:[%s2504_s12 + $0xe0] sm:$0xff] %vm279_vm1, %v1585_v61  ;;  %1618 = vst.msk [vmem:[%s2504_s12 + $0xe8] sm:$0xff] %vm279_vm1, %v1586_v0 }
 0x2f9   : > { %1619 = vst.msk [vmem:[%s2504_s12 + $0xf0] sm:$0xff] %vm279_vm1, %v1587_v4  ;;  %1620 = vst.msk [vmem:[%s2504_s12 + $0xf8] sm:$0xff] %vm279_vm1, %v1588_v14 }
 0x2fa PF: > { %s15_s18 = sadd.s32 1, %s1900_s18  }
 0x2fb   : > { %p12_p4 = scmp.ge.s32.totalorder %s15_s18, 4  }
 0x2fd   :  { %14 = sbr.rel (!%p12_p4) target bundleno = 1 (0x1), region = 73 }

</bundles_post_ra>
